<compile_context>
chip_gen: v7x
topology: tpu7x:2x2x1
jax: 0.10.0
libtpu: 0.0.40
codegen_flags: <defaults>
</compile_context>

<pallas_src>
import functools

import jax
import jax.numpy as jnp
from jax.experimental import pallas as pl
from jax.experimental.pallas import tpu as pltpu


def _slstm_kernel(x_ref, w_ih0_ref, w_hh_ref, w_ihr_ref, b_ref, gamma_ref, beta_ref,
                  h_ref, c_ref, xproj_scr,
                  *, chunk, num_layers, batch, hidden_size, eps, wdtype):
    L, B, H = num_layers, batch, hidden_size
    G = 4 * H

    # init_hidden(batch) -> zeros on the first chunk; h/c are VMEM-resident output
    # blocks (same block index every grid step) and carry state across chunks.
    @pl.when(pl.program_id(0) == 0)
    def _():
        h_ref[...] = jnp.zeros_like(h_ref)
        c_ref[...] = jnp.zeros_like(c_ref)

    # Hoisted layer-0 input projection for this time chunk: one MXU matmul with
    # M = chunk*B instead of `chunk` tiny M=B matmuls.  b[0] is folded in here so the
    # per-timestep layer-0 gates need no broadcast-add.
    xproj_scr[...] = (jnp.dot(x_ref[...], w_ih0_ref[...],
                              preferred_element_type=jnp.float32)
                      + b_ref[0])

    # Per-layer constants hoisted out of the (unrolled) time loop: JAX does not CSE
    # broadcast_in_dim, so broadcast once per chunk, not once per timestep.
    inv_g = jnp.float32(1.0 / G)
    gam = [jnp.broadcast_to(gamma_ref[l], (B, G)) for l in range(L)]
    bet = [jnp.broadcast_to(beta_ref[l], (B, G)) for l in range(L)]
    bia = [jnp.broadcast_to(b_ref[l], (B, G)) for l in range(1, L)]   # b[0] folded above

    def cell(gates, l):
        # LayerNorm over the 4H gate dim (nn.LayerNorm, eps=1e-5, affine).
        # Two *independent* cross-lane reductions (sum, sum-of-squares); var = E[x^2]-mu^2.
        s1 = jnp.sum(gates, axis=-1, keepdims=True)
        s2 = jnp.sum(gates * gates, axis=-1, keepdims=True)
        mu = s1 * inv_g
        var = s2 * inv_g - mu * mu
        gates = (gates - mu) * jax.lax.rsqrt(var + eps) * gam[l] + bet[l]
        # H is a multiple of 128 -> each gate slice is whole-vreg lane-aligned.
        i_g = jnp.exp(gates[:, 0 * H:1 * H])          # exponential (stabilized) input gate
        f_g = jax.nn.sigmoid(gates[:, 1 * H:2 * H])
        g_g = jnp.tanh(gates[:, 2 * H:3 * H])
        o_g = jax.nn.sigmoid(gates[:, 3 * H:4 * H])
        c_new = f_g * c_ref[l] + i_g * g_g
        h_new = o_g * jnp.tanh(c_new)
        c_ref[l] = c_new
        h_ref[l] = h_new
        return h_new

    # chunk is small and static -> static unroll is the bounded unroll (code size grows
    # with chunk, not T; large T grows only the grid).
    for t in range(chunk):
        row = t * B
        # Layer 0: precomputed input projection (+bias) + recurrent projection.
        gates0 = (xproj_scr[pl.ds(row, B), :]
                  + jnp.dot(h_ref[0].astype(wdtype), w_hh_ref[0],
                            preferred_element_type=jnp.float32))
        h_prev = cell(gates0, 0)
        # Layers 1..L-1: two accumulating dots (no concat temp); weights pre-transposed.
        for l in range(1, L):                           # static unroll over layers
            gates = (jnp.dot(h_prev.astype(wdtype), w_ihr_ref[l - 1],
                             preferred_element_type=jnp.float32)
                     + jnp.dot(h_ref[l].astype(wdtype), w_hh_ref[l],
                               preferred_element_type=jnp.float32)
                     + bia[l - 1])
            h_prev = cell(gates, l)                     # dropout p=0 -> identity


def slstm_network_forward(x, params, *, chunk=None, weight_dtype=jnp.bfloat16):
    """x: (T, B, I) -> (out (B, O), (h (L, B, H), c (L, B, H)))."""
    T, B, I = x.shape
    w_ih0 = params["w_ih0"]        # (4H, I)
    w_ihr = params["w_ihr"]        # (L-1, 4H, H)
    w_hh = params["w_hh"]          # (L, 4H, H)
    b = params["b"]                # (L, 1, 4H)
    gamma = params["gamma"]        # (L, 1, 4H)
    beta = params["beta"]          # (L, 1, 4H)
    w_fc = params["w_fc"]          # (O, H)
    b_fc = params["b_fc"]          # (1, O)
    L, _, H = w_hh.shape
    O = w_fc.shape[0]
    assert L >= 2, "layer>0 input weights are packed as a stacked array"

    if chunk is None:
        chunk = min(T, 8)
    assert T % chunk == 0, "demo requires T to be a multiple of the time chunk"
    n_chunks = T // chunk

    # One-time host/XLA-side layout prep:
    #   * flatten x so the layer-0 projection is one big matmul per chunk,
    #   * pre-transpose every weight (no .T / transpose inside the kernel),
    #   * bf16 weights (and bf16 x) for the MXU; accumulation stays f32.
    x_flat = x.reshape(T * B, I).astype(weight_dtype)
    w_ih0_t = w_ih0.T.astype(weight_dtype)                        # (I, 4H)
    w_hh_t = jnp.transpose(w_hh, (0, 2, 1)).astype(weight_dtype)  # (L, H, 4H)
    w_ihr_t = jnp.transpose(w_ihr, (0, 2, 1)).astype(weight_dtype)  # (L-1, H, 4H)

    kernel = functools.partial(_slstm_kernel, chunk=chunk, num_layers=L, batch=B,
                               hidden_size=H, eps=1e-5, wdtype=weight_dtype)

    def full(arr):
        nd = arr.ndim
        return pl.BlockSpec(arr.shape, lambda n, _nd=nd: (0,) * _nd)

    grid_spec = pltpu.PrefetchScalarGridSpec(
        num_scalar_prefetch=0,
        grid=(n_chunks,),                               # sequential time chunks
        in_specs=[
            pl.BlockSpec((chunk * B, I), lambda n: (n, 0)),   # x: DMA'd per chunk
            full(w_ih0_t), full(w_hh_t), full(w_ihr_t),       # constant-index weights
            full(b), full(gamma), full(beta),
        ],
        out_specs=[
            pl.BlockSpec((L, B, H), lambda n: (0, 0, 0)),     # h: resident accumulator
            pl.BlockSpec((L, B, H), lambda n: (0, 0, 0)),     # c: resident accumulator
        ],
        scratch_shapes=[pltpu.VMEM((chunk * B, 4 * H), jnp.float32)],  # chunk x-projection
    )

    # vmem limit sized from actual residency (inputs double-buffered) with 2x headroom.
    itemsize = jnp.dtype(weight_dtype).itemsize
    wbytes = (w_ih0_t.size + w_hh_t.size + w_ihr_t.size) * itemsize
    resident = (2 * chunk * B * I * itemsize          # x chunk (double-buffered)
                + 2 * wbytes                          # weights (worst-case 2 buffers)
                + chunk * B * 4 * H * 4               # xproj scratch (f32)
                + 2 * L * B * H * 4 * 2               # h, c output blocks (f32)
                + 3 * L * 4 * H * 4 * 2)              # b / gamma / beta
    vmem_limit = int(min(128 << 20, max(2 * resident, 16 << 20)))

    h, c = pl.pallas_call(
        kernel,
        out_shape=(jax.ShapeDtypeStruct((L, B, H), jnp.float32),
                   jax.ShapeDtypeStruct((L, B, H), jnp.float32)),
        grid_spec=grid_spec,
        compiler_params=pltpu.CompilerParams(
            dimension_semantics=("arbitrary",),       # sequential recurrence over chunks
            vmem_limit_bytes=vmem_limit),
    )(x_flat, w_ih0_t, w_hh_t, w_ihr_t, b, gamma, beta)

    # output = fc(output[-1]); O=8 < 128 lanes, so keep this tiny matmul as a plain XLA
    # op outside the kernel (avoids a masked lane-partial store inside the kernel).
    out = jnp.dot(h[L - 1], w_fc.T) + b_fc
    return out, (h, c)


def make_params(key, input_size, hidden_size, num_layers, output_size):
    """Deterministic nn.Linear-style init: U(-1/sqrt(fan_in), 1/sqrt(fan_in))."""
    H, I, L, O = hidden_size, input_size, num_layers, output_size
    ks = jax.random.split(key, 8)

    def uni(k, shape, fan_in):
        bound = 1.0 / jnp.sqrt(fan_in)
        return jax.random.uniform(k, shape, jnp.float32, -bound, bound)

    return {
        "w_ih0": uni(ks[0], (4 * H, I), I),
        "w_ihr": uni(ks[1], (L - 1, 4 * H, H), H),
        "w_hh": uni(ks[2], (L, 4 * H, H), H),
        "b":    uni(ks[3], (L, 1, 4 * H), H),
        "gamma": jnp.ones((L, 1, 4 * H), jnp.float32),
        "beta":  jnp.zeros((L, 1, 4 * H), jnp.float32),
        "w_fc": uni(ks[4], (O, H), H),
        "b_fc": uni(ks[5], (1, O), H),
    }


def ref_forward(x, params, weight_dtype=jnp.bfloat16):
    """Pure-JAX reference of the same forward pass (original weight layout), using the
    same bf16-weight / f32-accumulation precision as the kernel."""
    T, B, I = x.shape
    L, _, H = params["w_hh"].shape
    eps = 1e-5
    h = jnp.zeros((L, B, H), jnp.float32)
    c = jnp.zeros((L, B, H), jnp.float32)
    w_ih = [params["w_ih0"].astype(weight_dtype)] + [
        params["w_ihr"][l - 1].astype(weight_dtype) for l in range(1, L)]
    w_hh = [params["w_hh"][l].astype(weight_dtype) for l in range(L)]
    inp = None
    for t in range(T):
        inp = x[t]
        for l in range(L):
            gates = (jnp.dot(inp.astype(weight_dtype), w_ih[l].T,
                             preferred_element_type=jnp.float32)
                     + jnp.dot(h[l].astype(weight_dtype), w_hh[l].T,
                               preferred_element_type=jnp.float32)
                     + params["b"][l])
            mu = gates.mean(-1, keepdims=True)
            var = ((gates - mu) ** 2).mean(-1, keepdims=True)
            gates = (gates - mu) / jnp.sqrt(var + eps) * params["gamma"][l] + params["beta"][l]
            i_g = jnp.exp(gates[:, :H])
            f_g = jax.nn.sigmoid(gates[:, H:2 * H])
            g_g = jnp.tanh(gates[:, 2 * H:3 * H])
            o_g = jax.nn.sigmoid(gates[:, 3 * H:])
            c_new = f_g * c[l] + i_g * g_g
            h_new = o_g * jnp.tanh(c_new)
            c = c.at[l].set(c_new)
            h = h.at[l].set(h_new)
            inp = h_new
    out = jnp.dot(inp, params["w_fc"].T) + params["b_fc"]
    return out, (h, c)


if __name__ == "__main__":
    # small shapes consistent with the module: seq=8, batch=8, input=32, hidden=128,
    # layers=2, out=8 (H multiple of 128 keeps gate slices lane-aligned).
    T, B, I, H, L, O = 8, 8, 32, 128, 2, 8
    key = jax.random.PRNGKey(0)
    kx, kp = jax.random.split(key)
    x = jax.random.normal(kx, (T, B, I), jnp.float32)
    params = make_params(kp, I, H, L, O)

    # chunk=4 -> grid=(2,): exercises state carry across grid steps + x pipelining.
    out, (h, c) = slstm_network_forward(x, params, chunk=4)
    jax.block_until_ready((out, h, c))

    out_r, (h_r, c_r) = ref_forward(x, params)
    assert out.shape == (B, O) and h.shape == (L, B, H) and c.shape == (L, B, H)
    assert jnp.allclose(out, out_r, rtol=3e-3, atol=3e-3), \
        float(jnp.max(jnp.abs(out - out_r)))
    assert jnp.allclose(h, h_r, rtol=3e-3, atol=3e-3), \
        float(jnp.max(jnp.abs(h - h_r)))
    assert jnp.allclose(c, c_r, rtol=3e-3, atol=3e-3), \
        float(jnp.max(jnp.abs(c - c_r)))

    print("KERNEL_OK")
</pallas_src>

<mosaic_0001>
module attributes {stable_mosaic.version = 11 : i64} {
  func.func @_slstm_kernel(%arg0: i32, %arg1: memref<32x32xbf16, #tpu.memory_space<vmem>>, %arg2: memref<32x512xbf16, #tpu.memory_space<vmem>>, %arg3: memref<2x128x512xbf16, #tpu.memory_space<vmem>>, %arg4: memref<1x128x512xbf16, #tpu.memory_space<vmem>>, %arg5: memref<2x1x512xf32, #tpu.memory_space<vmem>>, %arg6: memref<2x1x512xf32, #tpu.memory_space<vmem>>, %arg7: memref<2x1x512xf32, #tpu.memory_space<vmem>>, %arg8: memref<2x8x128xf32, #tpu.memory_space<vmem>>, %arg9: memref<2x8x128xf32, #tpu.memory_space<vmem>>, %arg10: memref<32x512xf32, #tpu.memory_space<vmem>>) attributes {dimension_semantics = [#tpu.dimension_semantics<arbitrary>], iteration_bounds = array<i64: 2>, scalar_prefetch = 0 : i64, scratch_operands = 1 : i64, tpu.core_type = #tpu.core_type<tc>, window_params = [{transform_indices = @transform_0, window_bounds = array<i64: 32, 32>}, {pipeline_mode = #tpu.pipeline_mode<synchronous>, transform_indices = @transform_1, window_bounds = array<i64: 32, 512>}, {pipeline_mode = #tpu.pipeline_mode<synchronous>, transform_indices = @transform_2, window_bounds = array<i64: 2, 128, 512>}, {pipeline_mode = #tpu.pipeline_mode<synchronous>, transform_indices = @transform_3, window_bounds = array<i64: 1, 128, 512>}, {pipeline_mode = #tpu.pipeline_mode<synchronous>, transform_indices = @transform_4, window_bounds = array<i64: 2, 1, 512>}, {pipeline_mode = #tpu.pipeline_mode<synchronous>, transform_indices = @transform_5, window_bounds = array<i64: 2, 1, 512>}, {pipeline_mode = #tpu.pipeline_mode<synchronous>, transform_indices = @transform_6, window_bounds = array<i64: 2, 1, 512>}, {pipeline_mode = #tpu.pipeline_mode<synchronous>, transform_indices = @transform_7, window_bounds = array<i64: 2, 8, 128>}, {pipeline_mode = #tpu.pipeline_mode<synchronous>, transform_indices = @transform_8, window_bounds = array<i64: 2, 8, 128>}]} {
    %c0_i32 = arith.constant 0 : i32
    %0 = arith.cmpi eq, %arg0, %c0_i32 : i32
    %1 = arith.extui %0 : i1 to i32
    %c0_i32_0 = arith.constant 0 : i32
    %2 = arith.cmpi ne, %1, %c0_i32_0 : i32
    scf.if %2 {
      %cst_228 = arith.constant 0.000000e+00 : f32
      %503 = vector.broadcast %cst_228 : f32 to vector<2x8x128xf32>
      %c0_229 = arith.constant 0 : index
      %c0_230 = arith.constant 0 : index
      %c0_231 = arith.constant 0 : index
      %504 = vector.load %arg8[%c0_229, %c0_230, %c0_231] : memref<2x8x128xf32, #tpu.memory_space<vmem>>, vector<2x8x128xf32>
      tpu.vector_store %arg8[%c0_229, %c0_230, %c0_231], %503 {strides = array<i32>} : memref<2x8x128xf32, #tpu.memory_space<vmem>>, vector<2x8x128xf32>,
      %cst_232 = arith.constant 0.000000e+00 : f32
      %505 = vector.broadcast %cst_232 : f32 to vector<2x8x128xf32>
      %c0_233 = arith.constant 0 : index
      %c0_234 = arith.constant 0 : index
      %c0_235 = arith.constant 0 : index
      %506 = vector.load %arg9[%c0_233, %c0_234, %c0_235] : memref<2x8x128xf32, #tpu.memory_space<vmem>>, vector<2x8x128xf32>
      tpu.vector_store %arg9[%c0_233, %c0_234, %c0_235], %505 {strides = array<i32>} : memref<2x8x128xf32, #tpu.memory_space<vmem>>, vector<2x8x128xf32>,
    } else {
    }
    %c0 = arith.constant 0 : index
    %c0_1 = arith.constant 0 : index
    %3 = vector.load %arg1[%c0, %c0_1] : memref<32x32xbf16, #tpu.memory_space<vmem>>, vector<32x32xbf16>
    %c0_2 = arith.constant 0 : index
    %c0_3 = arith.constant 0 : index
    %4 = vector.load %arg2[%c0_2, %c0_3] : memref<32x512xbf16, #tpu.memory_space<vmem>>, vector<32x512xbf16>
    %cst = arith.constant dense<0.000000e+00> : vector<32x512xf32>
    %5 = tpu.matmul %3, %4, %cst {dimension_numbers = #tpu.dot_dimension_numbers<[1], [0], [0], [1], [0, 0, 1, 1], [], []>} : vector<32x32xbf16>, vector<32x512xbf16>, vector<32x512xf32> -> vector<32x512xf32>
    %c0_4 = arith.constant 0 : index
    %c0_5 = arith.constant 0 : index
    %c0_6 = arith.constant 0 : index
    %6 = vector.load %arg5[%c0_4, %c0_5, %c0_6] : memref<2x1x512xf32, #tpu.memory_space<vmem>>, vector<1x1x512xf32>
    %7 = vector.shape_cast %6 : vector<1x1x512xf32> to vector<1x512xf32>
    %8 = vector.broadcast %7 : vector<1x512xf32> to vector<32x512xf32>
    %9 = arith.addf %5, %8 : vector<32x512xf32>
    %c0_7 = arith.constant 0 : index
    %c0_8 = arith.constant 0 : index
    %10 = vector.load %arg10[%c0_7, %c0_8] : memref<32x512xf32, #tpu.memory_space<vmem>>, vector<32x512xf32>
    tpu.vector_store %arg10[%c0_7, %c0_8], %9 {strides = array<i32>} : memref<32x512xf32, #tpu.memory_space<vmem>>, vector<32x512xf32>,
    %c0_9 = arith.constant 0 : index
    %c0_10 = arith.constant 0 : index
    %c0_11 = arith.constant 0 : index
    %11 = vector.load %arg6[%c0_9, %c0_10, %c0_11] : memref<2x1x512xf32, #tpu.memory_space<vmem>>, vector<1x1x512xf32>
    %12 = vector.shape_cast %11 : vector<1x1x512xf32> to vector<1x512xf32>
    %13 = vector.shape_cast %12 : vector<1x512xf32> to vector<1x512xf32>
    %14 = vector.broadcast %13 : vector<1x512xf32> to vector<8x512xf32>
    %c1 = arith.constant 1 : index
    %c0_12 = arith.constant 0 : index
    %c0_13 = arith.constant 0 : index
    %15 = vector.load %arg6[%c1, %c0_12, %c0_13] : memref<2x1x512xf32, #tpu.memory_space<vmem>>, vector<1x1x512xf32>
    %16 = vector.shape_cast %15 : vector<1x1x512xf32> to vector<1x512xf32>
    %17 = vector.shape_cast %16 : vector<1x512xf32> to vector<1x512xf32>
    %18 = vector.broadcast %17 : vector<1x512xf32> to vector<8x512xf32>
    %c0_14 = arith.constant 0 : index
    %c0_15 = arith.constant 0 : index
    %c0_16 = arith.constant 0 : index
    %19 = vector.load %arg7[%c0_14, %c0_15, %c0_16] : memref<2x1x512xf32, #tpu.memory_space<vmem>>, vector<1x1x512xf32>
    %20 = vector.shape_cast %19 : vector<1x1x512xf32> to vector<1x512xf32>
    %21 = vector.shape_cast %20 : vector<1x512xf32> to vector<1x512xf32>
    %22 = vector.broadcast %21 : vector<1x512xf32> to vector<8x512xf32>
    %c1_17 = arith.constant 1 : index
    %c0_18 = arith.constant 0 : index
    %c0_19 = arith.constant 0 : index
    %23 = vector.load %arg7[%c1_17, %c0_18, %c0_19] : memref<2x1x512xf32, #tpu.memory_space<vmem>>, vector<1x1x512xf32>
    %24 = vector.shape_cast %23 : vector<1x1x512xf32> to vector<1x512xf32>
    %25 = vector.shape_cast %24 : vector<1x512xf32> to vector<1x512xf32>
    %26 = vector.broadcast %25 : vector<1x512xf32> to vector<8x512xf32>
    %c1_20 = arith.constant 1 : index
    %c0_21 = arith.constant 0 : index
    %c0_22 = arith.constant 0 : index
    %27 = vector.load %arg5[%c1_20, %c0_21, %c0_22] : memref<2x1x512xf32, #tpu.memory_space<vmem>>, vector<1x1x512xf32>
    %28 = vector.shape_cast %27 : vector<1x1x512xf32> to vector<1x512xf32>
    %29 = vector.shape_cast %28 : vector<1x512xf32> to vector<1x512xf32>
    %30 = vector.broadcast %29 : vector<1x512xf32> to vector<8x512xf32>
    %c0_23 = arith.constant 0 : index
    %c0_24 = arith.constant 0 : index
    %31 = vector.load %arg10[%c0_23, %c0_24] : memref<32x512xf32, #tpu.memory_space<vmem>>, vector<8x512xf32>
    %c0_25 = arith.constant 0 : index
    %c0_26 = arith.constant 0 : index
    %c0_27 = arith.constant 0 : index
    %32 = vector.load %arg8[%c0_25, %c0_26, %c0_27] : memref<2x8x128xf32, #tpu.memory_space<vmem>>, vector<1x8x128xf32>
    %33 = vector.shape_cast %32 : vector<1x8x128xf32> to vector<8x128xf32>
    %34 = arith.truncf %33 : vector<8x128xf32> to vector<8x128xbf16>
    %c0_28 = arith.constant 0 : index
    %c0_29 = arith.constant 0 : index
    %c0_30 = arith.constant 0 : index
    %35 = vector.load %arg3[%c0_28, %c0_29, %c0_30] : memref<2x128x512xbf16, #tpu.memory_space<vmem>>, vector<1x128x512xbf16>
    %36 = vector.shape_cast %35 : vector<1x128x512xbf16> to vector<128x512xbf16>
    %cst_31 = arith.constant dense<0.000000e+00> : vector<8x512xf32>
    %37 = tpu.matmul %34, %36, %cst_31 {dimension_numbers = #tpu.dot_dimension_numbers<[1], [0], [0], [1], [0, 0, 1, 1], [], []>} : vector<8x128xbf16>, vector<128x512xbf16>, vector<8x512xf32> -> vector<8x512xf32>
    %38 = arith.addf %31, %37 : vector<8x512xf32>
    %cst_32 = arith.constant dense<0.000000e+00> : vector<8xf32>
    %39 = vector.multi_reduction <add>, %38, %cst_32 [1] : vector<8x512xf32> to vector<8xf32>
    %40 = vector.shape_cast %39 : vector<8xf32> to vector<8x1xf32>
    %41 = arith.mulf %38, %38 : vector<8x512xf32>
    %cst_33 = arith.constant dense<0.000000e+00> : vector<8xf32>
    %42 = vector.multi_reduction <add>, %41, %cst_33 [1] : vector<8x512xf32> to vector<8xf32>
    %43 = vector.shape_cast %42 : vector<8xf32> to vector<8x1xf32>
    %cst_34 = arith.constant 0.001953125 : f32
    %44 = vector.broadcast %cst_34 : f32 to vector<8x1xf32>
    %45 = arith.mulf %40, %44 : vector<8x1xf32>
    %cst_35 = arith.constant 0.001953125 : f32
    %46 = vector.broadcast %cst_35 : f32 to vector<8x1xf32>
    %47 = arith.mulf %43, %46 : vector<8x1xf32>
    %48 = arith.mulf %45, %45 : vector<8x1xf32>
    %49 = arith.subf %47, %48 : vector<8x1xf32>
    %50 = vector.broadcast %45 : vector<8x1xf32> to vector<8x512xf32>
    %51 = arith.subf %38, %50 : vector<8x512xf32>
    %cst_36 = arith.constant 9.99999974E-6 : f32
    %52 = vector.broadcast %cst_36 : f32 to vector<8x1xf32>
    %53 = arith.addf %49, %52 : vector<8x1xf32>
    %54 = math.rsqrt %53 : vector<8x1xf32>
    %55 = vector.broadcast %54 : vector<8x1xf32> to vector<8x512xf32>
    %56 = arith.mulf %51, %55 : vector<8x512xf32>
    %57 = arith.mulf %56, %14 : vector<8x512xf32>
    %58 = arith.addf %57, %22 : vector<8x512xf32>
    %59 = vector.extract_strided_slice %58 {offsets = [0, 0], sizes = [8, 128], strides = [1, 1]} : vector<8x512xf32> to vector<8x128xf32>
    %60 = math.exp %59 : vector<8x128xf32>
    %61 = vector.extract_strided_slice %58 {offsets = [0, 128], sizes = [8, 128], strides = [1, 1]} : vector<8x512xf32> to vector<8x128xf32>
    %62 = arith.negf %61 : vector<8x128xf32>
    %63 = math.exp %62 : vector<8x128xf32>
    %cst_37 = arith.constant 1.000000e+00 : f32
    %64 = vector.broadcast %cst_37 : f32 to vector<8x128xf32>
    %65 = arith.addf %64, %63 : vector<8x128xf32>
    %66 = arith.divf %64, %65 : vector<8x128xf32>
    %67 = vector.extract_strided_slice %58 {offsets = [0, 256], sizes = [8, 128], strides = [1, 1]} : vector<8x512xf32> to vector<8x128xf32>
    %68 = math.tanh %67 : vector<8x128xf32>
    %69 = vector.extract_strided_slice %58 {offsets = [0, 384], sizes = [8, 128], strides = [1, 1]} : vector<8x512xf32> to vector<8x128xf32>
    %70 = arith.negf %69 : vector<8x128xf32>
    %71 = math.exp %70 : vector<8x128xf32>
    %cst_38 = arith.constant 1.000000e+00 : f32
    %72 = vector.broadcast %cst_38 : f32 to vector<8x128xf32>
    %73 = arith.addf %72, %71 : vector<8x128xf32>
    %74 = arith.divf %72, %73 : vector<8x128xf32>
    %c0_39 = arith.constant 0 : index
    %c0_40 = arith.constant 0 : index
    %c0_41 = arith.constant 0 : index
    %75 = vector.load %arg9[%c0_39, %c0_40, %c0_41] : memref<2x8x128xf32, #tpu.memory_space<vmem>>, vector<1x8x128xf32>
    %76 = vector.shape_cast %75 : vector<1x8x128xf32> to vector<8x128xf32>
    %77 = arith.mulf %66, %76 : vector<8x128xf32>
    %78 = arith.mulf %60, %68 : vector<8x128xf32>
    %79 = arith.addf %77, %78 : vector<8x128xf32>
    %80 = math.tanh %79 : vector<8x128xf32>
    %81 = arith.mulf %74, %80 : vector<8x128xf32>
    %c0_42 = arith.constant 0 : index
    %c0_43 = arith.constant 0 : index
    %c0_44 = arith.constant 0 : index
    %82 = vector.load %arg9[%c0_42, %c0_43, %c0_44] : memref<2x8x128xf32, #tpu.memory_space<vmem>>, vector<1x8x128xf32>
    %83 = vector.shape_cast %82 : vector<1x8x128xf32> to vector<8x128xf32>
    %84 = vector.shape_cast %79 : vector<8x128xf32> to vector<1x8x128xf32>
    tpu.vector_store %arg9[%c0_42, %c0_43, %c0_44], %84 {strides = array<i32>} : memref<2x8x128xf32, #tpu.memory_space<vmem>>, vector<1x8x128xf32>,
    %c0_45 = arith.constant 0 : index
    %c0_46 = arith.constant 0 : index
    %c0_47 = arith.constant 0 : index
    %85 = vector.load %arg8[%c0_45, %c0_46, %c0_47] : memref<2x8x128xf32, #tpu.memory_space<vmem>>, vector<1x8x128xf32>
    %86 = vector.shape_cast %85 : vector<1x8x128xf32> to vector<8x128xf32>
    %87 = vector.shape_cast %81 : vector<8x128xf32> to vector<1x8x128xf32>
    tpu.vector_store %arg8[%c0_45, %c0_46, %c0_47], %87 {strides = array<i32>} : memref<2x8x128xf32, #tpu.memory_space<vmem>>, vector<1x8x128xf32>,
    %88 = arith.truncf %81 : vector<8x128xf32> to vector<8x128xbf16>
    %c0_48 = arith.constant 0 : index
    %c0_49 = arith.constant 0 : index
    %c0_50 = arith.constant 0 : index
    %89 = vector.load %arg4[%c0_48, %c0_49, %c0_50] : memref<1x128x512xbf16, #tpu.memory_space<vmem>>, vector<1x128x512xbf16>
    %90 = vector.shape_cast %89 : vector<1x128x512xbf16> to vector<128x512xbf16>
    %cst_51 = arith.constant dense<0.000000e+00> : vector<8x512xf32>
    %91 = tpu.matmul %88, %90, %cst_51 {dimension_numbers = #tpu.dot_dimension_numbers<[1], [0], [0], [1], [0, 0, 1, 1], [], []>} : vector<8x128xbf16>, vector<128x512xbf16>, vector<8x512xf32> -> vector<8x512xf32>
    %c1_52 = arith.constant 1 : index
    %c0_53 = arith.constant 0 : index
    %c0_54 = arith.constant 0 : index
    %92 = vector.load %arg8[%c1_52, %c0_53, %c0_54] : memref<2x8x128xf32, #tpu.memory_space<vmem>>, vector<1x8x128xf32>
    %93 = vector.shape_cast %92 : vector<1x8x128xf32> to vector<8x128xf32>
    %94 = arith.truncf %93 : vector<8x128xf32> to vector<8x128xbf16>
    %c1_55 = arith.constant 1 : index
    %c0_56 = arith.constant 0 : index
    %c0_57 = arith.constant 0 : index
    %95 = vector.load %arg3[%c1_55, %c0_56, %c0_57] : memref<2x128x512xbf16, #tpu.memory_space<vmem>>, vector<1x128x512xbf16>
    %96 = vector.shape_cast %95 : vector<1x128x512xbf16> to vector<128x512xbf16>
    %cst_58 = arith.constant dense<0.000000e+00> : vector<8x512xf32>
    %97 = tpu.matmul %94, %96, %cst_58 {dimension_numbers = #tpu.dot_dimension_numbers<[1], [0], [0], [1], [0, 0, 1, 1], [], []>} : vector<8x128xbf16>, vector<128x512xbf16>, vector<8x512xf32> -> vector<8x512xf32>
    %98 = arith.addf %91, %97 : vector<8x512xf32>
    %99 = arith.addf %98, %30 : vector<8x512xf32>
    %cst_59 = arith.constant dense<0.000000e+00> : vector<8xf32>
    %100 = vector.multi_reduction <add>, %99, %cst_59 [1] : vector<8x512xf32> to vector<8xf32>
    %101 = vector.shape_cast %100 : vector<8xf32> to vector<8x1xf32>
    %102 = arith.mulf %99, %99 : vector<8x512xf32>
    %cst_60 = arith.constant dense<0.000000e+00> : vector<8xf32>
    %103 = vector.multi_reduction <add>, %102, %cst_60 [1] : vector<8x512xf32> to vector<8xf32>
    %104 = vector.shape_cast %103 : vector<8xf32> to vector<8x1xf32>
    %cst_61 = arith.constant 0.001953125 : f32
    %105 = vector.broadcast %cst_61 : f32 to vector<8x1xf32>
    %106 = arith.mulf %101, %105 : vector<8x1xf32>
    %cst_62 = arith.constant 0.001953125 : f32
    %107 = vector.broadcast %cst_62 : f32 to vector<8x1xf32>
    %108 = arith.mulf %104, %107 : vector<8x1xf32>
    %109 = arith.mulf %106, %106 : vector<8x1xf32>
    %110 = arith.subf %108, %109 : vector<8x1xf32>
    %111 = vector.broadcast %106 : vector<8x1xf32> to vector<8x512xf32>
    %112 = arith.subf %99, %111 : vector<8x512xf32>
    %cst_63 = arith.constant 9.99999974E-6 : f32
    %113 = vector.broadcast %cst_63 : f32 to vector<8x1xf32>
    %114 = arith.addf %110, %113 : vector<8x1xf32>
    %115 = math.rsqrt %114 : vector<8x1xf32>
    %116 = vector.broadcast %115 : vector<8x1xf32> to vector<8x512xf32>
    %117 = arith.mulf %112, %116 : vector<8x512xf32>
    %118 = arith.mulf %117, %18 : vector<8x512xf32>
    %119 = arith.addf %118, %26 : vector<8x512xf32>
    %120 = vector.extract_strided_slice %119 {offsets = [0, 0], sizes = [8, 128], strides = [1, 1]} : vector<8x512xf32> to vector<8x128xf32>
    %121 = math.exp %120 : vector<8x128xf32>
    %122 = vector.extract_strided_slice %119 {offsets = [0, 128], sizes = [8, 128], strides = [1, 1]} : vector<8x512xf32> to vector<8x128xf32>
    %123 = arith.negf %122 : vector<8x128xf32>
    %124 = math.exp %123 : vector<8x128xf32>
    %cst_64 = arith.constant 1.000000e+00 : f32
    %125 = vector.broadcast %cst_64 : f32 to vector<8x128xf32>
    %126 = arith.addf %125, %124 : vector<8x128xf32>
    %127 = arith.divf %125, %126 : vector<8x128xf32>
    %128 = vector.extract_strided_slice %119 {offsets = [0, 256], sizes = [8, 128], strides = [1, 1]} : vector<8x512xf32> to vector<8x128xf32>
    %129 = math.tanh %128 : vector<8x128xf32>
    %130 = vector.extract_strided_slice %119 {offsets = [0, 384], sizes = [8, 128], strides = [1, 1]} : vector<8x512xf32> to vector<8x128xf32>
    %131 = arith.negf %130 : vector<8x128xf32>
    %132 = math.exp %131 : vector<8x128xf32>
    %cst_65 = arith.constant 1.000000e+00 : f32
    %133 = vector.broadcast %cst_65 : f32 to vector<8x128xf32>
    %134 = arith.addf %133, %132 : vector<8x128xf32>
    %135 = arith.divf %133, %134 : vector<8x128xf32>
    %c1_66 = arith.constant 1 : index
    %c0_67 = arith.constant 0 : index
    %c0_68 = arith.constant 0 : index
    %136 = vector.load %arg9[%c1_66, %c0_67, %c0_68] : memref<2x8x128xf32, #tpu.memory_space<vmem>>, vector<1x8x128xf32>
    %137 = vector.shape_cast %136 : vector<1x8x128xf32> to vector<8x128xf32>
    %138 = arith.mulf %127, %137 : vector<8x128xf32>
    %139 = arith.mulf %121, %129 : vector<8x128xf32>
    %140 = arith.addf %138, %139 : vector<8x128xf32>
    %141 = math.tanh %140 : vector<8x128xf32>
    %142 = arith.mulf %135, %141 : vector<8x128xf32>
    %c1_69 = arith.constant 1 : index
    %c0_70 = arith.constant 0 : index
    %c0_71 = arith.constant 0 : index
    %143 = vector.load %arg9[%c1_69, %c0_70, %c0_71] : memref<2x8x128xf32, #tpu.memory_space<vmem>>, vector<1x8x128xf32>
    %144 = vector.shape_cast %143 : vector<1x8x128xf32> to vector<8x128xf32>
    %145 = vector.shape_cast %140 : vector<8x128xf32> to vector<1x8x128xf32>
    tpu.vector_store %arg9[%c1_69, %c0_70, %c0_71], %145 {strides = array<i32>} : memref<2x8x128xf32, #tpu.memory_space<vmem>>, vector<1x8x128xf32>,
    %c1_72 = arith.constant 1 : index
    %c0_73 = arith.constant 0 : index
    %c0_74 = arith.constant 0 : index
    %146 = vector.load %arg8[%c1_72, %c0_73, %c0_74] : memref<2x8x128xf32, #tpu.memory_space<vmem>>, vector<1x8x128xf32>
    %147 = vector.shape_cast %146 : vector<1x8x128xf32> to vector<8x128xf32>
    %148 = vector.shape_cast %142 : vector<8x128xf32> to vector<1x8x128xf32>
    tpu.vector_store %arg8[%c1_72, %c0_73, %c0_74], %148 {strides = array<i32>} : memref<2x8x128xf32, #tpu.memory_space<vmem>>, vector<1x8x128xf32>,
    %c8 = arith.constant 8 : index
    %c0_75 = arith.constant 0 : index
    %149 = vector.load %arg10[%c8, %c0_75] : memref<32x512xf32, #tpu.memory_space<vmem>>, vector<8x512xf32>
    %c0_76 = arith.constant 0 : index
    %c0_77 = arith.constant 0 : index
    %c0_78 = arith.constant 0 : index
    %150 = vector.load %arg8[%c0_76, %c0_77, %c0_78] : memref<2x8x128xf32, #tpu.memory_space<vmem>>, vector<1x8x128xf32>
    %151 = vector.shape_cast %150 : vector<1x8x128xf32> to vector<8x128xf32>
    %152 = arith.truncf %151 : vector<8x128xf32> to vector<8x128xbf16>
    %c0_79 = arith.constant 0 : index
    %c0_80 = arith.constant 0 : index
    %c0_81 = arith.constant 0 : index
    %153 = vector.load %arg3[%c0_79, %c0_80, %c0_81] : memref<2x128x512xbf16, #tpu.memory_space<vmem>>, vector<1x128x512xbf16>
    %154 = vector.shape_cast %153 : vector<1x128x512xbf16> to vector<128x512xbf16>
    %cst_82 = arith.constant dense<0.000000e+00> : vector<8x512xf32>
    %155 = tpu.matmul %152, %154, %cst_82 {dimension_numbers = #tpu.dot_dimension_numbers<[1], [0], [0], [1], [0, 0, 1, 1], [], []>} : vector<8x128xbf16>, vector<128x512xbf16>, vector<8x512xf32> -> vector<8x512xf32>
    %156 = arith.addf %149, %155 : vector<8x512xf32>
    %cst_83 = arith.constant dense<0.000000e+00> : vector<8xf32>
    %157 = vector.multi_reduction <add>, %156, %cst_83 [1] : vector<8x512xf32> to vector<8xf32>
    %158 = vector.shape_cast %157 : vector<8xf32> to vector<8x1xf32>
    %159 = arith.mulf %156, %156 : vector<8x512xf32>
    %cst_84 = arith.constant dense<0.000000e+00> : vector<8xf32>
    %160 = vector.multi_reduction <add>, %159, %cst_84 [1] : vector<8x512xf32> to vector<8xf32>
    %161 = vector.shape_cast %160 : vector<8xf32> to vector<8x1xf32>
    %cst_85 = arith.constant 0.001953125 : f32
    %162 = vector.broadcast %cst_85 : f32 to vector<8x1xf32>
    %163 = arith.mulf %158, %162 : vector<8x1xf32>
    %cst_86 = arith.constant 0.001953125 : f32
    %164 = vector.broadcast %cst_86 : f32 to vector<8x1xf32>
    %165 = arith.mulf %161, %164 : vector<8x1xf32>
    %166 = arith.mulf %163, %163 : vector<8x1xf32>
    %167 = arith.subf %165, %166 : vector<8x1xf32>
    %168 = vector.broadcast %163 : vector<8x1xf32> to vector<8x512xf32>
    %169 = arith.subf %156, %168 : vector<8x512xf32>
    %cst_87 = arith.constant 9.99999974E-6 : f32
    %170 = vector.broadcast %cst_87 : f32 to vector<8x1xf32>
    %171 = arith.addf %167, %170 : vector<8x1xf32>
    %172 = math.rsqrt %171 : vector<8x1xf32>
    %173 = vector.broadcast %172 : vector<8x1xf32> to vector<8x512xf32>
    %174 = arith.mulf %169, %173 : vector<8x512xf32>
    %175 = arith.mulf %174, %14 : vector<8x512xf32>
    %176 = arith.addf %175, %22 : vector<8x512xf32>
    %177 = vector.extract_strided_slice %176 {offsets = [0, 0], sizes = [8, 128], strides = [1, 1]} : vector<8x512xf32> to vector<8x128xf32>
    %178 = math.exp %177 : vector<8x128xf32>
    %179 = vector.extract_strided_slice %176 {offsets = [0, 128], sizes = [8, 128], strides = [1, 1]} : vector<8x512xf32> to vector<8x128xf32>
    %180 = arith.negf %179 : vector<8x128xf32>
    %181 = math.exp %180 : vector<8x128xf32>
    %cst_88 = arith.constant 1.000000e+00 : f32
    %182 = vector.broadcast %cst_88 : f32 to vector<8x128xf32>
    %183 = arith.addf %182, %181 : vector<8x128xf32>
    %184 = arith.divf %182, %183 : vector<8x128xf32>
    %185 = vector.extract_strided_slice %176 {offsets = [0, 256], sizes = [8, 128], strides = [1, 1]} : vector<8x512xf32> to vector<8x128xf32>
    %186 = math.tanh %185 : vector<8x128xf32>
    %187 = vector.extract_strided_slice %176 {offsets = [0, 384], sizes = [8, 128], strides = [1, 1]} : vector<8x512xf32> to vector<8x128xf32>
    %188 = arith.negf %187 : vector<8x128xf32>
    %189 = math.exp %188 : vector<8x128xf32>
    %cst_89 = arith.constant 1.000000e+00 : f32
    %190 = vector.broadcast %cst_89 : f32 to vector<8x128xf32>
    %191 = arith.addf %190, %189 : vector<8x128xf32>
    %192 = arith.divf %190, %191 : vector<8x128xf32>
    %c0_90 = arith.constant 0 : index
    %c0_91 = arith.constant 0 : index
    %c0_92 = arith.constant 0 : index
    %193 = vector.load %arg9[%c0_90, %c0_91, %c0_92] : memref<2x8x128xf32, #tpu.memory_space<vmem>>, vector<1x8x128xf32>
    %194 = vector.shape_cast %193 : vector<1x8x128xf32> to vector<8x128xf32>
    %195 = arith.mulf %184, %194 : vector<8x128xf32>
    %196 = arith.mulf %178, %186 : vector<8x128xf32>
    %197 = arith.addf %195, %196 : vector<8x128xf32>
    %198 = math.tanh %197 : vector<8x128xf32>
    %199 = arith.mulf %192, %198 : vector<8x128xf32>
    %c0_93 = arith.constant 0 : index
    %c0_94 = arith.constant 0 : index
    %c0_95 = arith.constant 0 : index
    %200 = vector.load %arg9[%c0_93, %c0_94, %c0_95] : memref<2x8x128xf32, #tpu.memory_space<vmem>>, vector<1x8x128xf32>
    %201 = vector.shape_cast %200 : vector<1x8x128xf32> to vector<8x128xf32>
    %202 = vector.shape_cast %197 : vector<8x128xf32> to vector<1x8x128xf32>
    tpu.vector_store %arg9[%c0_93, %c0_94, %c0_95], %202 {strides = array<i32>} : memref<2x8x128xf32, #tpu.memory_space<vmem>>, vector<1x8x128xf32>,
    %c0_96 = arith.constant 0 : index
    %c0_97 = arith.constant 0 : index
    %c0_98 = arith.constant 0 : index
    %203 = vector.load %arg8[%c0_96, %c0_97, %c0_98] : memref<2x8x128xf32, #tpu.memory_space<vmem>>, vector<1x8x128xf32>
    %204 = vector.shape_cast %203 : vector<1x8x128xf32> to vector<8x128xf32>
    %205 = vector.shape_cast %199 : vector<8x128xf32> to vector<1x8x128xf32>
    tpu.vector_store %arg8[%c0_96, %c0_97, %c0_98], %205 {strides = array<i32>} : memref<2x8x128xf32, #tpu.memory_space<vmem>>, vector<1x8x128xf32>,
    %206 = arith.truncf %199 : vector<8x128xf32> to vector<8x128xbf16>
    %c0_99 = arith.constant 0 : index
    %c0_100 = arith.constant 0 : index
    %c0_101 = arith.constant 0 : index
    %207 = vector.load %arg4[%c0_99, %c0_100, %c0_101] : memref<1x128x512xbf16, #tpu.memory_space<vmem>>, vector<1x128x512xbf16>
    %208 = vector.shape_cast %207 : vector<1x128x512xbf16> to vector<128x512xbf16>
    %cst_102 = arith.constant dense<0.000000e+00> : vector<8x512xf32>
    %209 = tpu.matmul %206, %208, %cst_102 {dimension_numbers = #tpu.dot_dimension_numbers<[1], [0], [0], [1], [0, 0, 1, 1], [], []>} : vector<8x128xbf16>, vector<128x512xbf16>, vector<8x512xf32> -> vector<8x512xf32>
    %c1_103 = arith.constant 1 : index
    %c0_104 = arith.constant 0 : index
    %c0_105 = arith.constant 0 : index
    %210 = vector.load %arg8[%c1_103, %c0_104, %c0_105] : memref<2x8x128xf32, #tpu.memory_space<vmem>>, vector<1x8x128xf32>
    %211 = vector.shape_cast %210 : vector<1x8x128xf32> to vector<8x128xf32>
    %212 = arith.truncf %211 : vector<8x128xf32> to vector<8x128xbf16>
    %c1_106 = arith.constant 1 : index
    %c0_107 = arith.constant 0 : index
    %c0_108 = arith.constant 0 : index
    %213 = vector.load %arg3[%c1_106, %c0_107, %c0_108] : memref<2x128x512xbf16, #tpu.memory_space<vmem>>, vector<1x128x512xbf16>
    %214 = vector.shape_cast %213 : vector<1x128x512xbf16> to vector<128x512xbf16>
    %cst_109 = arith.constant dense<0.000000e+00> : vector<8x512xf32>
    %215 = tpu.matmul %212, %214, %cst_109 {dimension_numbers = #tpu.dot_dimension_numbers<[1], [0], [0], [1], [0, 0, 1, 1], [], []>} : vector<8x128xbf16>, vector<128x512xbf16>, vector<8x512xf32> -> vector<8x512xf32>
    %216 = arith.addf %209, %215 : vector<8x512xf32>
    %217 = arith.addf %216, %30 : vector<8x512xf32>
    %cst_110 = arith.constant dense<0.000000e+00> : vector<8xf32>
    %218 = vector.multi_reduction <add>, %217, %cst_110 [1] : vector<8x512xf32> to vector<8xf32>
    %219 = vector.shape_cast %218 : vector<8xf32> to vector<8x1xf32>
    %220 = arith.mulf %217, %217 : vector<8x512xf32>
    %cst_111 = arith.constant dense<0.000000e+00> : vector<8xf32>
    %221 = vector.multi_reduction <add>, %220, %cst_111 [1] : vector<8x512xf32> to vector<8xf32>
    %222 = vector.shape_cast %221 : vector<8xf32> to vector<8x1xf32>
    %cst_112 = arith.constant 0.001953125 : f32
    %223 = vector.broadcast %cst_112 : f32 to vector<8x1xf32>
    %224 = arith.mulf %219, %223 : vector<8x1xf32>
    %cst_113 = arith.constant 0.001953125 : f32
    %225 = vector.broadcast %cst_113 : f32 to vector<8x1xf32>
    %226 = arith.mulf %222, %225 : vector<8x1xf32>
    %227 = arith.mulf %224, %224 : vector<8x1xf32>
    %228 = arith.subf %226, %227 : vector<8x1xf32>
    %229 = vector.broadcast %224 : vector<8x1xf32> to vector<8x512xf32>
    %230 = arith.subf %217, %229 : vector<8x512xf32>
    %cst_114 = arith.constant 9.99999974E-6 : f32
    %231 = vector.broadcast %cst_114 : f32 to vector<8x1xf32>
    %232 = arith.addf %228, %231 : vector<8x1xf32>
    %233 = math.rsqrt %232 : vector<8x1xf32>
    %234 = vector.broadcast %233 : vector<8x1xf32> to vector<8x512xf32>
    %235 = arith.mulf %230, %234 : vector<8x512xf32>
    %236 = arith.mulf %235, %18 : vector<8x512xf32>
    %237 = arith.addf %236, %26 : vector<8x512xf32>
    %238 = vector.extract_strided_slice %237 {offsets = [0, 0], sizes = [8, 128], strides = [1, 1]} : vector<8x512xf32> to vector<8x128xf32>
    %239 = math.exp %238 : vector<8x128xf32>
    %240 = vector.extract_strided_slice %237 {offsets = [0, 128], sizes = [8, 128], strides = [1, 1]} : vector<8x512xf32> to vector<8x128xf32>
    %241 = arith.negf %240 : vector<8x128xf32>
    %242 = math.exp %241 : vector<8x128xf32>
    %cst_115 = arith.constant 1.000000e+00 : f32
    %243 = vector.broadcast %cst_115 : f32 to vector<8x128xf32>
    %244 = arith.addf %243, %242 : vector<8x128xf32>
    %245 = arith.divf %243, %244 : vector<8x128xf32>
    %246 = vector.extract_strided_slice %237 {offsets = [0, 256], sizes = [8, 128], strides = [1, 1]} : vector<8x512xf32> to vector<8x128xf32>
    %247 = math.tanh %246 : vector<8x128xf32>
    %248 = vector.extract_strided_slice %237 {offsets = [0, 384], sizes = [8, 128], strides = [1, 1]} : vector<8x512xf32> to vector<8x128xf32>
    %249 = arith.negf %248 : vector<8x128xf32>
    %250 = math.exp %249 : vector<8x128xf32>
    %cst_116 = arith.constant 1.000000e+00 : f32
    %251 = vector.broadcast %cst_116 : f32 to vector<8x128xf32>
    %252 = arith.addf %251, %250 : vector<8x128xf32>
    %253 = arith.divf %251, %252 : vector<8x128xf32>
    %c1_117 = arith.constant 1 : index
    %c0_118 = arith.constant 0 : index
    %c0_119 = arith.constant 0 : index
    %254 = vector.load %arg9[%c1_117, %c0_118, %c0_119] : memref<2x8x128xf32, #tpu.memory_space<vmem>>, vector<1x8x128xf32>
    %255 = vector.shape_cast %254 : vector<1x8x128xf32> to vector<8x128xf32>
    %256 = arith.mulf %245, %255 : vector<8x128xf32>
    %257 = arith.mulf %239, %247 : vector<8x128xf32>
    %258 = arith.addf %256, %257 : vector<8x128xf32>
    %259 = math.tanh %258 : vector<8x128xf32>
    %260 = arith.mulf %253, %259 : vector<8x128xf32>
    %c1_120 = arith.constant 1 : index
    %c0_121 = arith.constant 0 : index
    %c0_122 = arith.constant 0 : index
    %261 = vector.load %arg9[%c1_120, %c0_121, %c0_122] : memref<2x8x128xf32, #tpu.memory_space<vmem>>, vector<1x8x128xf32>
    %262 = vector.shape_cast %261 : vector<1x8x128xf32> to vector<8x128xf32>
    %263 = vector.shape_cast %258 : vector<8x128xf32> to vector<1x8x128xf32>
    tpu.vector_store %arg9[%c1_120, %c0_121, %c0_122], %263 {strides = array<i32>} : memref<2x8x128xf32, #tpu.memory_space<vmem>>, vector<1x8x128xf32>,
    %c1_123 = arith.constant 1 : index
    %c0_124 = arith.constant 0 : index
    %c0_125 = arith.constant 0 : index
    %264 = vector.load %arg8[%c1_123, %c0_124, %c0_125] : memref<2x8x128xf32, #tpu.memory_space<vmem>>, vector<1x8x128xf32>
    %265 = vector.shape_cast %264 : vector<1x8x128xf32> to vector<8x128xf32>
    %266 = vector.shape_cast %260 : vector<8x128xf32> to vector<1x8x128xf32>
    tpu.vector_store %arg8[%c1_123, %c0_124, %c0_125], %266 {strides = array<i32>} : memref<2x8x128xf32, #tpu.memory_space<vmem>>, vector<1x8x128xf32>,
    %c16 = arith.constant 16 : index
    %c0_126 = arith.constant 0 : index
    %267 = vector.load %arg10[%c16, %c0_126] : memref<32x512xf32, #tpu.memory_space<vmem>>, vector<8x512xf32>
    %c0_127 = arith.constant 0 : index
    %c0_128 = arith.constant 0 : index
    %c0_129 = arith.constant 0 : index
    %268 = vector.load %arg8[%c0_127, %c0_128, %c0_129] : memref<2x8x128xf32, #tpu.memory_space<vmem>>, vector<1x8x128xf32>
    %269 = vector.shape_cast %268 : vector<1x8x128xf32> to vector<8x128xf32>
    %270 = arith.truncf %269 : vector<8x128xf32> to vector<8x128xbf16>
    %c0_130 = arith.constant 0 : index
    %c0_131 = arith.constant 0 : index
    %c0_132 = arith.constant 0 : index
    %271 = vector.load %arg3[%c0_130, %c0_131, %c0_132] : memref<2x128x512xbf16, #tpu.memory_space<vmem>>, vector<1x128x512xbf16>
    %272 = vector.shape_cast %271 : vector<1x128x512xbf16> to vector<128x512xbf16>
    %cst_133 = arith.constant dense<0.000000e+00> : vector<8x512xf32>
    %273 = tpu.matmul %270, %272, %cst_133 {dimension_numbers = #tpu.dot_dimension_numbers<[1], [0], [0], [1], [0, 0, 1, 1], [], []>} : vector<8x128xbf16>, vector<128x512xbf16>, vector<8x512xf32> -> vector<8x512xf32>
    %274 = arith.addf %267, %273 : vector<8x512xf32>
    %cst_134 = arith.constant dense<0.000000e+00> : vector<8xf32>
    %275 = vector.multi_reduction <add>, %274, %cst_134 [1] : vector<8x512xf32> to vector<8xf32>
    %276 = vector.shape_cast %275 : vector<8xf32> to vector<8x1xf32>
    %277 = arith.mulf %274, %274 : vector<8x512xf32>
    %cst_135 = arith.constant dense<0.000000e+00> : vector<8xf32>
    %278 = vector.multi_reduction <add>, %277, %cst_135 [1] : vector<8x512xf32> to vector<8xf32>
    %279 = vector.shape_cast %278 : vector<8xf32> to vector<8x1xf32>
    %cst_136 = arith.constant 0.001953125 : f32
    %280 = vector.broadcast %cst_136 : f32 to vector<8x1xf32>
    %281 = arith.mulf %276, %280 : vector<8x1xf32>
    %cst_137 = arith.constant 0.001953125 : f32
    %282 = vector.broadcast %cst_137 : f32 to vector<8x1xf32>
    %283 = arith.mulf %279, %282 : vector<8x1xf32>
    %284 = arith.mulf %281, %281 : vector<8x1xf32>
    %285 = arith.subf %283, %284 : vector<8x1xf32>
    %286 = vector.broadcast %281 : vector<8x1xf32> to vector<8x512xf32>
    %287 = arith.subf %274, %286 : vector<8x512xf32>
    %cst_138 = arith.constant 9.99999974E-6 : f32
    %288 = vector.broadcast %cst_138 : f32 to vector<8x1xf32>
    %289 = arith.addf %285, %288 : vector<8x1xf32>
    %290 = math.rsqrt %289 : vector<8x1xf32>
    %291 = vector.broadcast %290 : vector<8x1xf32> to vector<8x512xf32>
    %292 = arith.mulf %287, %291 : vector<8x512xf32>
    %293 = arith.mulf %292, %14 : vector<8x512xf32>
    %294 = arith.addf %293, %22 : vector<8x512xf32>
    %295 = vector.extract_strided_slice %294 {offsets = [0, 0], sizes = [8, 128], strides = [1, 1]} : vector<8x512xf32> to vector<8x128xf32>
    %296 = math.exp %295 : vector<8x128xf32>
    %297 = vector.extract_strided_slice %294 {offsets = [0, 128], sizes = [8, 128], strides = [1, 1]} : vector<8x512xf32> to vector<8x128xf32>
    %298 = arith.negf %297 : vector<8x128xf32>
    %299 = math.exp %298 : vector<8x128xf32>
    %cst_139 = arith.constant 1.000000e+00 : f32
    %300 = vector.broadcast %cst_139 : f32 to vector<8x128xf32>
    %301 = arith.addf %300, %299 : vector<8x128xf32>
    %302 = arith.divf %300, %301 : vector<8x128xf32>
    %303 = vector.extract_strided_slice %294 {offsets = [0, 256], sizes = [8, 128], strides = [1, 1]} : vector<8x512xf32> to vector<8x128xf32>
    %304 = math.tanh %303 : vector<8x128xf32>
    %305 = vector.extract_strided_slice %294 {offsets = [0, 384], sizes = [8, 128], strides = [1, 1]} : vector<8x512xf32> to vector<8x128xf32>
    %306 = arith.negf %305 : vector<8x128xf32>
    %307 = math.exp %306 : vector<8x128xf32>
    %cst_140 = arith.constant 1.000000e+00 : f32
    %308 = vector.broadcast %cst_140 : f32 to vector<8x128xf32>
    %309 = arith.addf %308, %307 : vector<8x128xf32>
    %310 = arith.divf %308, %309 : vector<8x128xf32>
    %c0_141 = arith.constant 0 : index
    %c0_142 = arith.constant 0 : index
    %c0_143 = arith.constant 0 : index
    %311 = vector.load %arg9[%c0_141, %c0_142, %c0_143] : memref<2x8x128xf32, #tpu.memory_space<vmem>>, vector<1x8x128xf32>
    %312 = vector.shape_cast %311 : vector<1x8x128xf32> to vector<8x128xf32>
    %313 = arith.mulf %302, %312 : vector<8x128xf32>
    %314 = arith.mulf %296, %304 : vector<8x128xf32>
    %315 = arith.addf %313, %314 : vector<8x128xf32>
    %316 = math.tanh %315 : vector<8x128xf32>
    %317 = arith.mulf %310, %316 : vector<8x128xf32>
    %c0_144 = arith.constant 0 : index
    %c0_145 = arith.constant 0 : index
    %c0_146 = arith.constant 0 : index
    %318 = vector.load %arg9[%c0_144, %c0_145, %c0_146] : memref<2x8x128xf32, #tpu.memory_space<vmem>>, vector<1x8x128xf32>
    %319 = vector.shape_cast %318 : vector<1x8x128xf32> to vector<8x128xf32>
    %320 = vector.shape_cast %315 : vector<8x128xf32> to vector<1x8x128xf32>
    tpu.vector_store %arg9[%c0_144, %c0_145, %c0_146], %320 {strides = array<i32>} : memref<2x8x128xf32, #tpu.memory_space<vmem>>, vector<1x8x128xf32>,
    %c0_147 = arith.constant 0 : index
    %c0_148 = arith.constant 0 : index
    %c0_149 = arith.constant 0 : index
    %321 = vector.load %arg8[%c0_147, %c0_148, %c0_149] : memref<2x8x128xf32, #tpu.memory_space<vmem>>, vector<1x8x128xf32>
    %322 = vector.shape_cast %321 : vector<1x8x128xf32> to vector<8x128xf32>
    %323 = vector.shape_cast %317 : vector<8x128xf32> to vector<1x8x128xf32>
    tpu.vector_store %arg8[%c0_147, %c0_148, %c0_149], %323 {strides = array<i32>} : memref<2x8x128xf32, #tpu.memory_space<vmem>>, vector<1x8x128xf32>,
    %324 = arith.truncf %317 : vector<8x128xf32> to vector<8x128xbf16>
    %c0_150 = arith.constant 0 : index
    %c0_151 = arith.constant 0 : index
    %c0_152 = arith.constant 0 : index
    %325 = vector.load %arg4[%c0_150, %c0_151, %c0_152] : memref<1x128x512xbf16, #tpu.memory_space<vmem>>, vector<1x128x512xbf16>
    %326 = vector.shape_cast %325 : vector<1x128x512xbf16> to vector<128x512xbf16>
    %cst_153 = arith.constant dense<0.000000e+00> : vector<8x512xf32>
    %327 = tpu.matmul %324, %326, %cst_153 {dimension_numbers = #tpu.dot_dimension_numbers<[1], [0], [0], [1], [0, 0, 1, 1], [], []>} : vector<8x128xbf16>, vector<128x512xbf16>, vector<8x512xf32> -> vector<8x512xf32>
    %c1_154 = arith.constant 1 : index
    %c0_155 = arith.constant 0 : index
    %c0_156 = arith.constant 0 : index
    %328 = vector.load %arg8[%c1_154, %c0_155, %c0_156] : memref<2x8x128xf32, #tpu.memory_space<vmem>>, vector<1x8x128xf32>
    %329 = vector.shape_cast %328 : vector<1x8x128xf32> to vector<8x128xf32>
    %330 = arith.truncf %329 : vector<8x128xf32> to vector<8x128xbf16>
    %c1_157 = arith.constant 1 : index
    %c0_158 = arith.constant 0 : index
    %c0_159 = arith.constant 0 : index
    %331 = vector.load %arg3[%c1_157, %c0_158, %c0_159] : memref<2x128x512xbf16, #tpu.memory_space<vmem>>, vector<1x128x512xbf16>
    %332 = vector.shape_cast %331 : vector<1x128x512xbf16> to vector<128x512xbf16>
    %cst_160 = arith.constant dense<0.000000e+00> : vector<8x512xf32>
    %333 = tpu.matmul %330, %332, %cst_160 {dimension_numbers = #tpu.dot_dimension_numbers<[1], [0], [0], [1], [0, 0, 1, 1], [], []>} : vector<8x128xbf16>, vector<128x512xbf16>, vector<8x512xf32> -> vector<8x512xf32>
    %334 = arith.addf %327, %333 : vector<8x512xf32>
    %335 = arith.addf %334, %30 : vector<8x512xf32>
    %cst_161 = arith.constant dense<0.000000e+00> : vector<8xf32>
    %336 = vector.multi_reduction <add>, %335, %cst_161 [1] : vector<8x512xf32> to vector<8xf32>
    %337 = vector.shape_cast %336 : vector<8xf32> to vector<8x1xf32>
    %338 = arith.mulf %335, %335 : vector<8x512xf32>
    %cst_162 = arith.constant dense<0.000000e+00> : vector<8xf32>
    %339 = vector.multi_reduction <add>, %338, %cst_162 [1] : vector<8x512xf32> to vector<8xf32>
    %340 = vector.shape_cast %339 : vector<8xf32> to vector<8x1xf32>
    %cst_163 = arith.constant 0.001953125 : f32
    %341 = vector.broadcast %cst_163 : f32 to vector<8x1xf32>
    %342 = arith.mulf %337, %341 : vector<8x1xf32>
    %cst_164 = arith.constant 0.001953125 : f32
    %343 = vector.broadcast %cst_164 : f32 to vector<8x1xf32>
    %344 = arith.mulf %340, %343 : vector<8x1xf32>
    %345 = arith.mulf %342, %342 : vector<8x1xf32>
    %346 = arith.subf %344, %345 : vector<8x1xf32>
    %347 = vector.broadcast %342 : vector<8x1xf32> to vector<8x512xf32>
    %348 = arith.subf %335, %347 : vector<8x512xf32>
    %cst_165 = arith.constant 9.99999974E-6 : f32
    %349 = vector.broadcast %cst_165 : f32 to vector<8x1xf32>
    %350 = arith.addf %346, %349 : vector<8x1xf32>
    %351 = math.rsqrt %350 : vector<8x1xf32>
    %352 = vector.broadcast %351 : vector<8x1xf32> to vector<8x512xf32>
    %353 = arith.mulf %348, %352 : vector<8x512xf32>
    %354 = arith.mulf %353, %18 : vector<8x512xf32>
    %355 = arith.addf %354, %26 : vector<8x512xf32>
    %356 = vector.extract_strided_slice %355 {offsets = [0, 0], sizes = [8, 128], strides = [1, 1]} : vector<8x512xf32> to vector<8x128xf32>
    %357 = math.exp %356 : vector<8x128xf32>
    %358 = vector.extract_strided_slice %355 {offsets = [0, 128], sizes = [8, 128], strides = [1, 1]} : vector<8x512xf32> to vector<8x128xf32>
    %359 = arith.negf %358 : vector<8x128xf32>
    %360 = math.exp %359 : vector<8x128xf32>
    %cst_166 = arith.constant 1.000000e+00 : f32
    %361 = vector.broadcast %cst_166 : f32 to vector<8x128xf32>
    %362 = arith.addf %361, %360 : vector<8x128xf32>
    %363 = arith.divf %361, %362 : vector<8x128xf32>
    %364 = vector.extract_strided_slice %355 {offsets = [0, 256], sizes = [8, 128], strides = [1, 1]} : vector<8x512xf32> to vector<8x128xf32>
    %365 = math.tanh %364 : vector<8x128xf32>
    %366 = vector.extract_strided_slice %355 {offsets = [0, 384], sizes = [8, 128], strides = [1, 1]} : vector<8x512xf32> to vector<8x128xf32>
    %367 = arith.negf %366 : vector<8x128xf32>
    %368 = math.exp %367 : vector<8x128xf32>
    %cst_167 = arith.constant 1.000000e+00 : f32
    %369 = vector.broadcast %cst_167 : f32 to vector<8x128xf32>
    %370 = arith.addf %369, %368 : vector<8x128xf32>
    %371 = arith.divf %369, %370 : vector<8x128xf32>
    %c1_168 = arith.constant 1 : index
    %c0_169 = arith.constant 0 : index
    %c0_170 = arith.constant 0 : index
    %372 = vector.load %arg9[%c1_168, %c0_169, %c0_170] : memref<2x8x128xf32, #tpu.memory_space<vmem>>, vector<1x8x128xf32>
    %373 = vector.shape_cast %372 : vector<1x8x128xf32> to vector<8x128xf32>
    %374 = arith.mulf %363, %373 : vector<8x128xf32>
    %375 = arith.mulf %357, %365 : vector<8x128xf32>
    %376 = arith.addf %374, %375 : vector<8x128xf32>
    %377 = math.tanh %376 : vector<8x128xf32>
    %378 = arith.mulf %371, %377 : vector<8x128xf32>
    %c1_171 = arith.constant 1 : index
    %c0_172 = arith.constant 0 : index
    %c0_173 = arith.constant 0 : index
    %379 = vector.load %arg9[%c1_171, %c0_172, %c0_173] : memref<2x8x128xf32, #tpu.memory_space<vmem>>, vector<1x8x128xf32>
    %380 = vector.shape_cast %379 : vector<1x8x128xf32> to vector<8x128xf32>
    %381 = vector.shape_cast %376 : vector<8x128xf32> to vector<1x8x128xf32>
    tpu.vector_store %arg9[%c1_171, %c0_172, %c0_173], %381 {strides = array<i32>} : memref<2x8x128xf32, #tpu.memory_space<vmem>>, vector<1x8x128xf32>,
    %c1_174 = arith.constant 1 : index
    %c0_175 = arith.constant 0 : index
    %c0_176 = arith.constant 0 : index
    %382 = vector.load %arg8[%c1_174, %c0_175, %c0_176] : memref<2x8x128xf32, #tpu.memory_space<vmem>>, vector<1x8x128xf32>
    %383 = vector.shape_cast %382 : vector<1x8x128xf32> to vector<8x128xf32>
    %384 = vector.shape_cast %378 : vector<8x128xf32> to vector<1x8x128xf32>
    tpu.vector_store %arg8[%c1_174, %c0_175, %c0_176], %384 {strides = array<i32>} : memref<2x8x128xf32, #tpu.memory_space<vmem>>, vector<1x8x128xf32>,
    %c24 = arith.constant 24 : index
    %c0_177 = arith.constant 0 : index
    %385 = vector.load %arg10[%c24, %c0_177] : memref<32x512xf32, #tpu.memory_space<vmem>>, vector<8x512xf32>
    %c0_178 = arith.constant 0 : index
    %c0_179 = arith.constant 0 : index
    %c0_180 = arith.constant 0 : index
    %386 = vector.load %arg8[%c0_178, %c0_179, %c0_180] : memref<2x8x128xf32, #tpu.memory_space<vmem>>, vector<1x8x128xf32>
    %387 = vector.shape_cast %386 : vector<1x8x128xf32> to vector<8x128xf32>
    %388 = arith.truncf %387 : vector<8x128xf32> to vector<8x128xbf16>
    %c0_181 = arith.constant 0 : index
    %c0_182 = arith.constant 0 : index
    %c0_183 = arith.constant 0 : index
    %389 = vector.load %arg3[%c0_181, %c0_182, %c0_183] : memref<2x128x512xbf16, #tpu.memory_space<vmem>>, vector<1x128x512xbf16>
    %390 = vector.shape_cast %389 : vector<1x128x512xbf16> to vector<128x512xbf16>
    %cst_184 = arith.constant dense<0.000000e+00> : vector<8x512xf32>
    %391 = tpu.matmul %388, %390, %cst_184 {dimension_numbers = #tpu.dot_dimension_numbers<[1], [0], [0], [1], [0, 0, 1, 1], [], []>} : vector<8x128xbf16>, vector<128x512xbf16>, vector<8x512xf32> -> vector<8x512xf32>
    %392 = arith.addf %385, %391 : vector<8x512xf32>
    %cst_185 = arith.constant dense<0.000000e+00> : vector<8xf32>
    %393 = vector.multi_reduction <add>, %392, %cst_185 [1] : vector<8x512xf32> to vector<8xf32>
    %394 = vector.shape_cast %393 : vector<8xf32> to vector<8x1xf32>
    %395 = arith.mulf %392, %392 : vector<8x512xf32>
    %cst_186 = arith.constant dense<0.000000e+00> : vector<8xf32>
    %396 = vector.multi_reduction <add>, %395, %cst_186 [1] : vector<8x512xf32> to vector<8xf32>
    %397 = vector.shape_cast %396 : vector<8xf32> to vector<8x1xf32>
    %cst_187 = arith.constant 0.001953125 : f32
    %398 = vector.broadcast %cst_187 : f32 to vector<8x1xf32>
    %399 = arith.mulf %394, %398 : vector<8x1xf32>
    %cst_188 = arith.constant 0.001953125 : f32
    %400 = vector.broadcast %cst_188 : f32 to vector<8x1xf32>
    %401 = arith.mulf %397, %400 : vector<8x1xf32>
    %402 = arith.mulf %399, %399 : vector<8x1xf32>
    %403 = arith.subf %401, %402 : vector<8x1xf32>
    %404 = vector.broadcast %399 : vector<8x1xf32> to vector<8x512xf32>
    %405 = arith.subf %392, %404 : vector<8x512xf32>
    %cst_189 = arith.constant 9.99999974E-6 : f32
    %406 = vector.broadcast %cst_189 : f32 to vector<8x1xf32>
    %407 = arith.addf %403, %406 : vector<8x1xf32>
    %408 = math.rsqrt %407 : vector<8x1xf32>
    %409 = vector.broadcast %408 : vector<8x1xf32> to vector<8x512xf32>
    %410 = arith.mulf %405, %409 : vector<8x512xf32>
    %411 = arith.mulf %410, %14 : vector<8x512xf32>
    %412 = arith.addf %411, %22 : vector<8x512xf32>
    %413 = vector.extract_strided_slice %412 {offsets = [0, 0], sizes = [8, 128], strides = [1, 1]} : vector<8x512xf32> to vector<8x128xf32>
    %414 = math.exp %413 : vector<8x128xf32>
    %415 = vector.extract_strided_slice %412 {offsets = [0, 128], sizes = [8, 128], strides = [1, 1]} : vector<8x512xf32> to vector<8x128xf32>
    %416 = arith.negf %415 : vector<8x128xf32>
    %417 = math.exp %416 : vector<8x128xf32>
    %cst_190 = arith.constant 1.000000e+00 : f32
    %418 = vector.broadcast %cst_190 : f32 to vector<8x128xf32>
    %419 = arith.addf %418, %417 : vector<8x128xf32>
    %420 = arith.divf %418, %419 : vector<8x128xf32>
    %421 = vector.extract_strided_slice %412 {offsets = [0, 256], sizes = [8, 128], strides = [1, 1]} : vector<8x512xf32> to vector<8x128xf32>
    %422 = math.tanh %421 : vector<8x128xf32>
    %423 = vector.extract_strided_slice %412 {offsets = [0, 384], sizes = [8, 128], strides = [1, 1]} : vector<8x512xf32> to vector<8x128xf32>
    %424 = arith.negf %423 : vector<8x128xf32>
    %425 = math.exp %424 : vector<8x128xf32>
    %cst_191 = arith.constant 1.000000e+00 : f32
    %426 = vector.broadcast %cst_191 : f32 to vector<8x128xf32>
    %427 = arith.addf %426, %425 : vector<8x128xf32>
    %428 = arith.divf %426, %427 : vector<8x128xf32>
    %c0_192 = arith.constant 0 : index
    %c0_193 = arith.constant 0 : index
    %c0_194 = arith.constant 0 : index
    %429 = vector.load %arg9[%c0_192, %c0_193, %c0_194] : memref<2x8x128xf32, #tpu.memory_space<vmem>>, vector<1x8x128xf32>
    %430 = vector.shape_cast %429 : vector<1x8x128xf32> to vector<8x128xf32>
    %431 = arith.mulf %420, %430 : vector<8x128xf32>
    %432 = arith.mulf %414, %422 : vector<8x128xf32>
    %433 = arith.addf %431, %432 : vector<8x128xf32>
    %434 = math.tanh %433 : vector<8x128xf32>
    %435 = arith.mulf %428, %434 : vector<8x128xf32>
    %c0_195 = arith.constant 0 : index
    %c0_196 = arith.constant 0 : index
    %c0_197 = arith.constant 0 : index
    %436 = vector.load %arg9[%c0_195, %c0_196, %c0_197] : memref<2x8x128xf32, #tpu.memory_space<vmem>>, vector<1x8x128xf32>
    %437 = vector.shape_cast %436 : vector<1x8x128xf32> to vector<8x128xf32>
    %438 = vector.shape_cast %433 : vector<8x128xf32> to vector<1x8x128xf32>
    tpu.vector_store %arg9[%c0_195, %c0_196, %c0_197], %438 {strides = array<i32>} : memref<2x8x128xf32, #tpu.memory_space<vmem>>, vector<1x8x128xf32>,
    %c0_198 = arith.constant 0 : index
    %c0_199 = arith.constant 0 : index
    %c0_200 = arith.constant 0 : index
    %439 = vector.load %arg8[%c0_198, %c0_199, %c0_200] : memref<2x8x128xf32, #tpu.memory_space<vmem>>, vector<1x8x128xf32>
    %440 = vector.shape_cast %439 : vector<1x8x128xf32> to vector<8x128xf32>
    %441 = vector.shape_cast %435 : vector<8x128xf32> to vector<1x8x128xf32>
    tpu.vector_store %arg8[%c0_198, %c0_199, %c0_200], %441 {strides = array<i32>} : memref<2x8x128xf32, #tpu.memory_space<vmem>>, vector<1x8x128xf32>,
    %442 = arith.truncf %435 : vector<8x128xf32> to vector<8x128xbf16>
    %c0_201 = arith.constant 0 : index
    %c0_202 = arith.constant 0 : index
    %c0_203 = arith.constant 0 : index
    %443 = vector.load %arg4[%c0_201, %c0_202, %c0_203] : memref<1x128x512xbf16, #tpu.memory_space<vmem>>, vector<1x128x512xbf16>
    %444 = vector.shape_cast %443 : vector<1x128x512xbf16> to vector<128x512xbf16>
    %cst_204 = arith.constant dense<0.000000e+00> : vector<8x512xf32>
    %445 = tpu.matmul %442, %444, %cst_204 {dimension_numbers = #tpu.dot_dimension_numbers<[1], [0], [0], [1], [0, 0, 1, 1], [], []>} : vector<8x128xbf16>, vector<128x512xbf16>, vector<8x512xf32> -> vector<8x512xf32>
    %c1_205 = arith.constant 1 : index
    %c0_206 = arith.constant 0 : index
    %c0_207 = arith.constant 0 : index
    %446 = vector.load %arg8[%c1_205, %c0_206, %c0_207] : memref<2x8x128xf32, #tpu.memory_space<vmem>>, vector<1x8x128xf32>
    %447 = vector.shape_cast %446 : vector<1x8x128xf32> to vector<8x128xf32>
    %448 = arith.truncf %447 : vector<8x128xf32> to vector<8x128xbf16>
    %c1_208 = arith.constant 1 : index
    %c0_209 = arith.constant 0 : index
    %c0_210 = arith.constant 0 : index
    %449 = vector.load %arg3[%c1_208, %c0_209, %c0_210] : memref<2x128x512xbf16, #tpu.memory_space<vmem>>, vector<1x128x512xbf16>
    %450 = vector.shape_cast %449 : vector<1x128x512xbf16> to vector<128x512xbf16>
    %cst_211 = arith.constant dense<0.000000e+00> : vector<8x512xf32>
    %451 = tpu.matmul %448, %450, %cst_211 {dimension_numbers = #tpu.dot_dimension_numbers<[1], [0], [0], [1], [0, 0, 1, 1], [], []>} : vector<8x128xbf16>, vector<128x512xbf16>, vector<8x512xf32> -> vector<8x512xf32>
    %452 = arith.addf %445, %451 : vector<8x512xf32>
    %453 = arith.addf %452, %30 : vector<8x512xf32>
    %cst_212 = arith.constant dense<0.000000e+00> : vector<8xf32>
    %454 = vector.multi_reduction <add>, %453, %cst_212 [1] : vector<8x512xf32> to vector<8xf32>
    %455 = vector.shape_cast %454 : vector<8xf32> to vector<8x1xf32>
    %456 = arith.mulf %453, %453 : vector<8x512xf32>
    %cst_213 = arith.constant dense<0.000000e+00> : vector<8xf32>
    %457 = vector.multi_reduction <add>, %456, %cst_213 [1] : vector<8x512xf32> to vector<8xf32>
    %458 = vector.shape_cast %457 : vector<8xf32> to vector<8x1xf32>
    %cst_214 = arith.constant 0.001953125 : f32
    %459 = vector.broadcast %cst_214 : f32 to vector<8x1xf32>
    %460 = arith.mulf %455, %459 : vector<8x1xf32>
    %cst_215 = arith.constant 0.001953125 : f32
    %461 = vector.broadcast %cst_215 : f32 to vector<8x1xf32>
    %462 = arith.mulf %458, %461 : vector<8x1xf32>
    %463 = arith.mulf %460, %460 : vector<8x1xf32>
    %464 = arith.subf %462, %463 : vector<8x1xf32>
    %465 = vector.broadcast %460 : vector<8x1xf32> to vector<8x512xf32>
    %466 = arith.subf %453, %465 : vector<8x512xf32>
    %cst_216 = arith.constant 9.99999974E-6 : f32
    %467 = vector.broadcast %cst_216 : f32 to vector<8x1xf32>
    %468 = arith.addf %464, %467 : vector<8x1xf32>
    %469 = math.rsqrt %468 : vector<8x1xf32>
    %470 = vector.broadcast %469 : vector<8x1xf32> to vector<8x512xf32>
    %471 = arith.mulf %466, %470 : vector<8x512xf32>
    %472 = arith.mulf %471, %18 : vector<8x512xf32>
    %473 = arith.addf %472, %26 : vector<8x512xf32>
    %474 = vector.extract_strided_slice %473 {offsets = [0, 0], sizes = [8, 128], strides = [1, 1]} : vector<8x512xf32> to vector<8x128xf32>
    %475 = math.exp %474 : vector<8x128xf32>
    %476 = vector.extract_strided_slice %473 {offsets = [0, 128], sizes = [8, 128], strides = [1, 1]} : vector<8x512xf32> to vector<8x128xf32>
    %477 = arith.negf %476 : vector<8x128xf32>
    %478 = math.exp %477 : vector<8x128xf32>
    %cst_217 = arith.constant 1.000000e+00 : f32
    %479 = vector.broadcast %cst_217 : f32 to vector<8x128xf32>
    %480 = arith.addf %479, %478 : vector<8x128xf32>
    %481 = arith.divf %479, %480 : vector<8x128xf32>
    %482 = vector.extract_strided_slice %473 {offsets = [0, 256], sizes = [8, 128], strides = [1, 1]} : vector<8x512xf32> to vector<8x128xf32>
    %483 = math.tanh %482 : vector<8x128xf32>
    %484 = vector.extract_strided_slice %473 {offsets = [0, 384], sizes = [8, 128], strides = [1, 1]} : vector<8x512xf32> to vector<8x128xf32>
    %485 = arith.negf %484 : vector<8x128xf32>
    %486 = math.exp %485 : vector<8x128xf32>
    %cst_218 = arith.constant 1.000000e+00 : f32
    %487 = vector.broadcast %cst_218 : f32 to vector<8x128xf32>
    %488 = arith.addf %487, %486 : vector<8x128xf32>
    %489 = arith.divf %487, %488 : vector<8x128xf32>
    %c1_219 = arith.constant 1 : index
    %c0_220 = arith.constant 0 : index
    %c0_221 = arith.constant 0 : index
    %490 = vector.load %arg9[%c1_219, %c0_220, %c0_221] : memref<2x8x128xf32, #tpu.memory_space<vmem>>, vector<1x8x128xf32>
    %491 = vector.shape_cast %490 : vector<1x8x128xf32> to vector<8x128xf32>
    %492 = arith.mulf %481, %491 : vector<8x128xf32>
    %493 = arith.mulf %475, %483 : vector<8x128xf32>
    %494 = arith.addf %492, %493 : vector<8x128xf32>
    %495 = math.tanh %494 : vector<8x128xf32>
    %496 = arith.mulf %489, %495 : vector<8x128xf32>
    %c1_222 = arith.constant 1 : index
    %c0_223 = arith.constant 0 : index
    %c0_224 = arith.constant 0 : index
    %497 = vector.load %arg9[%c1_222, %c0_223, %c0_224] : memref<2x8x128xf32, #tpu.memory_space<vmem>>, vector<1x8x128xf32>
    %498 = vector.shape_cast %497 : vector<1x8x128xf32> to vector<8x128xf32>
    %499 = vector.shape_cast %494 : vector<8x128xf32> to vector<1x8x128xf32>
    tpu.vector_store %arg9[%c1_222, %c0_223, %c0_224], %499 {strides = array<i32>} : memref<2x8x128xf32, #tpu.memory_space<vmem>>, vector<1x8x128xf32>,
    %c1_225 = arith.constant 1 : index
    %c0_226 = arith.constant 0 : index
    %c0_227 = arith.constant 0 : index
    %500 = vector.load %arg8[%c1_225, %c0_226, %c0_227] : memref<2x8x128xf32, #tpu.memory_space<vmem>>, vector<1x8x128xf32>
    %501 = vector.shape_cast %500 : vector<1x8x128xf32> to vector<8x128xf32>
    %502 = vector.shape_cast %496 : vector<8x128xf32> to vector<1x8x128xf32>
    tpu.vector_store %arg8[%c1_225, %c0_226, %c0_227], %502 {strides = array<i32>} : memref<2x8x128xf32, #tpu.memory_space<vmem>>, vector<1x8x128xf32>,
    return
  }
  func.func @transform_0(%arg0: i32) -> (i32, i32) {
    %c0_i32 = arith.constant 0 : i32
    %c0_i32_0 = arith.constant 0 : i32
    return %arg0, %c0_i32 : i32, i32
  }
  func.func @transform_1(%arg0: i32) -> (i32, i32) {
    %c0_i32 = arith.constant 0 : i32
    %c0_i32_0 = arith.constant 0 : i32
    %c0_i32_1 = arith.constant 0 : i32
    return %c0_i32, %c0_i32_0 : i32, i32
  }
  func.func @transform_2(%arg0: i32) -> (i32, i32, i32) {
    %c0_i32 = arith.constant 0 : i32
    %c0_i32_0 = arith.constant 0 : i32
    %c0_i32_1 = arith.constant 0 : i32
    %c0_i32_2 = arith.constant 0 : i32
    return %c0_i32, %c0_i32_0, %c0_i32_1 : i32, i32, i32
  }
  func.func @transform_3(%arg0: i32) -> (i32, i32, i32) {
    %c0_i32 = arith.constant 0 : i32
    %c0_i32_0 = arith.constant 0 : i32
    %c0_i32_1 = arith.constant 0 : i32
    %c0_i32_2 = arith.constant 0 : i32
    return %c0_i32, %c0_i32_0, %c0_i32_1 : i32, i32, i32
  }
  func.func @transform_4(%arg0: i32) -> (i32, i32, i32) {
    %c0_i32 = arith.constant 0 : i32
    %c0_i32_0 = arith.constant 0 : i32
    %c0_i32_1 = arith.constant 0 : i32
    %c0_i32_2 = arith.constant 0 : i32
    return %c0_i32, %c0_i32_0, %c0_i32_1 : i32, i32, i32
  }
  func.func @transform_5(%arg0: i32) -> (i32, i32, i32) {
    %c0_i32 = arith.constant 0 : i32
    %c0_i32_0 = arith.constant 0 : i32
    %c0_i32_1 = arith.constant 0 : i32
    %c0_i32_2 = arith.constant 0 : i32
    return %c0_i32, %c0_i32_0, %c0_i32_1 : i32, i32, i32
  }
  func.func @transform_6(%arg0: i32) -> (i32, i32, i32) {
    %c0_i32 = arith.constant 0 : i32
    %c0_i32_0 = arith.constant 0 : i32
    %c0_i32_1 = arith.constant 0 : i32
    %c0_i32_2 = arith.constant 0 : i32
    return %c0_i32, %c0_i32_0, %c0_i32_1 : i32, i32, i32
  }
  func.func @transform_7(%arg0: i32) -> (i32, i32, i32) {
    %c0_i32 = arith.constant 0 : i32
    %c0_i32_0 = arith.constant 0 : i32
    %c0_i32_1 = arith.constant 0 : i32
    %c0_i32_2 = arith.constant 0 : i32
    return %c0_i32, %c0_i32_0, %c0_i32_1 : i32, i32, i32
  }
  func.func @transform_8(%arg0: i32) -> (i32, i32, i32) {
    %c0_i32 = arith.constant 0 : i32
    %c0_i32_0 = arith.constant 0 : i32
    %c0_i32_1 = arith.constant 0 : i32
    %c0_i32_2 = arith.constant 0 : i32
    return %c0_i32, %c0_i32_0, %c0_i32_1 : i32, i32, i32
  }
}

</mosaic_0001>

<bundles_post_ra>
// kernel: tpu_custom_call.1
= control target key start
LH: loop header
LB: loop body
LE: loop exit
PB: predicated region body
PF: predicated region fallthrough
CT: control target
= control target key end

     0   :  { %14 = vsyncpa [#allocation4], 0  ;;  %s7063_s0 = inlined_call_operand.vmem [shape: bf16[64,32], index: 0, kind: input, shape index: {}]   ;;  %s7064_s1 = inlined_call_operand.hbm [shape: bf16[32,512], index: 1, kind: input, shape index: {}]   ;;  %s7065_s2 = inlined_call_operand.hbm [shape: bf16[2,128,512], index: 2, kind: input, shape index: {}]   ;;  %s7066_s3 = inlined_call_operand.hbm [shape: bf16[1,128,512], index: 3, kind: input, shape index: {}]   ;;  %s7067_s4 = inlined_call_operand.vmem [shape: f32[2,1,512], index: 4, kind: input, shape index: {}]   ;;  %s7068_s5 = inlined_call_operand.vmem [shape: f32[2,1,512], index: 5, kind: input, shape index: {}]   ;;  %s7069_s6 = inlined_call_operand.vmem [shape: f32[2,1,512], index: 6, kind: input, shape index: {}]   ;;  %s7070_s7 = inlined_call_operand.hbm [shape: f32[2,8,128], index: 7, kind: output, shape index: {0}]   ;;  %s7071_s8 = inlined_call_operand.hbm [shape: f32[2,8,128], index: 8, kind: output, shape index: {1}]  }
   0x1   :  { %15 = vsyncpa [#allocation7], 0 }
   0x2   :  { %16 = vsyncpa [#allocation5], 0 }
   0x3   :  { %17 = vsyncpa [#allocation11], 0  ;;  %s5756_s27 = smov 0  }
   0x4 LB: > { %s5762_s28 = sadd.s32 4294967295, %s5698_s27   ;;  %p4607_p0 = scmp.ge.s32.totalorder %s5698_s27, 1  ;;  %s5698_s27 = sphi %s5756_s27, %s23_s27  }
   0x5   : > { %p222_p1 = scmp.lt.s32.totalorder %s5698_s27, 3  ;;  %p7072_p3 = scmp.eq.s32.totalorder %s5762_s28, 0 }
   0x6   : > { %s5700_s30 = smov [#allocation6]   ;;  %s5701_s10 = smov [#allocation3]  }
   0x7   : > { %p5768_p4 = pnand %p4607_p0, %p222_p1  ;;  %s247_s9 = sshll.u32 %s5700_s30, 4  ;;  %s248_s9 = int_to_ptr.vmem [resolvable:$true] %s247_s9 }
   0x8   : > { %s234_s11 = sshll.u32 %s5701_s10, 4  ;;  %s5702_s13 = smov [#allocation8]   ;;  %s5780_s11 = int_to_ptr.vmem [resolvable:$true] %s234_s11 }
   0x9   : > { %s7200_s29 = scalar_select %p5768_p4, 1, 0 }
   0xa   : > { %p5062_p5 = pneg %p5768_p4  ;;  %s260_s14 = sshll.u32 %s5702_s13, 4  ;;  %s5782_s14 = int_to_ptr.vmem [resolvable:$true] %s260_s14 }
   0xb   : > { %s5540_s17 = scalar_lea.hbm %s7065_s2, 8192 }
   0xc   : > { %p5776_p6 = pnand %p7072_p3, %p5062_p5  ;;  %p5541_p7 = scmp.ne.s32.totalorder %s7065_s2, %s5540_s17 }
   0xd   : > { %p5547_p11 = scmp.lt.u32.totalorder %s5540_s17, %s7065_s2 }
   0xe   : > { %p5792_p8 = pneg %p5776_p6 }
  0x10   : > { %p5543_p9 = pnand %p5792_p8, %p5541_p7 }
  0x12   : > { %p5544_p10 = pneg %p5543_p9 }
  0x14   : > { %p5549_p12 = pnand %p5547_p11, %p5544_p10 }
  0x16   : > { %5552 = shalt.err (!%p5549_p12)
}
  0x17   : > { %s5553_s23 = scalar_lea.vmem %s248_s9, 8192  ;;  %p5561_p5 = scmp.lt.s32.totalorder %s248_s9, %s248_s9 }
  0x18   : > { %p5554_p13 = scmp.ne.s32.totalorder %s248_s9, %s5553_s23  ;;  %p5562_p2 = scmp.lt.s32.totalorder %s5553_s23, %s5553_s23 }
  0x1a   : > { %p5556_p0 = pnand %p5554_p13, %p5792_p8  ;;  %p5563_p3 = por %p5562_p2, %p5561_p5 }
  0x1c   : > { %p5557_p1 = pneg %p5556_p0 }
  0x1e   : > { %p5564_p4 = pnand %p5563_p3, %p5557_p1 }
  0x20   : > { %5567 = shalt.err (!%p5564_p4)
}
  0x21   : > { %s5703_s24 = smov 256   ;;  %s5704_s25 = smov 16  }
  0x22   : > { %5068 = dma.hbm_to_vmem [thread:$0]  (!%p5776_p6), %s7065_s2, 8192, %s248_s9, [#allocation7], %s5703_s24, %s5703_s24, %s5704_s25  }
  0x23   : > { %s5568_s15 = scalar_lea.hbm %s7064_s1, 1024 }
  0x24   : > { %p5569_p2 = scmp.ne.s32.totalorder %s7064_s1, %s5568_s15  ;;  %p5575_p7 = scmp.lt.u32.totalorder %s5568_s15, %s7064_s1 }
  0x26   : > { %p5571_p3 = pnand %p5569_p2, %p5792_p8 }
  0x28   : > { %p5572_p4 = pneg %p5571_p3 }
  0x2a   : > { %p5577_p9 = pnand %p5575_p7, %p5572_p4 }
  0x2c   : > { %5580 = shalt.err (!%p5577_p9)
}
  0x2d   : > { %s5581_s9 = scalar_lea.vmem %s5780_s11, 1024  ;;  %p5589_p13 = scmp.lt.s32.totalorder %s5780_s11, %s5780_s11 }
  0x2e   : > { %p5582_p10 = scmp.ne.s32.totalorder %s5780_s11, %s5581_s9  ;;  %p5590_p0 = scmp.lt.s32.totalorder %s5581_s9, %s5581_s9 }
  0x30   : > { %p5584_p11 = pnand %p5582_p10, %p5792_p8  ;;  %p5591_p1 = por %p5590_p0, %p5589_p13 }
  0x32   : > { %p5585_p12 = pneg %p5584_p11 }
  0x34   : > { %p5592_p5 = pnand %p5591_p1, %p5585_p12 }
  0x36   : > { %5595 = shalt.err (!%p5592_p5)
}
  0x37   : > { %5065 = dma.hbm_to_vmem [thread:$0]  (!%p5776_p6), %s7064_s1, 1024, %s5780_s11, [#allocation4], %s5703_s24, %s5703_s24, %s5704_s25  }
  0x38   : > { %s5596_s30 = scalar_lea.hbm %s7066_s3, 4096 }
  0x39   : > { %p5597_p2 = scmp.ne.s32.totalorder %s7066_s3, %s5596_s30  ;;  %p5603_p7 = scmp.lt.u32.totalorder %s5596_s30, %s7066_s3 }
  0x3b   : > { %p5599_p3 = pnand %p5597_p2, %p5792_p8 }
  0x3d   : > { %p5600_p4 = pneg %p5599_p3 }
  0x3f   : > { %p5605_p9 = pnand %p5603_p7, %p5600_p4 }
  0x41   : > { %5608 = shalt.err (!%p5605_p9)
}
  0x42   : > { %s5609_s11 = scalar_lea.vmem %s5782_s14, 4096  ;;  %p5617_p13 = scmp.lt.s32.totalorder %s5782_s14, %s5782_s14 }
  0x43   : > { %p5610_p10 = scmp.ne.s32.totalorder %s5782_s14, %s5609_s11  ;;  %p5618_p0 = scmp.lt.s32.totalorder %s5609_s11, %s5609_s11 }
  0x45   : > { %p5612_p11 = pnand %p5610_p10, %p5792_p8  ;;  %p5619_p1 = por %p5618_p0, %p5617_p13 }
  0x47   : > { %p5613_p12 = pneg %p5612_p11 }
  0x49   : > { %p5620_p5 = pnand %p5619_p1, %p5613_p12 }
  0x4b   : > { %5623 = shalt.err (!%p5620_p5)
}
  0x4c   : > { %5071 = dma.hbm_to_vmem [thread:$0]  (!%p5776_p6), %s7066_s3, 4096, %s5782_s14, [#allocation7], %s5703_s24, %s5703_s24, %s5704_s25  }
  0x4d   : > { %p7203_p2 = scmp.ne.s32.totalorder %s7200_s29, 0 }
  0x4f   : > { %294 = sbr.rel (%p7203_p2) target bundleno = 2445 (0x98d), region = 48 }
  0x56   : > { %p7204_p8 = scmp.eq.s32.totalorder %s5762_s28, 0 }
  0x58   : > { %5681 = dma.done.wait (%p7204_p8), [#allocation4], 1024   ;;  %p7205_p3 = pmov %p7204_p8 }
  0x5a   : > { %5683 = vsyncadd (%p7205_p3), [#allocation4], 4294966272  ;;  %p7206_p4 = pmov %p7205_p3 }
  0x5b   : > { %p7207_p7 = pmov %p7205_p3 }
  0x5c   : > { %5685 = dma.done.wait (%p7206_p4), [#allocation7], 12288  }
  0x5d   : > { %5687 = vsyncadd (%p7207_p7), [#allocation7], 4294955008  ;;  %s4616_s12 = sshll.u32 %s5762_s28, 2  ;;  %p7208_p6 = scmp.ne.s32.totalorder %s5762_s28, 0 }
  0x5e   : > { %p332_p9 = scmp.lt.s32.totalorder %s4616_s12, 7  ;;  %v5705_v0 = vmov (!%p7208_p6), 0.0  }
  0x5f   : > { %341 = sbr.rel (%p7208_p6) target bundleno = 102 (0x66), region = 64  ;;  %342 = vst [vmem:[#allocation9] sm:$0xff] (!%p7208_p6), %v5705_v0  ;;  %343 = vst [vmem:[#allocation9 + $0x8] sm:$0xff] (!%p7208_p6), %v5705_v0 }
  0x60   : > { %s7467_s12 = smov (!%p332_p9, %s4616_s12), 7  ;;  %344 = vst [vmem:[#allocation10] sm:$0xff] (!%p7208_p6), %v5705_v0  ;;  %345 = vst [vmem:[#allocation10 + $0x8] sm:$0xff] (!%p7208_p6), %v5705_v0 }
  0x61   : > { %s4617_s14 = sshll.u32 %s7467_s12, 2 }
  0x62   : > { %s5877_s24 = scalar_lea.vmem %s7063_s0, %s4617_s14 }
  0x66 PF: > { %v5101_v1 = vld [vmem:[#allocation3 + $0x4] ss:$16 sps:$4 sm:$0xff]   ;;  %v5103_v2 = vld [vmem:[#allocation3 + $0xc] ss:$16 sps:$4 sm:$0xff]   ;;  %v7074_v3 = vmov 0   ;;  %vm430_vm0 = vcmask 261120   ;;  %v360_v46 = vlaneseq }
  0x67   : > { %469 = vmatprep.mubr.bf16.mxu0 %v7074_v3  ;;  %522 = vmatprep.mubr.bf16.mxu1 %v7074_v3  ;;  %v5105_v4 = vld [vmem:[#allocation3] ss:$16 sps:$4 sm:$0xff]   ;;  %v5106_v5 = vld [vmem:[#allocation3 + $0x8] ss:$16 sps:$4 sm:$0xff]   ;;  %v5107_v6 = vld [vmem:[#allocation3 + $0x24] ss:$16 sps:$4 sm:$0xff]  }
  0x68   : > { %437 = vmatprep.subr.bf16.mxu0 %v5101_v1  ;;  %490 = vmatprep.subr.bf16.mxu1 %v5103_v2  ;;  %v5109_v7 = vld [vmem:[#allocation3 + $0x2c] ss:$16 sps:$4 sm:$0xff]   ;;  %v5111_v8 = vld [vmem:[#allocation3 + $0x20] ss:$16 sps:$4 sm:$0xff]   ;;  %v5112_v9 = vld [vmem:[#allocation3 + $0x28] ss:$16 sps:$4 sm:$0xff]  }
  0x69   : > { %438 = vmatpush1.bf16.msra.mxu0 %v5105_v4  ;;  %491 = vmatpush1.bf16.msra.mxu1 %v5106_v5  ;;  %v5113_v10 = vld [vmem:[%s5877_s24] sm:$0xff]   ;;  %v5117_v13 = vld [vmem:[#allocation6 + $0x8] ss:$16 sps:$4 sm:$0xff]   ;;  %v5886_v14 = vld [vmem:[#allocation6 + $0xc] ss:$16 sps:$4 sm:$0xff]   ;;  %v361_v47 = vshrl.u32 %v360_v46, 7 }
  0x6a   : > { %439 = vmatprep.subr.bf16.mxu0 %v5107_v6  ;;  %492 = vmatprep.subr.bf16.mxu1 %v5109_v7  ;;  %v5114_v11 = vld [vmem:[#allocation6] ss:$16 sps:$4 sm:$0xff]   ;;  %v5884_v12 = vld [vmem:[#allocation6 + $0x4] ss:$16 sps:$4 sm:$0xff]   ;;  %v5125_v16 = vld [vmem:[#allocation6 + $0x2c] ss:$16 sps:$4 sm:$0xff]  }
  0x6b   : > { %v5122_v15 = vld [vmem:[#allocation6 + $0x24] ss:$16 sps:$4 sm:$0xff]   ;;  %v5120_v17 = vld [vmem:[#allocation6 + $0x20] ss:$16 sps:$4 sm:$0xff]   ;;  %v5123_v18 = vld [vmem:[#allocation6 + $0x28] ss:$16 sps:$4 sm:$0xff]  }
  0x6c   : > { %v5128_v19 = vld [vmem:[#allocation6 + $0x44] ss:$16 sps:$4 sm:$0xff]   ;;  %v5131_v20 = vld [vmem:[#allocation6 + $0x4c] ss:$16 sps:$4 sm:$0xff]   ;;  %v5126_v21 = vld [vmem:[#allocation6 + $0x40] ss:$16 sps:$4 sm:$0xff]  }
  0x6d   : > { %440 = vmatpush1.bf16.msra.mxu0 %v5111_v8  ;;  %493 = vmatpush1.bf16.msra.mxu1 %v5112_v9  ;;  %v5894_v22 = vld [vmem:[#allocation6 + $0x48] ss:$16 sps:$4 sm:$0xff]   ;;  %v5896_v23 = vld [vmem:[#allocation6 + $0x64] ss:$16 sps:$4 sm:$0xff]   ;;  %v5898_v24 = vld [vmem:[#allocation6 + $0x6c] ss:$16 sps:$4 sm:$0xff]  }
  0x6e   : > { %870 = vmatprep.subr.bf16.mxu0 %v5884_v12  ;;  %911 = vmatprep.subr.bf16.mxu1 %v5886_v14  ;;  %v5900_v25 = vld [vmem:[#allocation6 + $0x60] ss:$16 sps:$4 sm:$0xff]   ;;  %v5903_v26 = vld [vmem:[#allocation6 + $0x68] ss:$16 sps:$4 sm:$0xff]   ;;  %v5905_v27 = vld [vmem:[#allocation6 + $0x84] ss:$16 sps:$4 sm:$0xff]  }
  0x6f   : > { %v5909_v28 = vld [vmem:[#allocation6 + $0x8c] ss:$16 sps:$4 sm:$0xff]   ;;  %v5914_v30 = vld [vmem:[#allocation6 + $0x80] ss:$16 sps:$4 sm:$0xff]   ;;  %v5916_v31 = vld [vmem:[#allocation6 + $0x88] ss:$16 sps:$4 sm:$0xff]  }
  0x70   : > { %4629 = vmatmul.mubr.msk.bf16.vlgmr.msra.gmra.mrb[0].mxu0 %vm430_vm0, %v5113_v10  ;;  %4631 = vmatmul.mubr.msk.bf16.vlgmr.msra.gmra.mrb[0].mxu1 %vm430_vm0, %v5113_v10  ;;  %v5150_v29 = vld [vmem:[%s5877_s24 + $0x8] sm:$0xff]   ;;  %v5920_v32 = vld [vmem:[#allocation6 + $0xa4] ss:$16 sps:$4 sm:$0xff]   ;;  %v5930_v34 = vld [vmem:[#allocation6 + $0xa0] ss:$16 sps:$4 sm:$0xff]   ;;  %v5964_v48 = vsub.s32 0, %v361_v47 }
  0x71   : > { %871 = vmatpush1.bf16.msra.mxu0 %v5114_v11  ;;  %912 = vmatpush1.bf16.msra.mxu1 %v5117_v13  ;;  %v5922_v33 = vld [vmem:[#allocation6 + $0xac] ss:$16 sps:$4 sm:$0xff]   ;;  %v5932_v35 = vld [vmem:[#allocation6 + $0xa8] ss:$16 sps:$4 sm:$0xff]   ;;  %v5934_v36 = vld [vmem:[#allocation6 + $0xc4] ss:$16 sps:$4 sm:$0xff]  }
  0x72   : > { %872 = vmatprep.subr.bf16.mxu0 %v5122_v15  ;;  %913 = vmatprep.subr.bf16.mxu1 %v5125_v16  ;;  %v5938_v37 = vld [vmem:[#allocation6 + $0xcc] ss:$16 sps:$4 sm:$0xff]   ;;  %v5940_v38 = vld [vmem:[#allocation6 + $0xc0] ss:$16 sps:$4 sm:$0xff]   ;;  %v5942_v39 = vld [vmem:[#allocation6 + $0xc8] ss:$16 sps:$4 sm:$0xff]  }
  0x73   : > { %479 = vmatprep.mubr.bf16.mxu0 %v7074_v3  ;;  %532 = vmatprep.mubr.bf16.mxu1 %v7074_v3  ;;  %v5944_v40 = vld [vmem:[#allocation6 + $0xe4] ss:$16 sps:$4 sm:$0xff]   ;;  %v5946_v41 = vld [vmem:[#allocation6 + $0xec] ss:$16 sps:$4 sm:$0xff]   ;;  %v5952_v42 = vld [vmem:[#allocation6 + $0xe0] ss:$16 sps:$4 sm:$0xff]  }
  0x74   : > { %v5954_v43 = vld [vmem:[#allocation6 + $0xe8] ss:$16 sps:$4 sm:$0xff]   ;;  %v676_v44 = vld [vmem:[#allocation9] sm:$0xff]  ;;  %v5966_v49 = vsub.s32 2, %v361_v47  ;;  %v5971_v51 = vsub.s32 3, %v361_v47  ;;  %v5973_v52 = vsub.s32 1, %v361_v47 }
  0x75   : > { %873 = vmatpush1.bf16.msra.mxu0 %v5120_v17  ;;  %914 = vmatpush1.bf16.msra.mxu1 %v5123_v18  ;;  %v677_v45 = vpack.c.bf16 %v676_v44, %v676_v44  ;;  %v358_v50 = vld [vmem:[%s7067_s4] sm:$0xf]  ;;  %s5707_s11 = smov [#allocation10]   ;;  %p5078_p10 = scmp.eq.s32.totalorder %s5762_s28, 1 }
  0x76   : > { %874 = vmatprep.subr.bf16.mxu0 %v5128_v19  ;;  %915 = vmatprep.subr.bf16.mxu1 %v5131_v20  ;;  %7209 = vst [vmem:[#allocation16_spill] sm:$0xff] %v5973_v52  ;;  %v363_v53 = vrot.slane %v358_v50, %v5964_v48  ;;  %v371_v54 = vrot.slane %v358_v50, %v5966_v49  ;;  %s4522_s17 = sshll.u32 %s5707_s11, 4  ;;  %s4523_s17 = int_to_ptr.vmem [resolvable:$true] %s4522_s17 }
  0x77   : > { %v375_v57 = vrot.slane %v358_v50, %v5971_v51  ;;  %v367_v60 = vrot.slane %v358_v50, %v5973_v52  ;;  %s5624_s18 = scalar_lea.vmem %s4523_s17, 256  ;;  %p5631_p0 = scmp.lt.s32.totalorder %s4523_s17, %s4523_s17 }
  0x78   : > { %4630 = vmatmul.mubr.msk.bf16.gmra.mrb[4].mxu0 %vm430_vm0, %v5150_v29  ;;  %4632 = vmatmul.mubr.msk.bf16.gmra.mrb[4].mxu1 %vm430_vm0, %v5150_v29  ;;  %p5625_p11 = scmp.ne.s32.totalorder %s4523_s17, %s5624_s18  ;;  %p5632_p1 = scmp.lt.s32.totalorder %s5624_s18, %s5624_s18 }
  0x79   : > { %875 = vmatpush1.bf16.msra.mxu0 %v5126_v21  ;;  %916 = vmatpush1.bf16.msra.mxu1 %v5894_v22 }
  0x7a   : > { %876 = vmatprep.subr.bf16.mxu0 %v5896_v23  ;;  %917 = vmatprep.subr.bf16.mxu1 %v5898_v24  ;;  %p5626_p12 = pnand %p5625_p11, %p5078_p10  ;;  %p5633_p5 = por %p5632_p1, %p5631_p0 }
  0x7b   : > { %902 = vmatprep.mubr.bf16.mxu0 %v7074_v3  ;;  %943 = vmatprep.mubr.bf16.mxu1 %v7074_v3 }
  0x7c   : > { %p5627_p13 = pneg %p5626_p12 }
  0x7d   : > { %877 = vmatpush1.bf16.msra.mxu0 %v5900_v25  ;;  %918 = vmatpush1.bf16.msra.mxu1 %v5903_v26 }
  0x7e   : > { %878 = vmatprep.subr.bf16.mxu0 %v5905_v27  ;;  %919 = vmatprep.subr.bf16.mxu1 %v5909_v28  ;;  %p5634_p2 = pnand %p5633_p5, %p5627_p13 }
  0x81   : > { %879 = vmatpush1.bf16.msra.mxu0 %v5914_v30  ;;  %920 = vmatpush1.bf16.msra.mxu1 %v5916_v31 }
  0x82   : > { %880 = vmatprep.subr.bf16.mxu0 %v5920_v32  ;;  %921 = vmatprep.subr.bf16.mxu1 %v5922_v33 }
  0x85   : > { %881 = vmatpush1.bf16.msra.mxu0 %v5930_v34  ;;  %922 = vmatpush1.bf16.msra.mxu1 %v5932_v35 }
  0x86   : > { %882 = vmatprep.subr.bf16.mxu0 %v5934_v36  ;;  %923 = vmatprep.subr.bf16.mxu1 %v5938_v37 }
  0x89   : > { %883 = vmatpush1.bf16.msra.mxu0 %v5940_v38  ;;  %924 = vmatpush1.bf16.msra.mxu1 %v5942_v39 }
  0x8a   : > { %884 = vmatprep.subr.bf16.mxu0 %v5944_v40  ;;  %925 = vmatprep.subr.bf16.mxu1 %v5946_v41 }
  0x8d   : > { %885 = vmatpush1.bf16.msra.mxu0 %v5952_v42  ;;  %926 = vmatpush1.bf16.msra.mxu1 %v5954_v43 }
  0x90   : > { %903 = vmatmul.mubr.bf16.vlgmr.msra.gmra.mrb[8].mxu0 %v677_v45  ;;  %944 = vmatmul.mubr.bf16.vlgmr.msra.gmra.mrb[8].mxu1 %v677_v45 }
  0x91   : > { %1276 = vmatprep.mubr.bf16.mxu0 %v7074_v3  ;;  %1317 = vmatprep.mubr.bf16.mxu1 %v7074_v3  ;;  %v6080_v3 = vld [vmem:[#allocation6 + $0x1a4] ss:$16 sps:$4 sm:$0xff]  }
  0x92   : > { %7224 = vst [vmem:[#allocation31_spill] sm:$0xff] %v6080_v3 }
 0x143   : > { %v471_v55 = vpop.f32.mrb[0].mxu0  ;;  %v524_v56 = vpop.f32.mrb[0].mxu1 }
 0x144   : > { %v473_v58 = vpop.f32.mrb[1].mxu0  ;;  %v526_v59 = vpop.f32.mrb[1].mxu1  ;;  %v472_v45 = vadd.f32 %v471_v55, %v363_v53  ;;  %v525_v46 = vadd.f32 %v524_v56, %v371_v54 }
 0x145   : > { %v475_v61 = vpop.f32.mrb[2].mxu0  ;;  %v528_v62 = vpop.f32.mrb[2].mxu1  ;;  %v474_v47 = vadd.f32 %v473_v58, %v367_v60  ;;  %v527_v50 = vadd.f32 %v526_v59, %v375_v57 }
 0x146   : > { %v5979_v63 = vadd.f32 %v475_v61, %v363_v53  ;;  %v477_v0 = vpop.f32.mrb[3].mxu0  ;;  %v5981_v1 = vadd.f32 %v528_v62, %v371_v54  ;;  %v530_v2 = vpop.f32.mrb[3].mxu1 }
 0x147   : > { %v5983_v4 = vadd.f32 %v477_v0, %v367_v60  ;;  %v5985_v5 = vadd.f32 %v530_v2, %v375_v57 }
 0x148   : > { %7210 = vst [vmem:[#allocation17_spill] sm:$0xff] %v5979_v63  ;;  %7211 = vst [vmem:[#allocation18_spill] sm:$0xff] %v5981_v1  ;;  %v1049_v1 = vld [vmem:[#allocation9 + $0x8] sm:$0xff] }
 0x149   : > { %7212 = vst [vmem:[#allocation19_spill] sm:$0xff] %v5983_v4  ;;  %7213 = vst [vmem:[#allocation20_spill] sm:$0xff] %v5985_v5  ;;  %v6107_v5 = vld [vmem:[#allocation6 + $0x1ec] ss:$16 sps:$4 sm:$0xff]   ;;  %v6110_v4 = vld [vmem:[#allocation6 + $0x1e0] ss:$16 sps:$4 sm:$0xff]  }
 0x14a   : > { %7233 = vst [vmem:[#allocation40_spill] sm:$0xff] %v6107_v5  ;;  %7234 = vst [vmem:[#allocation41_spill] sm:$0xff] %v6110_v4  ;;  %v6114_v63 = vld [vmem:[#allocation6 + $0x1e8] ss:$16 sps:$4 sm:$0xff]  }
 0x14b   : > { %v481_v6 = vpop.f32.mrb[4].mxu0  ;;  %v534_v7 = vpop.f32.mrb[4].mxu1  ;;  %7235 = vst [vmem:[#allocation42_spill] sm:$0xff] %v6114_v63 }
 0x14c   : > { %v5987_v8 = vadd.f32 %v481_v6, %v363_v53  ;;  %v483_v9 = vpop.f32.mrb[5].mxu0  ;;  %v5989_v10 = vadd.f32 %v534_v7, %v371_v54  ;;  %v536_v11 = vpop.f32.mrb[5].mxu1 }
 0x14d   : > { %v5991_v13 = vadd.f32 %v483_v9, %v367_v60  ;;  %v485_v15 = vpop.f32.mrb[6].mxu0  ;;  %v5993_v16 = vadd.f32 %v536_v11, %v375_v57  ;;  %v538_v17 = vpop.f32.mrb[6].mxu1 }
 0x14e   : > { %7214 = vst [vmem:[#allocation21_spill] sm:$0xff] %v5987_v8  ;;  %7215 = vst [vmem:[#allocation22_spill] sm:$0xff] %v5989_v10  ;;  %v5995_v18 = vadd.f32 %v485_v15, %v363_v53  ;;  %v487_v19 = vpop.f32.mrb[7].mxu0  ;;  %v5997_v20 = vadd.f32 %v538_v17, %v371_v54  ;;  %v540_v21 = vpop.f32.mrb[7].mxu1  ;;  %v6102_v10 = vld [vmem:[#allocation6 + $0x1c8] ss:$16 sps:$4 sm:$0xff]  }
 0x14f   : > { %7216 = vst [vmem:[#allocation23_spill] sm:$0xff] %v5991_v13  ;;  %7217 = vst [vmem:[#allocation24_spill] sm:$0xff] %v5993_v16  ;;  %v5999_v29 = vadd.f32 %v487_v19, %v367_v60  ;;  %v6001_v44 = vadd.f32 %v540_v21, %v375_v57  ;;  %v6095_v16 = vld [vmem:[#allocation6 + $0x1cc] ss:$16 sps:$4 sm:$0xff]   ;;  %v6098_v13 = vld [vmem:[#allocation6 + $0x1c0] ss:$16 sps:$4 sm:$0xff]  }
 0x150   : > { %7218 = vst [vmem:[#allocation25_spill] sm:$0xff] %v5995_v18  ;;  %7219 = vst [vmem:[#allocation26_spill] sm:$0xff] %v5997_v20  ;;  %v6090_v20 = vld [vmem:[#allocation6 + $0x1a8] ss:$16 sps:$4 sm:$0xff]   ;;  %v6092_v18 = vld [vmem:[#allocation6 + $0x1c4] ss:$16 sps:$4 sm:$0xff]  }
 0x151   : > { %7220 = vst [vmem:[#allocation27_spill] sm:$0xff] %v5999_v29  ;;  %7221 = vst [vmem:[#allocation28_spill] sm:$0xff] %v6001_v44  ;;  %v6083_v44 = vld [vmem:[#allocation6 + $0x1ac] ss:$16 sps:$4 sm:$0xff]   ;;  %v6086_v29 = vld [vmem:[#allocation6 + $0x1a0] ss:$16 sps:$4 sm:$0xff]  }
 0x152   : > { %7225 = vst [vmem:[#allocation32_spill] sm:$0xff] %v6083_v44  ;;  %7226 = vst [vmem:[#allocation33_spill] sm:$0xff] %v6086_v29  ;;  %v6104_v8 = vld [vmem:[#allocation6 + $0x1e4] ss:$16 sps:$4 sm:$0xff]  }
 0x153   : > { %7227 = vst [vmem:[#allocation34_spill] sm:$0xff] %v6090_v20  ;;  %7228 = vst [vmem:[#allocation35_spill] sm:$0xff] %v6092_v18 }
 0x154   : > { %7229 = vst [vmem:[#allocation36_spill] sm:$0xff] %v6095_v16  ;;  %7230 = vst [vmem:[#allocation37_spill] sm:$0xff] %v6098_v13 }
 0x155   : > { %7231 = vst [vmem:[#allocation38_spill] sm:$0xff] %v6102_v10  ;;  %7232 = vst [vmem:[#allocation39_spill] sm:$0xff] %v6104_v8 }
 0x163   : > { %v904_v61 = vpop.f32.mrb[8].mxu0  ;;  %v945_v62 = vpop.f32.mrb[8].mxu1 }
 0x164   : > { %v6003_v0 = vadd.f32 %v904_v61, %v472_v45  ;;  %v6005_v2 = vadd.f32 %v945_v62, %v525_v46  ;;  %v906_v6 = vpop.f32.mrb[9].mxu0  ;;  %v947_v7 = vpop.f32.mrb[9].mxu1  ;;  %v6027_v61 = vld [vmem:[#allocation6 + $0x10c] ss:$16 sps:$4 sm:$0xff]   ;;  %v6030_v62 = vld [vmem:[#allocation6 + $0x108] ss:$16 sps:$4 sm:$0xff]  }
 0x165   : > { %v6007_v9 = vadd.f32 %v906_v6, %v474_v47  ;;  %v6009_v11 = vadd.f32 %v947_v7, %v527_v50  ;;  %v908_v15 = vpop.f32.mrb[10].mxu0  ;;  %v949_v17 = vpop.f32.mrb[10].mxu1  ;;  %v6023_v47 = vld [vmem:[#allocation6 + $0x104] ss:$16 sps:$4 sm:$0xff]   ;;  %v6025_v50 = vld [vmem:[#allocation6 + $0x100] ss:$16 sps:$4 sm:$0xff]   ;;  %1285 = vmatprep.subr.bf16.mxu1 %v6027_v61 }
 0x166   : > { %v961_v53 = vmul.f32 %v6003_v0, %v6003_v0  ;;  %v909_v54 = vpop.f32.mrb[11].mxu0  ;;  %v950_v55 = vpop.f32.mrb[11].mxu1  ;;  %v963_v58 = vmul.f32 %v6005_v2, %v6005_v2  ;;  %1244 = vmatprep.subr.bf16.mxu0 %v6023_v47  ;;  %1286 = vmatpush1.bf16.msra.mxu1 %v6030_v62  ;;  %v6035_v6 = vld [vmem:[#allocation6 + $0x124] ss:$16 sps:$4 sm:$0xff]   ;;  %v6037_v7 = vld [vmem:[#allocation6 + $0x120] ss:$16 sps:$4 sm:$0xff]  }
 0x167   : > { %v962_v56 = vmul.f32 %v6007_v9, %v6007_v9  ;;  %v956_v57 = vadd.f32 %v6007_v9, %v6003_v0  ;;  %v964_v45 = vmul.f32 %v6009_v11, %v6009_v11  ;;  %1245 = vmatpush1.bf16.msra.mxu0 %v6025_v50  ;;  %v6039_v15 = vld [vmem:[#allocation6 + $0x128] ss:$16 sps:$4 sm:$0xff]   ;;  %v6041_v17 = vld [vmem:[#allocation6 + $0x12c] ss:$16 sps:$4 sm:$0xff]   ;;  %v6048_v54 = vld [vmem:[#allocation6 + $0x140] ss:$16 sps:$4 sm:$0xff]  }
 0x168   : > { %1246 = vmatprep.subr.bf16.mxu0 %v6035_v6  ;;  %1287 = vmatprep.subr.bf16.mxu1 %v6041_v17  ;;  %v6050_v55 = vld [vmem:[#allocation6 + $0x14c] ss:$16 sps:$4 sm:$0xff]  }
 0x169   : > { %v957_v59 = vadd.f32 %v956_v57, %v6005_v2  ;;  %v965_v60 = vadd.f32 %v962_v56, %v961_v53  ;;  %v6044_v53 = vld [vmem:[#allocation6 + $0x144] ss:$16 sps:$4 sm:$0xff]   ;;  %v6054_v56 = vld [vmem:[#allocation6 + $0x148] ss:$16 sps:$4 sm:$0xff]  }
 0x16a   : > { %1288 = vmatpush1.bf16.msra.mxu1 %v6039_v15  ;;  %v6056_v57 = vld [vmem:[#allocation6 + $0x164] ss:$16 sps:$4 sm:$0xff]  }
 0x16b   : > { %v958_v19 = vadd.f32 %v957_v59, %v6009_v11  ;;  %v966_v21 = vadd.f32 %v965_v60, %v963_v58  ;;  %1247 = vmatpush1.bf16.msra.mxu0 %v6037_v7  ;;  %1289 = vmatprep.subr.bf16.mxu1 %v6050_v55  ;;  %v6059_v58 = vld [vmem:[#allocation6 + $0x16c] ss:$16 sps:$4 sm:$0xff]   ;;  %v6062_v59 = vld [vmem:[#allocation6 + $0x160] ss:$16 sps:$4 sm:$0xff]   ;;  %v6066_v60 = vld [vmem:[#allocation6 + $0x168] ss:$16 sps:$4 sm:$0xff]  }
 0x16c   : > { %1248 = vmatprep.subr.bf16.mxu0 %v6044_v53 }
 0x16d   : > { %959 = vadd.xlane.f32.xlu0 %v958_v19  ;;  %v967_v46 = vadd.f32 %v966_v21, %v964_v45  ;;  %v6068_v19 = vld [vmem:[#allocation6 + $0x184] ss:$16 sps:$4 sm:$0xff]   ;;  %v6071_v21 = vld [vmem:[#allocation6 + $0x18c] ss:$16 sps:$4 sm:$0xff]   ;;  %v6074_v45 = vld [vmem:[#allocation6 + $0x180] ss:$16 sps:$4 sm:$0xff]  }
 0x16e   : > { %1290 = vmatpush1.bf16.msra.mxu1 %v6054_v56  ;;  %7222 = vst [vmem:[#allocation29_spill] sm:$0xff] %v6074_v45 }
 0x16f   : > { %1249 = vmatpush1.bf16.msra.mxu0 %v6048_v54  ;;  %1291 = vmatprep.subr.bf16.mxu1 %v6059_v58 }
 0x170   : > { %1250 = vmatprep.subr.bf16.mxu0 %v6056_v57 }
 0x171   : > { %968 = vadd.xlane.f32.xlu0 %v967_v46  ;;  %v6078_v46 = vld [vmem:[#allocation6 + $0x188] ss:$16 sps:$4 sm:$0xff]  }
 0x172   : > { %1292 = vmatpush1.bf16.msra.mxu1 %v6066_v60  ;;  %7223 = vst [vmem:[#allocation30_spill] sm:$0xff] %v6078_v46 }
 0x173   : > { %1251 = vmatpush1.bf16.msra.mxu0 %v6062_v59  ;;  %1293 = vmatprep.subr.bf16.mxu1 %v6071_v21 }
 0x174   : > { %1252 = vmatprep.subr.bf16.mxu0 %v6068_v19 }
 0x176   : > { %1294 = vmatpush1.bf16.msra.mxu1 %v6078_v46 }
 0x177   : > { %1253 = vmatpush1.bf16.msra.mxu0 %v6074_v45  ;;  %1295 = vmatprep.subr.bf16.mxu1 %v6083_v44 }
 0x178   : > { %1254 = vmatprep.subr.bf16.mxu0 %v6080_v3 }
 0x17a   : > { %1296 = vmatpush1.bf16.msra.mxu1 %v6090_v20  ;;  %v6119_v20 = vld [vmem:[#allocation8 + $0xc] ss:$16 sps:$4 sm:$0xff]  }
 0x17b   : > { %1255 = vmatpush1.bf16.msra.mxu0 %v6086_v29  ;;  %1297 = vmatprep.subr.bf16.mxu1 %v6095_v16  ;;  %7237 = vst [vmem:[#allocation44_spill] sm:$0xff] %v6119_v20  ;;  %v1050_v16 = vpack.c.bf16 %v1049_v1, %v1049_v1  ;;  %v6122_v29 = vld [vmem:[#allocation8] ss:$16 sps:$4 sm:$0xff]  }
 0x17c   : > { %1256 = vmatprep.subr.bf16.mxu0 %v6092_v18  ;;  %v6116_v18 = vld [vmem:[#allocation8 + $0x4] ss:$16 sps:$4 sm:$0xff]   ;;  %7238 = vst [vmem:[#allocation45_spill] sm:$0xff] %v6122_v29  ;;  %v6134_v1 = vld [vmem:[#allocation8 + $0x20] ss:$16 sps:$4 sm:$0xff]  }
 0x17d   : > { %7236 = vst [vmem:[#allocation43_spill] sm:$0xff] %v6116_v18  ;;  %7242 = vst [vmem:[#allocation49_spill] sm:$0xff] %v6134_v1 }
 0x17e   : > { %1298 = vmatpush1.bf16.msra.mxu1 %v6102_v10  ;;  %v6126_v10 = vld [vmem:[#allocation8 + $0x8] ss:$16 sps:$4 sm:$0xff]  }
 0x17f   : > { %1257 = vmatpush1.bf16.msra.mxu0 %v6098_v13  ;;  %1299 = vmatprep.subr.bf16.mxu1 %v6107_v5  ;;  %7239 = vst [vmem:[#allocation46_spill] sm:$0xff] %v6126_v10  ;;  %v6131_v13 = vld [vmem:[#allocation8 + $0x2c] ss:$16 sps:$4 sm:$0xff]  }
 0x180   : > { %1258 = vmatprep.subr.bf16.mxu0 %v6104_v8  ;;  %v6128_v8 = vld [vmem:[#allocation8 + $0x24] ss:$16 sps:$4 sm:$0xff]   ;;  %7241 = vst [vmem:[#allocation48_spill] sm:$0xff] %v6131_v13 }
 0x181   : > { %7240 = vst [vmem:[#allocation47_spill] sm:$0xff] %v6128_v8 }
 0x182   : > { %1300 = vmatpush1.bf16.msra.mxu1 %v6114_v63  ;;  %v6138_v63 = vld [vmem:[#allocation8 + $0x28] ss:$16 sps:$4 sm:$0xff]  }
 0x183   : > { %1259 = vmatpush1.bf16.msra.mxu0 %v6110_v4  ;;  %1527 = vmatprep.subr.bf16.mxu1 %v6119_v20  ;;  %7243 = vst [vmem:[#allocation50_spill] sm:$0xff] %v6138_v63  ;;  %v6143_v4 = vld [vmem:[#allocation8 + $0x4c] ss:$16 sps:$4 sm:$0xff]   ;;  %v7246_v20 = vmov 0  }
 0x184   : > { %1486 = vmatprep.subr.bf16.mxu0 %v6116_v18  ;;  %v6140_v18 = vld [vmem:[#allocation8 + $0x44] ss:$16 sps:$4 sm:$0xff]   ;;  %7245 = vst [vmem:[#allocation52_spill] sm:$0xff] %v6143_v4 }
 0x185   : > { %1318 = vmatmul.mubr.bf16.vlgmr.msra.gmra.mrb[12].mxu1 %v1050_v16  ;;  %7244 = vst [vmem:[#allocation51_spill] sm:$0xff] %v6140_v18 }
 0x186   : > { %1277 = vmatmul.mubr.bf16.vlgmr.msra.gmra.mrb[12].mxu0 %v1050_v16  ;;  %1528 = vmatpush1.bf16.msra.mxu1 %v6126_v10  ;;  %v6148_v16 = vld [vmem:[#allocation8 + $0x40] ss:$16 sps:$4 sm:$0xff]   ;;  %v6154_v10 = vld [vmem:[#allocation8 + $0x64] ss:$16 sps:$4 sm:$0xff]  }
 0x187   : > { %1487 = vmatpush1.bf16.msra.mxu0 %v6122_v29  ;;  %1529 = vmatprep.subr.bf16.mxu1 %v6131_v13  ;;  %7247 = vst [vmem:[#allocation53_spill] sm:$0xff] %v6148_v16  ;;  %7249 = vst [vmem:[#allocation55_spill] sm:$0xff] %v6154_v10  ;;  %v6157_v13 = vld [vmem:[#allocation8 + $0x6c] ss:$16 sps:$4 sm:$0xff]   ;;  %v6160_v29 = vld [vmem:[#allocation8 + $0x60] ss:$16 sps:$4 sm:$0xff]  }
 0x188   : > { %1488 = vmatprep.subr.bf16.mxu0 %v6128_v8  ;;  %1518 = vmatprep.mubr.bf16.mxu0 %v7246_v20  ;;  %v6152_v8 = vld [vmem:[#allocation8 + $0x48] ss:$16 sps:$4 sm:$0xff]   ;;  %7250 = vst [vmem:[#allocation56_spill] sm:$0xff] %v6157_v13  ;;  %7251 = vst [vmem:[#allocation57_spill] sm:$0xff] %v6160_v29 }
 0x189   : > { %1559 = vmatprep.mubr.bf16.mxu1 %v7246_v20  ;;  %7248 = vst [vmem:[#allocation54_spill] sm:$0xff] %v6152_v8 }
 0x18a   : > { %1530 = vmatpush1.bf16.msra.mxu1 %v6138_v63  ;;  %v6166_v63 = vld [vmem:[#allocation8 + $0x84] ss:$16 sps:$4 sm:$0xff]  }
 0x18b   : > { %1489 = vmatpush1.bf16.msra.mxu0 %v6134_v1  ;;  %1531 = vmatprep.subr.bf16.mxu1 %v6143_v4  ;;  %v6164_v1 = vld [vmem:[#allocation8 + $0x68] ss:$16 sps:$4 sm:$0xff]   ;;  %7253 = vst [vmem:[#allocation59_spill] sm:$0xff] %v6166_v63  ;;  %v6172_v4 = vld [vmem:[#allocation8 + $0x80] ss:$16 sps:$4 sm:$0xff]  }
 0x18c   : > { %1490 = vmatprep.subr.bf16.mxu0 %v6140_v18  ;;  %7252 = vst [vmem:[#allocation58_spill] sm:$0xff] %v6164_v1  ;;  %v6169_v18 = vld [vmem:[#allocation8 + $0x8c] ss:$16 sps:$4 sm:$0xff]   ;;  %7255 = vst [vmem:[#allocation61_spill] sm:$0xff] %v6172_v4 }
 0x18d   : > { %7254 = vst [vmem:[#allocation60_spill] sm:$0xff] %v6169_v18 }
 0x18e   : > { %1532 = vmatpush1.bf16.msra.mxu1 %v6152_v8  ;;  %v6178_v8 = vld [vmem:[#allocation8 + $0xa4] ss:$16 sps:$4 sm:$0xff]  }
 0x18f   : > { %1491 = vmatpush1.bf16.msra.mxu0 %v6148_v16  ;;  %1533 = vmatprep.subr.bf16.mxu1 %v6157_v13  ;;  %v6176_v16 = vld [vmem:[#allocation8 + $0x88] ss:$16 sps:$4 sm:$0xff]   ;;  %7257 = vst [vmem:[#allocation63_spill] sm:$0xff] %v6178_v8  ;;  %v6184_v13 = vld [vmem:[#allocation8 + $0xa0] ss:$16 sps:$4 sm:$0xff]  }
 0x190   : > { %1492 = vmatprep.subr.bf16.mxu0 %v6154_v10  ;;  %7256 = vst [vmem:[#allocation62_spill] sm:$0xff] %v6176_v16  ;;  %v6181_v10 = vld [vmem:[#allocation8 + $0xac] ss:$16 sps:$4 sm:$0xff]   ;;  %7259 = vst [vmem:[#allocation65_spill] sm:$0xff] %v6184_v13 }
 0x191   : > { %7258 = vst [vmem:[#allocation64_spill] sm:$0xff] %v6181_v10 }
 0x192   : > { %1534 = vmatpush1.bf16.msra.mxu1 %v6164_v1  ;;  %v6190_v1 = vld [vmem:[#allocation8 + $0xc4] ss:$16 sps:$4 sm:$0xff]  }
 0x193   : > { %1493 = vmatpush1.bf16.msra.mxu0 %v6160_v29  ;;  %1535 = vmatprep.subr.bf16.mxu1 %v6169_v18  ;;  %v6188_v29 = vld [vmem:[#allocation8 + $0xa8] ss:$16 sps:$4 sm:$0xff]   ;;  %7261 = vst [vmem:[#allocation67_spill] sm:$0xff] %v6190_v1  ;;  %v6196_v18 = vld [vmem:[#allocation8 + $0xc0] ss:$16 sps:$4 sm:$0xff]  }
 0x194   : > { %1494 = vmatprep.subr.bf16.mxu0 %v6166_v63  ;;  %7260 = vst [vmem:[#allocation66_spill] sm:$0xff] %v6188_v29  ;;  %v6193_v63 = vld [vmem:[#allocation8 + $0xcc] ss:$16 sps:$4 sm:$0xff]   ;;  %7263 = vst [vmem:[#allocation69_spill] sm:$0xff] %v6196_v18 }
 0x195   : > { %7262 = vst [vmem:[#allocation68_spill] sm:$0xff] %v6193_v63 }
 0x196   : > { %1536 = vmatpush1.bf16.msra.mxu1 %v6176_v16  ;;  %v6202_v16 = vld [vmem:[#allocation8 + $0xe4] ss:$16 sps:$4 sm:$0xff]  }
 0x197   : > { %1495 = vmatpush1.bf16.msra.mxu0 %v6172_v4  ;;  %1537 = vmatprep.subr.bf16.mxu1 %v6181_v10  ;;  %v6200_v4 = vld [vmem:[#allocation8 + $0xc8] ss:$16 sps:$4 sm:$0xff]   ;;  %7265 = vst [vmem:[#allocation71_spill] sm:$0xff] %v6202_v16  ;;  %v6208_v10 = vld [vmem:[#allocation8 + $0xe0] ss:$16 sps:$4 sm:$0xff]  }
 0x198   : > { %1496 = vmatprep.subr.bf16.mxu0 %v6178_v8  ;;  %7264 = vst [vmem:[#allocation70_spill] sm:$0xff] %v6200_v4  ;;  %v6205_v8 = vld [vmem:[#allocation8 + $0xec] ss:$16 sps:$4 sm:$0xff]   ;;  %7267 = vst [vmem:[#allocation73_spill] sm:$0xff] %v6208_v10 }
 0x199   : > { %7266 = vst [vmem:[#allocation72_spill] sm:$0xff] %v6205_v8 }
 0x19a   : > { %1538 = vmatpush1.bf16.msra.mxu1 %v6188_v29 }
 0x19b   : > { %1497 = vmatpush1.bf16.msra.mxu0 %v6184_v13  ;;  %1539 = vmatprep.subr.bf16.mxu1 %v6193_v63  ;;  %v6212_v13 = vld [vmem:[#allocation8 + $0xe8] ss:$16 sps:$4 sm:$0xff]  }
 0x19c   : > { %1498 = vmatprep.subr.bf16.mxu0 %v6190_v1  ;;  %7268 = vst [vmem:[#allocation74_spill] sm:$0xff] %v6212_v13 }
 0x19e   : > { %1540 = vmatpush1.bf16.msra.mxu1 %v6200_v4 }
 0x19f   : > { %1499 = vmatpush1.bf16.msra.mxu0 %v6196_v18  ;;  %1541 = vmatprep.subr.bf16.mxu1 %v6205_v8  ;;  %v559_v8 = vld [vmem:[%s7068_s5] sm:$0xf] }
 0x1a0   : > { %1500 = vmatprep.subr.bf16.mxu0 %v6202_v16 }
 0x1a2   : > { %1542 = vmatpush1.bf16.msra.mxu1 %v6212_v13  ;;  %v604_v13 = vld [vmem:[%s7069_s6] sm:$0xf] }
 0x1a3   : > { %1501 = vmatpush1.bf16.msra.mxu0 %v6208_v10  ;;  %1871 = vmatprep.subr.bf16.mxu1 %v5886_v14  ;;  %v6227_v14 = vrot.slane %v559_v8, %v5973_v52  ;;  %v6230_v10 = vrot.slane %v604_v13, %v5973_v52 }
 0x1a4   : > { %1830 = vmatprep.subr.bf16.mxu0 %v5884_v12 }
 0x1a5   : > { %7269 = vst [vmem:[#allocation75_spill] sm:$0xff] %v6227_v14  ;;  %7270 = vst [vmem:[#allocation76_spill] sm:$0xff] %v6230_v10 }
 0x1fa   : > { %v960_v63 = vpop.xlane.xlu0 %959 }
 0x1fb   : > { %v970_v18 = vmul.f32 0.001953125, %v960_v63 }
 0x1fd   : > { %v972_v29 = vmul.f32 %v970_v18, %v970_v18  ;;  %v975_v12 = vsub.f32 %v6007_v9, %v970_v18  ;;  %v6239_v9 = vrot.slane %v559_v8, %v5964_v48  ;;  %v976_v52 = vsub.f32 %v6005_v2, %v970_v18 }
 0x1fe   : > { %v969_v1 = vpop.xlane.xlu0 %968 }
 0x1ff   : > { %v971_v5 = vmul.f32 0.001953125, %v969_v1  ;;  %v6236_v1 = vrot.slane %v559_v8, %v5971_v51 }
 0x201   : > { %v973_v4 = vsub.f32 %v971_v5, %v972_v29  ;;  %v974_v29 = vsub.f32 %v6003_v0, %v970_v18  ;;  %7271 = vst [vmem:[#allocation77_spill] sm:$0xff] %v6236_v1 }
 0x203   : > { %v978_v44 = vadd.f32 1e-05, %v973_v4  ;;  %v977_v4 = vsub.f32 %v6009_v11, %v970_v18  ;;  %v6248_v11 = vrot.slane %v604_v13, %v5964_v48  ;;  %v6257_v18 = vrot.slane %v604_v13, %v5966_v49 }
 0x205   : > { %5403 = vrsqrt.f32 %v978_v44  ;;  %7273 = vst [vmem:[#allocation79_spill] sm:$0xff] %v6248_v11 }
 0x20f   : > { %v5404_v63 = vpop.eup %5403 }
 0x210   : > { %v981_v5 = vmul.f32 %v5404_v63, %v975_v12  ;;  %v983_v16 = vmul.f32 %v5404_v63, %v977_v4  ;;  %v980_v3 = vmul.f32 %v5404_v63, %v974_v29  ;;  %v6244_v12 = vrot.slane %v604_v13, %v5971_v51 }
 0x211   : > { %v6252_v4 = vrot.slane %v559_v8, %v5966_v49 }
 0x212   : > { %v985_v44 = vmul.f32 %v981_v5, %v6227_v14  ;;  %7272 = vst [vmem:[#allocation78_spill] sm:$0xff] %v6244_v12  ;;  %v987_v0 = vmul.f32 %v983_v16, %v6236_v1  ;;  %v984_v5 = vmul.f32 %v980_v3, %v6239_v9  ;;  %v982_v14 = vmul.f32 %v5404_v63, %v976_v52 }
 0x214   : > { %v989_v46 = vadd.f32 %v985_v44, %v6230_v10  ;;  %v991_v29 = vadd.f32 %v987_v0, %v6244_v12  ;;  %v986_v2 = vmul.f32 %v982_v14, %v6252_v4 }
 0x216   : > { %v4668_v45 = vmul.f32 -1.442695, %v989_v46  ;;  %v988_v46 = vadd.f32 %v984_v5, %v6248_v11  ;;  %v4669_v16 = vmul.f32 -1.442695, %v991_v29  ;;  %v990_v1 = vadd.f32 %v986_v2, %v6257_v18 }
 0x218   : > { %5405 = vpow2.f32 %v4668_v45  ;;  %v992_v44 = vmul.f32 1.442695, %v988_v46  ;;  %v1007_v45 = vld [vmem:[#allocation10] sm:$0xff] }
 0x219   : > { %5407 = vpow2.f32 %v4669_v16  ;;  %v5533_v16 = vld [vmem:[#allocation6 + $0x24] ss:$16 sps:$4 sm:$0xff]  }
 0x21a   : > { %5409 = vpow2.f32 %v992_v44  ;;  %v5534_v44 = vld [vmem:[#allocation6 + $0x2c] ss:$16 sps:$4 sm:$0xff]  }
 0x21b   : > { %5411 = vtanh.f32 %v990_v1  ;;  %v5532_v1 = vld [vmem:[#allocation6 + $0x8] ss:$16 sps:$4 sm:$0xff]  }
 0x222   : > { %v5406_v10 = vpop.eup %5405 }
 0x223   : > { %v997_v3 = vadd.f32 1.0, %v5406_v10  ;;  %v5408_v52 = vpop.eup %5407  ;;  %v5531_v10 = vld [vmem:[#allocation6] ss:$16 sps:$4 sm:$0xff]  }
 0x224   : > { %v5410_v8 = vpop.eup %5409  ;;  %v1004_v5 = vadd.f32 1.0, %v5408_v52  ;;  %v5537_v52 = vld [vmem:[#allocation6 + $0x44] ss:$16 sps:$4 sm:$0xff]  }
 0x225   : > { %5413 = vrcp.f32 %v997_v3  ;;  %v5412_v63 = vpop.eup %5411  ;;  %v5536_v3 = vld [vmem:[#allocation6 + $0x28] ss:$16 sps:$4 sm:$0xff]  }
 0x226   : > { %v1009_v11 = vmul.f32 %v5412_v63, %v5410_v8  ;;  %5415 = vrcp.f32 %v1004_v5  ;;  %v5538_v8 = vld [vmem:[#allocation6 + $0x4c] ss:$16 sps:$4 sm:$0xff]  }
 0x22f   : > { %v5414_v0 = vpop.eup %5413 }
 0x230   : > { %v1008_v13 = vmul.f32 %v5414_v0, %v1007_v45  ;;  %v5416_v14 = vpop.eup %5415  ;;  %v5539_v45 = vld [vmem:[#allocation6 + $0x40] ss:$16 sps:$4 sm:$0xff]  }
 0x232   : > { %v6261_v12 = vadd.f32 %v1009_v11, %v1008_v13  ;;  %v5535_v11 = vld [vmem:[#allocation6 + $0x20] ss:$16 sps:$4 sm:$0xff]  }
 0x234   : > { %5417 = vtanh.f32 %v6261_v12 }
 0x23e   : > { %v5418_v29 = vpop.eup %5417 }
 0x23f   : > { %v1012_v46 = vmul.f32 %v5418_v29, %v5416_v14 }
 0x241   : > { %v1015_v2 = vpack.c.bf16 %v1012_v46, %v1012_v46 }
 0x243   : > { %1519 = vmatmul.mubr.bf16.vlgmr.msra.gmra.mrb[16].mxu0 %v1015_v2  ;;  %1560 = vmatmul.mubr.bf16.vlgmr.msra.gmra.mrb[16].mxu1 %v1015_v2 }
 0x244   : > { %1831 = vmatpush1.bf16.msra.mxu0 %v5531_v10  ;;  %1872 = vmatpush1.bf16.msra.mxu1 %v5532_v1 }
 0x245   : > { %1832 = vmatprep.subr.bf16.mxu0 %v5533_v16  ;;  %1873 = vmatprep.subr.bf16.mxu1 %v5534_v44 }
 0x246   : > { %1862 = vmatprep.mubr.bf16.mxu0 %v7246_v20  ;;  %1903 = vmatprep.mubr.bf16.mxu1 %v7246_v20 }
 0x248   : > { %1833 = vmatpush1.bf16.msra.mxu0 %v5535_v11  ;;  %1874 = vmatpush1.bf16.msra.mxu1 %v5536_v3 }
 0x249   : > { %1834 = vmatprep.subr.bf16.mxu0 %v5537_v52  ;;  %1875 = vmatprep.subr.bf16.mxu1 %v5538_v8 }
 0x24c   : > { %1835 = vmatpush1.bf16.msra.mxu0 %v5539_v45  ;;  %1876 = vmatpush1.bf16.msra.mxu1 %v5894_v22 }
 0x24d   : > { %1836 = vmatprep.subr.bf16.mxu0 %v5896_v23  ;;  %1877 = vmatprep.subr.bf16.mxu1 %v5898_v24  ;;  %v7274_v23 = vld [vmem:[#allocation29_spill] sm:$0xff]  ;;  %v7275_v24 = vld [vmem:[#allocation30_spill] sm:$0xff] }
 0x250   : > { %1837 = vmatpush1.bf16.msra.mxu0 %v5900_v25  ;;  %1878 = vmatpush1.bf16.msra.mxu1 %v5903_v26 }
 0x251   : > { %1838 = vmatprep.subr.bf16.mxu0 %v5905_v27  ;;  %1879 = vmatprep.subr.bf16.mxu1 %v5909_v28  ;;  %v7276_v27 = vld [vmem:[#allocation31_spill] sm:$0xff]  ;;  %v7277_v28 = vld [vmem:[#allocation32_spill] sm:$0xff] }
 0x254   : > { %1839 = vmatpush1.bf16.msra.mxu0 %v5914_v30  ;;  %1880 = vmatpush1.bf16.msra.mxu1 %v5916_v31 }
 0x255   : > { %1840 = vmatprep.subr.bf16.mxu0 %v5920_v32  ;;  %1881 = vmatprep.subr.bf16.mxu1 %v5922_v33 }
 0x258   : > { %1841 = vmatpush1.bf16.msra.mxu0 %v5930_v34  ;;  %1882 = vmatpush1.bf16.msra.mxu1 %v5932_v35  ;;  %v1319_v26 = vpop.f32.mrb[12].mxu1  ;;  %v7278_v35 = vld [vmem:[#allocation33_spill] sm:$0xff] }
 0x259   : > { %1842 = vmatprep.subr.bf16.mxu0 %v5934_v36  ;;  %1883 = vmatprep.subr.bf16.mxu1 %v5938_v37  ;;  %v1278_v22 = vpop.f32.mrb[12].mxu0  ;;  %v1321_v31 = vpop.f32.mrb[13].mxu1  ;;  %v7279_v36 = vld [vmem:[#allocation34_spill] sm:$0xff]  ;;  %v7280_v37 = vld [vmem:[#allocation35_spill] sm:$0xff] }
 0x25a   : > { %v1280_v25 = vpop.f32.mrb[13].mxu0  ;;  %v1323_v33 = vpop.f32.mrb[14].mxu1 }
 0x25b   : > { %v1282_v30 = vpop.f32.mrb[14].mxu0  ;;  %v1324_v34 = vpop.f32.mrb[15].mxu1  ;;  %v7298_v33 = vld [vmem:[#allocation20_spill] sm:$0xff] }
 0x25c   : > { %1843 = vmatpush1.bf16.msra.mxu0 %v5940_v38  ;;  %1884 = vmatpush1.bf16.msra.mxu1 %v5942_v39  ;;  %v1283_v32 = vpop.f32.mrb[15].mxu0  ;;  %v7281_v38 = vld [vmem:[#allocation36_spill] sm:$0xff]  ;;  %v7282_v39 = vld [vmem:[#allocation37_spill] sm:$0xff] }
 0x25d   : > { %1844 = vmatprep.subr.bf16.mxu0 %v5944_v40  ;;  %1885 = vmatprep.subr.bf16.mxu1 %v5946_v41  ;;  %v7283_v40 = vld [vmem:[#allocation38_spill] sm:$0xff]  ;;  %v7284_v41 = vld [vmem:[#allocation39_spill] sm:$0xff] }
 0x260   : > { %1845 = vmatpush1.bf16.msra.mxu0 %v5952_v42  ;;  %1886 = vmatpush1.bf16.msra.mxu1 %v5954_v43  ;;  %v7285_v42 = vld [vmem:[#allocation40_spill] sm:$0xff]  ;;  %v7286_v43 = vld [vmem:[#allocation41_spill] sm:$0xff] }
 0x261   : > { %2202 = vmatprep.subr.bf16.mxu0 %v6023_v47  ;;  %2243 = vmatprep.subr.bf16.mxu1 %v6027_v61  ;;  %v7287_v47 = vld [vmem:[#allocation42_spill] sm:$0xff]  ;;  %v7289_v61 = vld [vmem:[#allocation44_spill] sm:$0xff] }
 0x263   : > { %1863 = vmatmul.mubr.bf16.vlgmr.msra.gmra.mrb[20].mxu0 %v1015_v2  ;;  %1904 = vmatmul.mubr.bf16.vlgmr.msra.gmra.mrb[20].mxu1 %v1015_v2 }
 0x264   : > { %2203 = vmatpush1.bf16.msra.mxu0 %v6025_v50  ;;  %2244 = vmatpush1.bf16.msra.mxu1 %v6030_v62  ;;  %v7288_v50 = vld [vmem:[#allocation43_spill] sm:$0xff]  ;;  %v4635_v62 = vld [vmem:[%s7067_s4 + $0x4] sm:$0xf] }
 0x265   : > { %2204 = vmatprep.subr.bf16.mxu0 %v6035_v6  ;;  %2245 = vmatprep.subr.bf16.mxu1 %v6041_v17  ;;  %v6327_v6 = vrot.slane %v4635_v62, %v5964_v48  ;;  %v6343_v29 = vrot.slane %v4635_v62, %v5971_v51 }
 0x266   : > { %2234 = vmatprep.mubr.bf16.mxu0 %v7246_v20  ;;  %2275 = vmatprep.mubr.bf16.mxu1 %v7246_v20 }
 0x267   : > { %7290 = vst [vmem:[#allocation29_spill] sm:$0xff] %v6327_v6  ;;  %7294 = vst [vmem:[#allocation32_spill] sm:$0xff] %v6343_v29 }
 0x268   : > { %2205 = vmatpush1.bf16.msra.mxu0 %v6037_v7  ;;  %2246 = vmatpush1.bf16.msra.mxu1 %v6039_v15  ;;  %v6330_v15 = vrot.slane %v4635_v62, %v5966_v49 }
 0x269   : > { %2206 = vmatprep.subr.bf16.mxu0 %v6044_v53  ;;  %2247 = vmatprep.subr.bf16.mxu1 %v6050_v55  ;;  %v7292_v53 = vld [vmem:[#allocation16_spill] sm:$0xff] }
 0x26a   : > { %7291 = vst [vmem:[#allocation30_spill] sm:$0xff] %v6330_v15 }
 0x26c   : > { %2207 = vmatpush1.bf16.msra.mxu0 %v6048_v54  ;;  %2248 = vmatpush1.bf16.msra.mxu1 %v6054_v56  ;;  %v6333_v54 = vrot.slane %v4635_v62, %v7292_v53 }
 0x26d   : > { %2208 = vmatprep.subr.bf16.mxu0 %v6056_v57  ;;  %2249 = vmatprep.subr.bf16.mxu1 %v6059_v58 }
 0x26e   : > { %7293 = vst [vmem:[#allocation31_spill] sm:$0xff] %v6333_v54 }
 0x270   : > { %2209 = vmatpush1.bf16.msra.mxu0 %v6062_v59  ;;  %2250 = vmatpush1.bf16.msra.mxu1 %v6066_v60 }
 0x271   : > { %2210 = vmatprep.subr.bf16.mxu0 %v6068_v19  ;;  %2251 = vmatprep.subr.bf16.mxu1 %v6071_v21 }
 0x274   : > { %2211 = vmatpush1.bf16.msra.mxu0 %v7274_v23  ;;  %2252 = vmatpush1.bf16.msra.mxu1 %v7275_v24  ;;  %v7295_v24 = vld [vmem:[#allocation17_spill] sm:$0xff] }
 0x275   : > { %2212 = vmatprep.subr.bf16.mxu0 %v7276_v27  ;;  %2253 = vmatprep.subr.bf16.mxu1 %v7277_v28 }
 0x278   : > { %2213 = vmatpush1.bf16.msra.mxu0 %v7278_v35  ;;  %2254 = vmatpush1.bf16.msra.mxu1 %v7279_v36 }
 0x279   : > { %2214 = vmatprep.subr.bf16.mxu0 %v7280_v37  ;;  %2255 = vmatprep.subr.bf16.mxu1 %v7281_v38 }
 0x27c   : > { %2215 = vmatpush1.bf16.msra.mxu0 %v7282_v39  ;;  %2256 = vmatpush1.bf16.msra.mxu1 %v7283_v40 }
 0x27d   : > { %2216 = vmatprep.subr.bf16.mxu0 %v7284_v41  ;;  %2257 = vmatprep.subr.bf16.mxu1 %v7285_v42 }
 0x280   : > { %2217 = vmatpush1.bf16.msra.mxu0 %v7286_v43  ;;  %2258 = vmatpush1.bf16.msra.mxu1 %v7287_v47 }
 0x281   : > { %2444 = vmatprep.subr.bf16.mxu0 %v7288_v50  ;;  %2485 = vmatprep.subr.bf16.mxu1 %v7289_v61 }
 0x316   : > { %v1520_v7 = vpop.f32.mrb[16].mxu0  ;;  %v1561_v17 = vpop.f32.mrb[16].mxu1 }
 0x317   : > { %v1521_v55 = vadd.f32 %v1520_v7, %v1278_v22  ;;  %v1562_v56 = vadd.f32 %v1561_v17, %v1319_v26  ;;  %v1522_v57 = vpop.f32.mrb[17].mxu0  ;;  %v1563_v58 = vpop.f32.mrb[17].mxu1  ;;  %v7296_v26 = vld [vmem:[#allocation18_spill] sm:$0xff] }
 0x318   : > { %v1523_v59 = vadd.f32 %v1522_v57, %v1280_v25  ;;  %v1564_v60 = vadd.f32 %v1563_v58, %v1321_v31  ;;  %v1524_v19 = vpop.f32.mrb[18].mxu0  ;;  %v1565_v21 = vpop.f32.mrb[18].mxu1  ;;  %v7297_v31 = vld [vmem:[#allocation19_spill] sm:$0xff] }
 0x319   : > { %v6336_v63 = vadd.f32 %v1521_v55, %v6327_v6  ;;  %v1525_v0 = vpop.f32.mrb[19].mxu0  ;;  %v1566_v5 = vpop.f32.mrb[19].mxu1  ;;  %v6339_v13 = vadd.f32 %v1562_v56, %v6330_v15  ;;  %v4633_v19 = vld [vmem:[%s7068_s5 + $0x4] sm:$0xf] }
 0x31a   : > { %v1569_v14 = vadd.f32 %v1523_v59, %v6333_v54  ;;  %v1571_v1 = vadd.f32 %v1564_v60, %v6343_v29  ;;  %v4634_v21 = vld [vmem:[%s7069_s6 + $0x4] sm:$0xf]  ;;  %v6383_v0 = vrot.slane %v4633_v19, %v7292_v53 }
 0x31b   : > { %v1577_v46 = vmul.f32 %v6336_v63, %v6336_v63  ;;  %v1579_v44 = vmul.f32 %v6339_v13, %v6339_v13 }
 0x31c   : > { %v1578_v2 = vmul.f32 %v1569_v14, %v1569_v14  ;;  %v1572_v10 = vadd.f32 %v1569_v14, %v6336_v63  ;;  %v1580_v8 = vmul.f32 %v1571_v1, %v1571_v1 }
 0x31e   : > { %v1573_v16 = vadd.f32 %v1572_v10, %v6339_v13  ;;  %v1581_v11 = vadd.f32 %v1578_v2, %v1577_v46  ;;  %v6386_v2 = vrot.slane %v4634_v21, %v7292_v53  ;;  %v6398_v53 = vrot.slane %v4634_v21, %v5971_v51 }
 0x320   : > { %v1574_v3 = vadd.f32 %v1573_v16, %v1571_v1  ;;  %v1582_v52 = vadd.f32 %v1581_v11, %v1579_v44 }
 0x322   : > { %1575 = vadd.xlane.f32.xlu1 %v1574_v3  ;;  %v1583_v45 = vadd.f32 %v1582_v52, %v1580_v8  ;;  %v6391_v3 = vrot.slane %v4633_v19, %v5971_v51  ;;  %v6394_v8 = vrot.slane %v4633_v19, %v5964_v48 }
 0x326   : > { %1584 = vadd.xlane.f32.xlu1 %v1583_v45 }
 0x336   : > { %v1864_v22 = vpop.f32.mrb[20].mxu0  ;;  %v1905_v23 = vpop.f32.mrb[20].mxu1 }
 0x337   : > { %v6353_v25 = vadd.f32 %v1864_v22, %v7295_v24  ;;  %v6356_v27 = vadd.f32 %v1905_v23, %v7296_v26  ;;  %v1866_v28 = vpop.f32.mrb[21].mxu0  ;;  %v1907_v30 = vpop.f32.mrb[21].mxu1  ;;  %v6403_v23 = vrot.slane %v4634_v21, %v5964_v48 }
 0x338   : > { %v6359_v32 = vadd.f32 %v1866_v28, %v7297_v31  ;;  %v6362_v34 = vadd.f32 %v1907_v30, %v7298_v33  ;;  %v1868_v35 = vpop.f32.mrb[22].mxu0  ;;  %v1909_v36 = vpop.f32.mrb[22].mxu1  ;;  %v6407_v28 = vrot.slane %v4633_v19, %v5966_v49 }
 0x339   : > { %v1921_v37 = vmul.f32 %v6353_v25, %v6353_v25  ;;  %v1869_v38 = vpop.f32.mrb[23].mxu0  ;;  %v1910_v39 = vpop.f32.mrb[23].mxu1  ;;  %v1923_v42 = vmul.f32 %v6356_v27, %v6356_v27 }
 0x33a   : > { %v1916_v40 = vadd.f32 %v6359_v32, %v6353_v25  ;;  %v1922_v41 = vmul.f32 %v6359_v32, %v6359_v32  ;;  %v1924_v61 = vmul.f32 %v6362_v34, %v6362_v34 }
 0x33c   : > { %v1917_v43 = vadd.f32 %v1916_v40, %v6356_v27  ;;  %v1925_v47 = vadd.f32 %v1922_v41, %v1921_v37  ;;  %v6412_v37 = vrot.slane %v4634_v21, %v5966_v49 }
 0x33e   : > { %v1918_v50 = vadd.f32 %v1917_v43, %v6362_v34  ;;  %v1926_v62 = vadd.f32 %v1925_v47, %v1923_v42 }
 0x340   : > { %1919 = vadd.xlane.f32.xlu0 %v1918_v50  ;;  %v1927_v7 = vadd.f32 %v1926_v62, %v1924_v61 }
 0x342   : > { %1928 = vadd.xlane.f32.xlu1 %v1927_v7 }
 0x3af   : > { %v1576_v17 = vpop.xlane.xlu1 %1575 }
 0x3b0   : > { %v1586_v55 = vmul.f32 0.001953125, %v1576_v17  ;;  %v1624_v17 = vld [vmem:[#allocation10 + $0x8] sm:$0xff] }
 0x3b2   : > { %v1588_v57 = vmul.f32 %v1586_v55, %v1586_v55  ;;  %v1591_v5 = vsub.f32 %v1569_v14, %v1586_v55  ;;  %v1593_v16 = vsub.f32 %v1571_v1, %v1586_v55  ;;  %v1590_v44 = vsub.f32 %v6336_v63, %v1586_v55 }
 0x3b3   : > { %v1585_v56 = vpop.xlane.xlu1 %1584  ;;  %v1592_v1 = vsub.f32 %v6339_v13, %v1586_v55 }
 0x3b4   : > { %v1587_v58 = vmul.f32 0.001953125, %v1585_v56 }
 0x3b6   : > { %v1589_v59 = vsub.f32 %v1587_v58, %v1588_v57  ;;  %v7299_v57 = vld [vmem:[#allocation75_spill] sm:$0xff] }
 0x3b8   : > { %v1594_v60 = vadd.f32 1e-05, %v1589_v59 }
 0x3ba   : > { %5419 = vrsqrt.f32 %v1594_v60 }
 0x3c4   : > { %v5420_v46 = vpop.eup %5419 }
 0x3c5   : > { %v1597_v10 = vmul.f32 %v5420_v46, %v1591_v5  ;;  %v1599_v52 = vmul.f32 %v5420_v46, %v1593_v16  ;;  %v1596_v45 = vmul.f32 %v5420_v46, %v1590_v44  ;;  %v1598_v30 = vmul.f32 %v5420_v46, %v1592_v1 }
 0x3c7   : > { %v1601_v11 = vmul.f32 %v1597_v10, %v6383_v0  ;;  %v1603_v63 = vmul.f32 %v1599_v52, %v6391_v3  ;;  %v1600_v24 = vmul.f32 %v1596_v45, %v6394_v8  ;;  %v1602_v48 = vmul.f32 %v1598_v30, %v6407_v28  ;;  %v7300_v10 = vld [vmem:[#allocation76_spill] sm:$0xff] }
 0x3c9   : > { %v1605_v14 = vadd.f32 %v1601_v11, %v6386_v2  ;;  %v1607_v51 = vadd.f32 %v1603_v63, %v6398_v53  ;;  %v1604_v35 = vadd.f32 %v1600_v24, %v6403_v23  ;;  %v1606_v42 = vadd.f32 %v1602_v48, %v6412_v37  ;;  %v7303_v63 = vld [vmem:[#allocation79_spill] sm:$0xff] }
 0x3cb   : > { %v4734_v22 = vmul.f32 -1.442695, %v1605_v14  ;;  %v4735_v39 = vmul.f32 -1.442695, %v1607_v51  ;;  %v1608_v40 = vmul.f32 1.442695, %v1604_v35 }
 0x3cd   : > { %v1920_v26 = vpop.xlane.xlu0 %1919  ;;  %5421 = vpow2.f32 %v4734_v22  ;;  %v7302_v22 = vld [vmem:[#allocation78_spill] sm:$0xff] }
 0x3ce   : > { %v1930_v31 = vmul.f32 0.001953125, %v1920_v26 }
 0x3cf   : > { %v1929_v33 = vpop.xlane.xlu1 %1928 }
 0x3d0   : > { %v1931_v13 = vmul.f32 0.001953125, %v1929_v33  ;;  %v1932_v36 = vmul.f32 %v1930_v31, %v1930_v31  ;;  %v1935_v50 = vsub.f32 %v6359_v32, %v1930_v31  ;;  %v1937_v56 = vsub.f32 %v6362_v34, %v1930_v31  ;;  %v7301_v34 = vld [vmem:[#allocation77_spill] sm:$0xff] }
 0x3d1   : > { %v1934_v60 = vsub.f32 %v6353_v25, %v1930_v31  ;;  %v1936_v52 = vsub.f32 %v6356_v27, %v1930_v31 }
 0x3d2   : > { %v1933_v38 = vsub.f32 %v1931_v13, %v1932_v36 }
 0x3d4   : > { %v1938_v41 = vadd.f32 1e-05, %v1933_v38  ;;  %v7304_v38 = vld [vmem:[#allocation45_spill] sm:$0xff] }
 0x3d6   : > { %5423 = vrsqrt.f32 %v1938_v41  ;;  %v7307_v41 = vld [vmem:[#allocation48_spill] sm:$0xff] }
 0x3d7   : > { %v5422_v43 = vpop.eup %5421  ;;  %5425 = vpow2.f32 %v4735_v39  ;;  %v7305_v39 = vld [vmem:[#allocation46_spill] sm:$0xff] }
 0x3d8   : > { %5427 = vpow2.f32 %v1608_v40  ;;  %v1613_v47 = vadd.f32 1.0, %v5422_v43  ;;  %v7306_v40 = vld [vmem:[#allocation47_spill] sm:$0xff]  ;;  %v7309_v43 = vld [vmem:[#allocation50_spill] sm:$0xff] }
 0x3d9   : > { %5429 = vtanh.f32 %v1606_v42  ;;  %v7308_v42 = vld [vmem:[#allocation49_spill] sm:$0xff] }
 0x3da   : > { %5431 = vrcp.f32 %v1613_v47  ;;  %v7310_v47 = vld [vmem:[#allocation51_spill] sm:$0xff] }
 0x3e0   : > { %v5424_v61 = vpop.eup %5423 }
 0x3e1   : > { %v5426_v49 = vpop.eup %5425  ;;  %v1941_v62 = vmul.f32 %v5424_v61, %v1935_v50  ;;  %v1943_v46 = vmul.f32 %v5424_v61, %v1937_v56  ;;  %v1940_v32 = vmul.f32 %v5424_v61, %v1934_v60  ;;  %v1942_v25 = vmul.f32 %v5424_v61, %v1936_v52  ;;  %v7311_v50 = vld [vmem:[#allocation52_spill] sm:$0xff]  ;;  %v7314_v56 = vld [vmem:[#allocation55_spill] sm:$0xff]  ;;  %v7321_v52 = vld [vmem:[#allocation62_spill] sm:$0xff] }
 0x3e2   : > { %v5428_v7 = vpop.eup %5427  ;;  %v1620_v19 = vadd.f32 1.0, %v5426_v49 }
 0x3e3   : > { %v5430_v55 = vpop.eup %5429  ;;  %v1945_v58 = vmul.f32 %v1941_v62, %v7299_v57  ;;  %v1947_v45 = vmul.f32 %v1943_v46, %v7301_v34  ;;  %v1944_v14 = vmul.f32 %v1940_v32, %v6239_v9  ;;  %v1946_v26 = vmul.f32 %v1942_v25, %v6252_v4  ;;  %v7319_v32 = vld [vmem:[#allocation60_spill] sm:$0xff]  ;;  %v7325_v25 = vld [vmem:[#allocation66_spill] sm:$0xff] }
 0x3e4   : > { %v5432_v59 = vpop.eup %5431  ;;  %v1626_v5 = vmul.f32 %v5430_v55, %v5428_v7  ;;  %5433 = vrcp.f32 %v1620_v19  ;;  %v7312_v7 = vld [vmem:[#allocation53_spill] sm:$0xff] }
 0x3e5   : > { %v1625_v21 = vmul.f32 %v5432_v59, %v1624_v17  ;;  %v1949_v16 = vadd.f32 %v1945_v58, %v7300_v10  ;;  %v1951_v1 = vadd.f32 %v1947_v45, %v7302_v22  ;;  %v1948_v24 = vadd.f32 %v1944_v14, %v7303_v63  ;;  %v7313_v17 = vld [vmem:[#allocation54_spill] sm:$0xff]  ;;  %v7315_v58 = vld [vmem:[#allocation56_spill] sm:$0xff]  ;;  %v7322_v45 = vld [vmem:[#allocation63_spill] sm:$0xff] }
 0x3e6   : > { %v1950_v27 = vadd.f32 %v1946_v26, %v6257_v18  ;;  %v7324_v14 = vld [vmem:[#allocation65_spill] sm:$0xff] }
 0x3e7   : > { %v6421_v44 = vadd.f32 %v1626_v5, %v1625_v21  ;;  %v4768_v11 = vmul.f32 -1.442695, %v1949_v16  ;;  %v4769_v30 = vmul.f32 -1.442695, %v1951_v1  ;;  %v1952_v51 = vmul.f32 1.442695, %v1948_v24 }
 0x3e8   : > { %v7316_v21 = vld [vmem:[#allocation57_spill] sm:$0xff]  ;;  %v7317_v5 = vld [vmem:[#allocation58_spill] sm:$0xff]  ;;  %v7318_v16 = vld [vmem:[#allocation59_spill] sm:$0xff] }
 0x3e9   : > { %5435 = vtanh.f32 %v6421_v44  ;;  %v7326_v1 = vld [vmem:[#allocation67_spill] sm:$0xff]  ;;  %v7327_v24 = vld [vmem:[#allocation68_spill] sm:$0xff] }
 0x3ea   : > { %5437 = vpow2.f32 %v4768_v11  ;;  %v7320_v11 = vld [vmem:[#allocation61_spill] sm:$0xff] }
 0x3eb   : > { %5439 = vpow2.f32 %v4769_v30 }
 0x3ec   : > { %5441 = vpow2.f32 %v1952_v51  ;;  %v7329_v51 = vld [vmem:[#allocation70_spill] sm:$0xff] }
 0x3ed   : > { %5443 = vtanh.f32 %v1950_v27  ;;  %v7331_v27 = vld [vmem:[#allocation72_spill] sm:$0xff] }
 0x3ee   : > { %v5434_v33 = vpop.eup %5433 }
 0x3f3   : > { %v5436_v35 = vpop.eup %5435 }
 0x3f4   : > { %v1629_v31 = vmul.f32 %v5436_v35, %v5434_v33  ;;  %v5438_v13 = vpop.eup %5437  ;;  %v7328_v33 = vld [vmem:[#allocation69_spill] sm:$0xff]  ;;  %v7330_v35 = vld [vmem:[#allocation71_spill] sm:$0xff] }
 0x3f5   : > { %v1957_v48 = vadd.f32 1.0, %v5438_v13  ;;  %v5440_v61 = vpop.eup %5439  ;;  %v6465_v13 = vld [vmem:[#allocation6 + $0x4] ss:$16 sps:$4 sm:$0xff]  }
 0x3f6   : > { %v2009_v36 = vpack.c.bf16 %v1629_v31, %v1629_v31  ;;  %v5442_v49 = vpop.eup %5441  ;;  %v1964_v59 = vadd.f32 1.0, %v5440_v61  ;;  %v6493_v61 = vld [vmem:[#allocation6 + $0x44] ss:$16 sps:$4 sm:$0xff]  }
 0x3f7   : > { %5445 = vrcp.f32 %v1957_v48  ;;  %v5444_v62 = vpop.eup %5443  ;;  %v7332_v48 = vld [vmem:[#allocation73_spill] sm:$0xff] }
 0x3f8   : > { %2235 = vmatmul.mubr.bf16.vlgmr.msra.gmra.mrb[24].mxu0 %v2009_v36  ;;  %2276 = vmatmul.mubr.bf16.vlgmr.msra.gmra.mrb[24].mxu1 %v2009_v36  ;;  %v1969_v19 = vmul.f32 %v5444_v62, %v5442_v49  ;;  %5447 = vrcp.f32 %v1964_v59  ;;  %v6467_v36 = vld [vmem:[#allocation6 + $0xc] ss:$16 sps:$4 sm:$0xff]   ;;  %v6501_v62 = vld [vmem:[#allocation6 + $0x40] ss:$16 sps:$4 sm:$0xff]   ;;  %v6519_v59 = vld [vmem:[#allocation6 + $0x84] ss:$16 sps:$4 sm:$0xff]  }
 0x3f9   : > { %2445 = vmatpush1.bf16.msra.mxu0 %v7304_v38  ;;  %2486 = vmatpush1.bf16.msra.mxu1 %v7305_v39  ;;  %v7333_v38 = vld [vmem:[#allocation74_spill] sm:$0xff]  ;;  %v6495_v49 = vld [vmem:[#allocation6 + $0x4c] ss:$16 sps:$4 sm:$0xff]  }
 0x3fa   : > { %2446 = vmatprep.subr.bf16.mxu0 %v7306_v40  ;;  %2487 = vmatprep.subr.bf16.mxu1 %v7307_v41  ;;  %v6471_v39 = vld [vmem:[#allocation6] ss:$16 sps:$4 sm:$0xff]   ;;  %v6473_v40 = vld [vmem:[#allocation6 + $0x8] ss:$16 sps:$4 sm:$0xff]  }
 0x3fb   : > { %2476 = vmatprep.mubr.bf16.mxu0 %v7246_v20  ;;  %2517 = vmatprep.mubr.bf16.mxu1 %v7246_v20 }
 0x3fd   : > { %2447 = vmatpush1.bf16.msra.mxu0 %v7308_v42  ;;  %2488 = vmatpush1.bf16.msra.mxu1 %v7309_v43  ;;  %v6479_v42 = vld [vmem:[#allocation6 + $0x24] ss:$16 sps:$4 sm:$0xff]   ;;  %v6481_v43 = vld [vmem:[#allocation6 + $0x2c] ss:$16 sps:$4 sm:$0xff]  }
 0x3fe   : > { %2448 = vmatprep.subr.bf16.mxu0 %v7310_v47  ;;  %2489 = vmatprep.subr.bf16.mxu1 %v7311_v50  ;;  %v6487_v47 = vld [vmem:[#allocation6 + $0x20] ss:$16 sps:$4 sm:$0xff]   ;;  %v6489_v50 = vld [vmem:[#allocation6 + $0x28] ss:$16 sps:$4 sm:$0xff]  }
 0x401   : > { %2449 = vmatpush1.bf16.msra.mxu0 %v7312_v7  ;;  %2490 = vmatpush1.bf16.msra.mxu1 %v7313_v17  ;;  %v5446_v55 = vpop.eup %5445  ;;  %v6503_v7 = vld [vmem:[#allocation6 + $0x48] ss:$16 sps:$4 sm:$0xff]   ;;  %v6507_v17 = vld [vmem:[#allocation6 + $0x64] ss:$16 sps:$4 sm:$0xff]  }
 0x402   : > { %2450 = vmatprep.subr.bf16.mxu0 %v7314_v56  ;;  %2491 = vmatprep.subr.bf16.mxu1 %v7315_v58  ;;  %v1968_v60 = vmul.f32 %v5446_v55, %v6261_v12  ;;  %v7323_v12 = vld [vmem:[#allocation64_spill] sm:$0xff]  ;;  %v5448_v26 = vpop.eup %5447  ;;  %v6509_v55 = vld [vmem:[#allocation6 + $0x6c] ss:$16 sps:$4 sm:$0xff]   ;;  %v6515_v58 = vld [vmem:[#allocation6 + $0x68] ss:$16 sps:$4 sm:$0xff]  }
 0x403   : > { %v6513_v56 = vld [vmem:[#allocation6 + $0x60] ss:$16 sps:$4 sm:$0xff]  }
 0x404   : > { %v6448_v46 = vadd.f32 %v1969_v19, %v1968_v60  ;;  %v6521_v60 = vld [vmem:[#allocation6 + $0x8c] ss:$16 sps:$4 sm:$0xff]   ;;  %v6525_v19 = vld [vmem:[#allocation6 + $0x80] ss:$16 sps:$4 sm:$0xff]  }
 0x405   : > { %2451 = vmatpush1.bf16.msra.mxu0 %v7316_v21  ;;  %2492 = vmatpush1.bf16.msra.mxu1 %v7317_v5  ;;  %v6527_v21 = vld [vmem:[#allocation6 + $0x88] ss:$16 sps:$4 sm:$0xff]   ;;  %v6531_v5 = vld [vmem:[#allocation6 + $0xa4] ss:$16 sps:$4 sm:$0xff]  }
 0x406   : > { %2452 = vmatprep.subr.bf16.mxu0 %v7318_v16  ;;  %2493 = vmatprep.subr.bf16.mxu1 %v7319_v32  ;;  %5449 = vtanh.f32 %v6448_v46  ;;  %7334 = vst [vmem:[#allocation33_spill] sm:$0xff] %v6531_v5  ;;  %v6533_v16 = vld [vmem:[#allocation6 + $0xac] ss:$16 sps:$4 sm:$0xff]   ;;  %v6537_v32 = vld [vmem:[#allocation6 + $0xa0] ss:$16 sps:$4 sm:$0xff]  }
 0x407   : > { %7335 = vst [vmem:[#allocation34_spill] sm:$0xff] %v6533_v16  ;;  %7336 = vst [vmem:[#allocation35_spill] sm:$0xff] %v6537_v32 }
 0x409   : > { %2453 = vmatpush1.bf16.msra.mxu0 %v7320_v11  ;;  %2494 = vmatpush1.bf16.msra.mxu1 %v7321_v52  ;;  %v6539_v11 = vld [vmem:[#allocation6 + $0xa8] ss:$16 sps:$4 sm:$0xff]   ;;  %v6543_v52 = vld [vmem:[#allocation6 + $0xc4] ss:$16 sps:$4 sm:$0xff]  }
 0x40a   : > { %2454 = vmatprep.subr.bf16.mxu0 %v7322_v45  ;;  %2495 = vmatprep.subr.bf16.mxu1 %v7323_v12  ;;  %7337 = vst [vmem:[#allocation36_spill] sm:$0xff] %v6539_v11  ;;  %7338 = vst [vmem:[#allocation37_spill] sm:$0xff] %v6543_v52  ;;  %v6545_v45 = vld [vmem:[#allocation6 + $0xcc] ss:$16 sps:$4 sm:$0xff]   ;;  %v6549_v12 = vld [vmem:[#allocation6 + $0xc0] ss:$16 sps:$4 sm:$0xff]  }
 0x40b   : > { %7339 = vst [vmem:[#allocation38_spill] sm:$0xff] %v6545_v45  ;;  %7340 = vst [vmem:[#allocation39_spill] sm:$0xff] %v6549_v12 }
 0x40d   : > { %2455 = vmatpush1.bf16.msra.mxu0 %v7324_v14  ;;  %2496 = vmatpush1.bf16.msra.mxu1 %v7325_v25  ;;  %v6551_v14 = vld [vmem:[#allocation6 + $0xc8] ss:$16 sps:$4 sm:$0xff]   ;;  %v6555_v25 = vld [vmem:[#allocation6 + $0xe4] ss:$16 sps:$4 sm:$0xff]  }
 0x40e   : > { %2456 = vmatprep.subr.bf16.mxu0 %v7326_v1  ;;  %2497 = vmatprep.subr.bf16.mxu1 %v7327_v24  ;;  %7341 = vst [vmem:[#allocation40_spill] sm:$0xff] %v6551_v14  ;;  %7342 = vst [vmem:[#allocation41_spill] sm:$0xff] %v6555_v25  ;;  %v6557_v1 = vld [vmem:[#allocation6 + $0xec] ss:$16 sps:$4 sm:$0xff]   ;;  %v6561_v24 = vld [vmem:[#allocation6 + $0xe0] ss:$16 sps:$4 sm:$0xff]  }
 0x40f   : > { %7343 = vst [vmem:[#allocation42_spill] sm:$0xff] %v6557_v1  ;;  %7344 = vst [vmem:[#allocation43_spill] sm:$0xff] %v6561_v24 }
 0x410   : > { %v5450_v30 = vpop.eup %5449 }
 0x411   : > { %2457 = vmatpush1.bf16.msra.mxu0 %v7328_v33  ;;  %2498 = vmatpush1.bf16.msra.mxu1 %v7329_v51  ;;  %v1972_v31 = vmul.f32 %v5450_v30, %v5448_v26  ;;  %v6563_v26 = vld [vmem:[#allocation6 + $0xe8] ss:$16 sps:$4 sm:$0xff]  }
 0x412   : > { %2458 = vmatprep.subr.bf16.mxu0 %v7330_v35  ;;  %2499 = vmatprep.subr.bf16.mxu1 %v7331_v27  ;;  %7345 = vst [vmem:[#allocation44_spill] sm:$0xff] %v6563_v26 }
 0x413   : > { %v6475_v41 = vpack.c.bf16 %v1972_v31, %v1972_v31 }
 0x415   : > { %2459 = vmatpush1.bf16.msra.mxu0 %v7332_v48  ;;  %2500 = vmatpush1.bf16.msra.mxu1 %v7333_v38 }
 0x416   : > { %2787 = vmatprep.subr.bf16.mxu0 %v6465_v13  ;;  %2828 = vmatprep.subr.bf16.mxu1 %v6467_v36 }
 0x418   : > { %2477 = vmatmul.mubr.bf16.vlgmr.msra.gmra.mrb[28].mxu0 %v6475_v41  ;;  %2518 = vmatmul.mubr.bf16.vlgmr.msra.gmra.mrb[28].mxu1 %v6475_v41 }
 0x419   : > { %2788 = vmatpush1.bf16.msra.mxu0 %v6471_v39  ;;  %2829 = vmatpush1.bf16.msra.mxu1 %v6473_v40 }
 0x41a   : > { %2789 = vmatprep.subr.bf16.mxu0 %v6479_v42  ;;  %2830 = vmatprep.subr.bf16.mxu1 %v6481_v43 }
 0x41b   : > { %2819 = vmatprep.mubr.bf16.mxu0 %v7246_v20  ;;  %2860 = vmatprep.mubr.bf16.mxu1 %v7246_v20 }
 0x41d   : > { %2790 = vmatpush1.bf16.msra.mxu0 %v6487_v47  ;;  %2831 = vmatpush1.bf16.msra.mxu1 %v6489_v50 }
 0x41e   : > { %2791 = vmatprep.subr.bf16.mxu0 %v6493_v61  ;;  %2832 = vmatprep.subr.bf16.mxu1 %v6495_v49 }
 0x421   : > { %2792 = vmatpush1.bf16.msra.mxu0 %v6501_v62  ;;  %2833 = vmatpush1.bf16.msra.mxu1 %v6503_v7 }
 0x422   : > { %2793 = vmatprep.subr.bf16.mxu0 %v6507_v17  ;;  %2834 = vmatprep.subr.bf16.mxu1 %v6509_v55 }
 0x425   : > { %2794 = vmatpush1.bf16.msra.mxu0 %v6513_v56  ;;  %2835 = vmatpush1.bf16.msra.mxu1 %v6515_v58 }
 0x426   : > { %2795 = vmatprep.subr.bf16.mxu0 %v6519_v59  ;;  %2836 = vmatprep.subr.bf16.mxu1 %v6521_v60 }
 0x429   : > { %2796 = vmatpush1.bf16.msra.mxu0 %v6525_v19  ;;  %2837 = vmatpush1.bf16.msra.mxu1 %v6527_v21 }
 0x42a   : > { %2797 = vmatprep.subr.bf16.mxu0 %v6531_v5  ;;  %2838 = vmatprep.subr.bf16.mxu1 %v6533_v16 }
 0x42d   : > { %2798 = vmatpush1.bf16.msra.mxu0 %v6537_v32  ;;  %2839 = vmatpush1.bf16.msra.mxu1 %v6539_v11 }
 0x42e   : > { %2799 = vmatprep.subr.bf16.mxu0 %v6543_v52  ;;  %2840 = vmatprep.subr.bf16.mxu1 %v6545_v45 }
 0x431   : > { %2800 = vmatpush1.bf16.msra.mxu0 %v6549_v12  ;;  %2841 = vmatpush1.bf16.msra.mxu1 %v6551_v14 }
 0x432   : > { %2801 = vmatprep.subr.bf16.mxu0 %v6555_v25  ;;  %2842 = vmatprep.subr.bf16.mxu1 %v6557_v1 }
 0x435   : > { %2802 = vmatpush1.bf16.msra.mxu0 %v6561_v24  ;;  %2843 = vmatpush1.bf16.msra.mxu1 %v6563_v26 }
 0x438   : > { %2820 = vmatmul.mubr.bf16.vlgmr.msra.gmra.mrb[32].mxu0 %v6475_v41  ;;  %2861 = vmatmul.mubr.bf16.vlgmr.msra.gmra.mrb[32].mxu1 %v6475_v41 }
 0x439   : > { %3191 = vmatprep.mubr.bf16.mxu0 %v7246_v20  ;;  %3232 = vmatprep.mubr.bf16.mxu1 %v7246_v20 }
 0x4cb   : > { %v2236_v30 = vpop.f32.mrb[24].mxu0  ;;  %v2277_v33 = vpop.f32.mrb[24].mxu1 }
 0x4cc   : > { %v2238_v51 = vpop.f32.mrb[25].mxu0  ;;  %v2279_v35 = vpop.f32.mrb[25].mxu1 }
 0x4cd   : > { %v2240_v27 = vpop.f32.mrb[26].mxu0  ;;  %v2281_v31 = vpop.f32.mrb[26].mxu1 }
 0x4ce   : > { %v2241_v48 = vpop.f32.mrb[27].mxu0  ;;  %v2282_v38 = vpop.f32.mrb[27].mxu1 }
 0x4cf   : > { %v7347_v48 = vld [vmem:[#allocation22_spill] sm:$0xff] }
 0x4eb   : > { %v2478_v1 = vpop.f32.mrb[28].mxu0  ;;  %v2519_v24 = vpop.f32.mrb[28].mxu1 }
 0x4ec   : > { %v2479_v25 = vadd.f32 %v2478_v1, %v2236_v30  ;;  %v2520_v26 = vadd.f32 %v2519_v24, %v2277_v33  ;;  %v2480_v14 = vpop.f32.mrb[29].mxu0  ;;  %v2521_v12 = vpop.f32.mrb[29].mxu1 }
 0x4ed   : > { %v2481_v45 = vadd.f32 %v2480_v14, %v2238_v51  ;;  %v2522_v41 = vadd.f32 %v2521_v12, %v2279_v35  ;;  %v2482_v52 = vpop.f32.mrb[30].mxu0  ;;  %v2523_v11 = vpop.f32.mrb[30].mxu1  ;;  %v7346_v51 = vld [vmem:[#allocation21_spill] sm:$0xff] }
 0x4ee   : > { %v6574_v32 = vadd.f32 %v2479_v25, %v6327_v6  ;;  %v2483_v16 = vpop.f32.mrb[31].mxu0  ;;  %v2524_v5 = vpop.f32.mrb[31].mxu1  ;;  %v6577_v27 = vadd.f32 %v2520_v26, %v6330_v15  ;;  %v6663_v15 = vld [vmem:[#allocation6 + $0x168] ss:$16 sps:$4 sm:$0xff]   ;;  %v6667_v6 = vld [vmem:[#allocation6 + $0x184] ss:$16 sps:$4 sm:$0xff]  }
 0x4ef   : > { %v6580_v31 = vadd.f32 %v2481_v45, %v6333_v54  ;;  %v6587_v52 = vadd.f32 %v2522_v41, %v6343_v29  ;;  %v6661_v54 = vld [vmem:[#allocation6 + $0x160] ss:$16 sps:$4 sm:$0xff]   ;;  %7364 = vst [vmem:[#allocation49_spill] sm:$0xff] %v6663_v15  ;;  %7365 = vst [vmem:[#allocation50_spill] sm:$0xff] %v6667_v6 }
 0x4f0   : > { %v2535_v1 = vmul.f32 %v6574_v32, %v6574_v32  ;;  %v2537_v16 = vmul.f32 %v6577_v27, %v6577_v27  ;;  %7363 = vst [vmem:[#allocation48_spill] sm:$0xff] %v6661_v54 }
 0x4f1   : > { %v2536_v14 = vmul.f32 %v6580_v31, %v6580_v31  ;;  %v2530_v11 = vadd.f32 %v6580_v31, %v6574_v32  ;;  %v2538_v25 = vmul.f32 %v6587_v52, %v6587_v52 }
 0x4f3   : > { %v2531_v5 = vadd.f32 %v2530_v11, %v6577_v27  ;;  %v2539_v12 = vadd.f32 %v2536_v14, %v2535_v1  ;;  %v7348_v1 = vld [vmem:[#allocation23_spill] sm:$0xff] }
 0x4f5   : > { %v2532_v45 = vadd.f32 %v2531_v5, %v6587_v52  ;;  %v2540_v24 = vadd.f32 %v2539_v12, %v2537_v16  ;;  %v7349_v5 = vld [vmem:[#allocation24_spill] sm:$0xff] }
 0x4f7   : > { %2533 = vadd.xlane.f32.xlu0 %v2532_v45  ;;  %v2541_v26 = vadd.f32 %v2540_v24, %v2538_v25 }
 0x4f9   : > { %2542 = vadd.xlane.f32.xlu1 %v2541_v26 }
 0x50b   : > { %v2821_v30 = vpop.f32.mrb[32].mxu0  ;;  %v2862_v33 = vpop.f32.mrb[32].mxu1 }
 0x50c   : > { %v6598_v35 = vadd.f32 %v2821_v30, %v7346_v51  ;;  %v6601_v38 = vadd.f32 %v2862_v33, %v7347_v48  ;;  %v2823_v41 = vpop.f32.mrb[33].mxu0  ;;  %v2864_v11 = vpop.f32.mrb[33].mxu1 }
 0x50d   : > { %v6604_v14 = vadd.f32 %v2823_v41, %v7348_v1  ;;  %v6607_v29 = vadd.f32 %v2864_v11, %v7349_v5  ;;  %v2825_v16 = vpop.f32.mrb[34].mxu0  ;;  %v2866_v12 = vpop.f32.mrb[34].mxu1 }
 0x50e   : > { %v2878_v45 = vmul.f32 %v6598_v35, %v6598_v35  ;;  %v2826_v25 = vpop.f32.mrb[35].mxu0  ;;  %v2867_v24 = vpop.f32.mrb[35].mxu1  ;;  %v2880_v33 = vmul.f32 %v6601_v38, %v6601_v38  ;;  %v6621_v16 = vld [vmem:[#allocation6 + $0x104] ss:$16 sps:$4 sm:$0xff]   ;;  %v6623_v12 = vld [vmem:[#allocation6 + $0x10c] ss:$16 sps:$4 sm:$0xff]  }
 0x50f   : > { %v2873_v26 = vadd.f32 %v6604_v14, %v6598_v35  ;;  %v2879_v30 = vmul.f32 %v6604_v14, %v6604_v14  ;;  %v2881_v11 = vmul.f32 %v6607_v29, %v6607_v29  ;;  %7350 = vst [vmem:[#allocation16_spill] sm:$0xff] %v6623_v12  ;;  %v6625_v25 = vld [vmem:[#allocation6 + $0x100] ss:$16 sps:$4 sm:$0xff]   ;;  %v6627_v24 = vld [vmem:[#allocation6 + $0x108] ss:$16 sps:$4 sm:$0xff]   ;;  %3159 = vmatprep.subr.bf16.mxu0 %v6621_v16 }
 0x510   : > { %7351 = vst [vmem:[#allocation17_spill] sm:$0xff] %v6625_v25  ;;  %7352 = vst [vmem:[#allocation18_spill] sm:$0xff] %v6627_v24  ;;  %3200 = vmatprep.subr.bf16.mxu1 %v6623_v12  ;;  %3160 = vmatpush1.bf16.msra.mxu0 %v6625_v25 }
 0x511   : > { %v2874_v51 = vadd.f32 %v2873_v26, %v6601_v38  ;;  %v2882_v48 = vadd.f32 %v2879_v30, %v2878_v45  ;;  %3201 = vmatpush1.bf16.msra.mxu1 %v6627_v24  ;;  %v6633_v45 = vld [vmem:[#allocation6 + $0x124] ss:$16 sps:$4 sm:$0xff]   ;;  %v6635_v26 = vld [vmem:[#allocation6 + $0x12c] ss:$16 sps:$4 sm:$0xff]   ;;  %v6637_v30 = vld [vmem:[#allocation6 + $0x120] ss:$16 sps:$4 sm:$0xff]  }
 0x512   : > { %7353 = vst [vmem:[#allocation19_spill] sm:$0xff] %v6633_v45  ;;  %7354 = vst [vmem:[#allocation20_spill] sm:$0xff] %v6635_v26  ;;  %3161 = vmatprep.subr.bf16.mxu0 %v6633_v45  ;;  %3202 = vmatprep.subr.bf16.mxu1 %v6635_v26 }
 0x513   : > { %v2875_v41 = vadd.f32 %v2874_v51, %v6607_v29  ;;  %v2883_v1 = vadd.f32 %v2882_v48, %v2880_v33  ;;  %7355 = vst [vmem:[#allocation75_spill] sm:$0xff] %v6637_v30  ;;  %v6639_v33 = vld [vmem:[#allocation6 + $0x128] ss:$16 sps:$4 sm:$0xff]   ;;  %v6643_v51 = vld [vmem:[#allocation6 + $0x144] ss:$16 sps:$4 sm:$0xff]  }
 0x514   : > { %7356 = vst [vmem:[#allocation76_spill] sm:$0xff] %v6639_v33  ;;  %7357 = vst [vmem:[#allocation77_spill] sm:$0xff] %v6643_v51  ;;  %v6645_v48 = vld [vmem:[#allocation6 + $0x14c] ss:$16 sps:$4 sm:$0xff]   ;;  %3162 = vmatpush1.bf16.msra.mxu0 %v6637_v30 }
 0x515   : > { %2876 = vadd.xlane.f32.xlu0 %v2875_v41  ;;  %v2884_v5 = vadd.f32 %v2883_v1, %v2881_v11  ;;  %7358 = vst [vmem:[#allocation78_spill] sm:$0xff] %v6645_v48  ;;  %3203 = vmatpush1.bf16.msra.mxu1 %v6639_v33  ;;  %v6649_v41 = vld [vmem:[#allocation6 + $0x140] ss:$16 sps:$4 sm:$0xff]   ;;  %v6651_v11 = vld [vmem:[#allocation6 + $0x148] ss:$16 sps:$4 sm:$0xff]  }
 0x516   : > { %7359 = vst [vmem:[#allocation79_spill] sm:$0xff] %v6649_v41  ;;  %7360 = vst [vmem:[#allocation45_spill] sm:$0xff] %v6651_v11  ;;  %3163 = vmatprep.subr.bf16.mxu0 %v6643_v51  ;;  %3204 = vmatprep.subr.bf16.mxu1 %v6645_v48  ;;  %v6655_v1 = vld [vmem:[#allocation6 + $0x164] ss:$16 sps:$4 sm:$0xff]   ;;  %v6669_v51 = vld [vmem:[#allocation6 + $0x18c] ss:$16 sps:$4 sm:$0xff]  }
 0x517   : > { %2885 = vadd.xlane.f32.xlu1 %v2884_v5  ;;  %7361 = vst [vmem:[#allocation46_spill] sm:$0xff] %v6655_v1  ;;  %v6657_v5 = vld [vmem:[#allocation6 + $0x16c] ss:$16 sps:$4 sm:$0xff]   ;;  %7366 = vst [vmem:[#allocation51_spill] sm:$0xff] %v6669_v51  ;;  %v6673_v48 = vld [vmem:[#allocation6 + $0x180] ss:$16 sps:$4 sm:$0xff]  }
 0x518   : > { %7362 = vst [vmem:[#allocation47_spill] sm:$0xff] %v6657_v5  ;;  %3164 = vmatpush1.bf16.msra.mxu0 %v6649_v41  ;;  %7367 = vst [vmem:[#allocation52_spill] sm:$0xff] %v6673_v48  ;;  %v6675_v41 = vld [vmem:[#allocation6 + $0x188] ss:$16 sps:$4 sm:$0xff]  }
 0x519   : > { %3205 = vmatpush1.bf16.msra.mxu1 %v6651_v11  ;;  %3165 = vmatprep.subr.bf16.mxu0 %v6655_v1  ;;  %7368 = vst [vmem:[#allocation53_spill] sm:$0xff] %v6675_v41  ;;  %v6679_v11 = vld [vmem:[#allocation6 + $0x1a4] ss:$16 sps:$4 sm:$0xff]   ;;  %v6681_v1 = vld [vmem:[#allocation6 + $0x1ac] ss:$16 sps:$4 sm:$0xff]  }
 0x51a   : > { %3206 = vmatprep.subr.bf16.mxu1 %v6657_v5  ;;  %7369 = vst [vmem:[#allocation54_spill] sm:$0xff] %v6679_v11  ;;  %7370 = vst [vmem:[#allocation55_spill] sm:$0xff] %v6681_v1  ;;  %v6685_v5 = vld [vmem:[#allocation6 + $0x1a0] ss:$16 sps:$4 sm:$0xff]  }
 0x51b   : > { %7371 = vst [vmem:[#allocation56_spill] sm:$0xff] %v6685_v5 }
 0x51c   : > { %3166 = vmatpush1.bf16.msra.mxu0 %v6661_v54  ;;  %v6687_v54 = vld [vmem:[#allocation6 + $0x1a8] ss:$16 sps:$4 sm:$0xff]  }
 0x51d   : > { %3207 = vmatpush1.bf16.msra.mxu1 %v6663_v15  ;;  %3167 = vmatprep.subr.bf16.mxu0 %v6667_v6  ;;  %7372 = vst [vmem:[#allocation57_spill] sm:$0xff] %v6687_v54  ;;  %v6691_v15 = vld [vmem:[#allocation6 + $0x1c4] ss:$16 sps:$4 sm:$0xff]   ;;  %v6693_v6 = vld [vmem:[#allocation6 + $0x1cc] ss:$16 sps:$4 sm:$0xff]  }
 0x51e   : > { %3208 = vmatprep.subr.bf16.mxu1 %v6669_v51  ;;  %7373 = vst [vmem:[#allocation58_spill] sm:$0xff] %v6691_v15  ;;  %7374 = vst [vmem:[#allocation59_spill] sm:$0xff] %v6693_v6  ;;  %v6697_v51 = vld [vmem:[#allocation6 + $0x1c0] ss:$16 sps:$4 sm:$0xff]  }
 0x51f   : > { %7375 = vst [vmem:[#allocation60_spill] sm:$0xff] %v6697_v51 }
 0x520   : > { %3168 = vmatpush1.bf16.msra.mxu0 %v6673_v48  ;;  %v6699_v48 = vld [vmem:[#allocation6 + $0x1c8] ss:$16 sps:$4 sm:$0xff]  }
 0x521   : > { %3209 = vmatpush1.bf16.msra.mxu1 %v6675_v41  ;;  %3169 = vmatprep.subr.bf16.mxu0 %v6679_v11  ;;  %7376 = vst [vmem:[#allocation61_spill] sm:$0xff] %v6699_v48  ;;  %v6703_v41 = vld [vmem:[#allocation6 + $0x1e4] ss:$16 sps:$4 sm:$0xff]   ;;  %v6705_v11 = vld [vmem:[#allocation6 + $0x1ec] ss:$16 sps:$4 sm:$0xff]  }
 0x522   : > { %3210 = vmatprep.subr.bf16.mxu1 %v6681_v1  ;;  %7377 = vst [vmem:[#allocation62_spill] sm:$0xff] %v6703_v41  ;;  %7378 = vst [vmem:[#allocation63_spill] sm:$0xff] %v6705_v11  ;;  %v6709_v1 = vld [vmem:[#allocation6 + $0x1e0] ss:$16 sps:$4 sm:$0xff]  }
 0x523   : > { %7379 = vst [vmem:[#allocation64_spill] sm:$0xff] %v6709_v1 }
 0x524   : > { %3170 = vmatpush1.bf16.msra.mxu0 %v6685_v5  ;;  %v6711_v5 = vld [vmem:[#allocation6 + $0x1e8] ss:$16 sps:$4 sm:$0xff]  }
 0x525   : > { %3211 = vmatpush1.bf16.msra.mxu1 %v6687_v54  ;;  %3171 = vmatprep.subr.bf16.mxu0 %v6691_v15  ;;  %7380 = vst [vmem:[#allocation65_spill] sm:$0xff] %v6711_v5  ;;  %v6715_v54 = vld [vmem:[#allocation8 + $0x4] ss:$16 sps:$4 sm:$0xff]   ;;  %v6717_v15 = vld [vmem:[#allocation8 + $0xc] ss:$16 sps:$4 sm:$0xff]  }
 0x526   : > { %3212 = vmatprep.subr.bf16.mxu1 %v6693_v6  ;;  %7381 = vst [vmem:[#allocation66_spill] sm:$0xff] %v6715_v54  ;;  %7382 = vst [vmem:[#allocation67_spill] sm:$0xff] %v6717_v15 }
 0x528   : > { %3172 = vmatpush1.bf16.msra.mxu0 %v6697_v51 }
 0x529   : > { %3213 = vmatpush1.bf16.msra.mxu1 %v6699_v48  ;;  %3173 = vmatprep.subr.bf16.mxu0 %v6703_v41 }
 0x52a   : > { %3214 = vmatprep.subr.bf16.mxu1 %v6705_v11 }
 0x52c   : > { %3174 = vmatpush1.bf16.msra.mxu0 %v6709_v1 }
 0x52d   : > { %3215 = vmatpush1.bf16.msra.mxu1 %v6711_v5  ;;  %3401 = vmatprep.subr.bf16.mxu0 %v6715_v54 }
 0x52e   : > { %3442 = vmatprep.subr.bf16.mxu1 %v6717_v15 }
 0x584   : > { %v2534_v48 = vpop.xlane.xlu0 %2533 }
 0x585   : > { %v2544_v51 = vmul.f32 0.001953125, %v2534_v48 }
 0x586   : > { %v2543_v6 = vpop.xlane.xlu1 %2542 }
 0x587   : > { %v2545_v33 = vmul.f32 0.001953125, %v2543_v6  ;;  %v2546_v30 = vmul.f32 %v2544_v51, %v2544_v51  ;;  %v2549_v11 = vsub.f32 %v6580_v31, %v2544_v51  ;;  %v2551_v24 = vsub.f32 %v6587_v52, %v2544_v51 }
 0x588   : > { %v2548_v5 = vsub.f32 %v6574_v32, %v2544_v51 }
 0x589   : > { %v2547_v41 = vsub.f32 %v2545_v33, %v2546_v30  ;;  %v2550_v30 = vsub.f32 %v6577_v27, %v2544_v51 }
 0x58b   : > { %v2552_v26 = vadd.f32 1e-05, %v2547_v41 }
 0x58d   : > { %5451 = vrsqrt.f32 %v2552_v26 }
 0x597   : > { %v5452_v45 = vpop.eup %5451 }
 0x598   : > { %v2555_v1 = vmul.f32 %v5452_v45, %v2549_v11  ;;  %v2557_v25 = vmul.f32 %v5452_v45, %v2551_v24  ;;  %v2554_v15 = vmul.f32 %v5452_v45, %v2548_v5  ;;  %v2556_v31 = vmul.f32 %v5452_v45, %v2550_v30 }
 0x59a   : > { %v2559_v54 = vmul.f32 %v2555_v1, %v6383_v0  ;;  %v2561_v6 = vmul.f32 %v2557_v25, %v6391_v3  ;;  %v2558_v26 = vmul.f32 %v2554_v15, %v6394_v8  ;;  %v2560_v11 = vmul.f32 %v2556_v31, %v6407_v28 }
 0x59c   : > { %v2563_v48 = vadd.f32 %v2559_v54, %v6386_v2  ;;  %v2565_v52 = vadd.f32 %v2561_v6, %v6398_v53  ;;  %v2562_v24 = vadd.f32 %v2558_v26, %v6403_v23  ;;  %v2564_v27 = vadd.f32 %v2560_v11, %v6412_v37 }
 0x59e   : > { %v4834_v12 = vmul.f32 -1.442695, %v2563_v48  ;;  %v4835_v5 = vmul.f32 -1.442695, %v2565_v52  ;;  %v2566_v48 = vmul.f32 1.442695, %v2562_v24 }
 0x5a0   : > { %5453 = vpow2.f32 %v4834_v12 }
 0x5a1   : > { %5455 = vpow2.f32 %v4835_v5 }
 0x5a2   : > { %v2877_v33 = vpop.xlane.xlu0 %2876 }
 0x5a3   : > { %v2887_v41 = vmul.f32 0.001953125, %v2877_v33 }
 0x5a4   : > { %v2886_v32 = vpop.xlane.xlu1 %2885 }
 0x5a5   : > { %v2888_v1 = vmul.f32 0.001953125, %v2886_v32  ;;  %v2889_v54 = vmul.f32 %v2887_v41, %v2887_v41  ;;  %v2892_v6 = vsub.f32 %v6604_v14, %v2887_v41  ;;  %v2894_v52 = vsub.f32 %v6607_v29, %v2887_v41 }
 0x5a6   : > { %v2891_v11 = vsub.f32 %v6598_v35, %v2887_v41 }
 0x5a7   : > { %v2890_v25 = vsub.f32 %v2888_v1, %v2889_v54 }
 0x5a9   : > { %v2895_v51 = vadd.f32 1e-05, %v2890_v25 }
 0x5aa   : > { %v5454_v15 = vpop.eup %5453 }
 0x5ab   : > { %5457 = vrsqrt.f32 %v2895_v51  ;;  %v2571_v12 = vadd.f32 1.0, %v5454_v15  ;;  %v5456_v45 = vpop.eup %5455  ;;  %v2893_v15 = vsub.f32 %v6601_v38, %v2887_v41 }
 0x5ac   : > { %5459 = vpow2.f32 %v2566_v48  ;;  %v2578_v24 = vadd.f32 1.0, %v5456_v45 }
 0x5ad   : > { %5461 = vtanh.f32 %v2564_v27 }
 0x5ae   : > { %5463 = vrcp.f32 %v2571_v12 }
 0x5af   : > { %5465 = vrcp.f32 %v2578_v24  ;;  %v6751_v24 = vld [vmem:[#allocation8] ss:$16 sps:$4 sm:$0xff]  }
 0x5b5   : > { %v5458_v30 = vpop.eup %5457 }
 0x5b6   : > { %v5460_v26 = vpop.eup %5459  ;;  %v2898_v31 = vmul.f32 %v5458_v30, %v2892_v6  ;;  %v2900_v25 = vmul.f32 %v5458_v30, %v2894_v52  ;;  %v2897_v48 = vmul.f32 %v5458_v30, %v2891_v11  ;;  %v2899_v12 = vmul.f32 %v5458_v30, %v2893_v15  ;;  %v6753_v11 = vld [vmem:[#allocation8 + $0x8] ss:$16 sps:$4 sm:$0xff]   ;;  %v6775_v15 = vld [vmem:[#allocation8 + $0x40] ss:$16 sps:$4 sm:$0xff]  }
 0x5b7   : > { %v5462_v33 = vpop.eup %5461  ;;  %7383 = vst [vmem:[#allocation68_spill] sm:$0xff] %v6775_v15 }
 0x5b8   : > { %v5464_v32 = vpop.eup %5463  ;;  %v2902_v1 = vmul.f32 %v2898_v31, %v7299_v57  ;;  %v2583_v5 = vmul.f32 %v5462_v33, %v5460_v26  ;;  %v2904_v29 = vmul.f32 %v2900_v25, %v7301_v34  ;;  %v2901_v35 = vmul.f32 %v2897_v48, %v6239_v9  ;;  %v6761_v25 = vld [vmem:[#allocation8 + $0x20] ss:$16 sps:$4 sm:$0xff]   ;;  %v6763_v48 = vld [vmem:[#allocation8 + $0x28] ss:$16 sps:$4 sm:$0xff]  }
 0x5b9   : > { %v2582_v54 = vmul.f32 %v5464_v32, %v6421_v44  ;;  %v2903_v6 = vmul.f32 %v2899_v12, %v6252_v4  ;;  %v5466_v31 = vpop.eup %5465  ;;  %v6783_v12 = vld [vmem:[#allocation8 + $0x6c] ss:$16 sps:$4 sm:$0xff]  }
 0x5ba   : > { %v2906_v27 = vadd.f32 %v2902_v1, %v7300_v10  ;;  %v2908_v44 = vadd.f32 %v2904_v29, %v7302_v22  ;;  %v2905_v45 = vadd.f32 %v2901_v35, %v7303_v63  ;;  %v6755_v1 = vld [vmem:[#allocation8 + $0x24] ss:$16 sps:$4 sm:$0xff]   ;;  %v6777_v29 = vld [vmem:[#allocation8 + $0x48] ss:$16 sps:$4 sm:$0xff]   ;;  %7385 = vst [vmem:[#allocation70_spill] sm:$0xff] %v6783_v12 }
 0x5bb   : > { %v6741_v14 = vadd.f32 %v2583_v5, %v2582_v54  ;;  %v2907_v38 = vadd.f32 %v2903_v6, %v6257_v18  ;;  %v6757_v54 = vld [vmem:[#allocation8 + $0x2c] ss:$16 sps:$4 sm:$0xff]   ;;  %7384 = vst [vmem:[#allocation69_spill] sm:$0xff] %v6777_v29  ;;  %v6781_v35 = vld [vmem:[#allocation8 + $0x64] ss:$16 sps:$4 sm:$0xff]  }
 0x5bc   : > { %v4868_v51 = vmul.f32 -1.442695, %v2906_v27  ;;  %v4869_v26 = vmul.f32 -1.442695, %v2908_v44  ;;  %v2909_v33 = vmul.f32 1.442695, %v2905_v45 }
 0x5bd   : > { %5467 = vtanh.f32 %v6741_v14  ;;  %v6767_v27 = vld [vmem:[#allocation8 + $0x44] ss:$16 sps:$4 sm:$0xff]  }
 0x5be   : > { %5469 = vpow2.f32 %v4868_v51  ;;  %v6769_v51 = vld [vmem:[#allocation8 + $0x4c] ss:$16 sps:$4 sm:$0xff]  }
 0x5bf   : > { %5471 = vpow2.f32 %v4869_v26  ;;  %v6787_v26 = vld [vmem:[#allocation8 + $0x60] ss:$16 sps:$4 sm:$0xff]  }
 0x5c0   : > { %5473 = vpow2.f32 %v2909_v33 }
 0x5c1   : > { %5475 = vtanh.f32 %v2907_v38  ;;  %v6795_v38 = vld [vmem:[#allocation8 + $0x8c] ss:$16 sps:$4 sm:$0xff]  }
 0x5c7   : > { %v5468_v52 = vpop.eup %5467 }
 0x5c8   : > { %v2586_v41 = vmul.f32 %v5468_v52, %v5466_v31  ;;  %v5470_v32 = vpop.eup %5469  ;;  %v6789_v31 = vld [vmem:[#allocation8 + $0x68] ss:$16 sps:$4 sm:$0xff]   ;;  %v6793_v52 = vld [vmem:[#allocation8 + $0x84] ss:$16 sps:$4 sm:$0xff]  }
 0x5c9   : > { %v2914_v5 = vadd.f32 1.0, %v5470_v32  ;;  %v5472_v44 = vpop.eup %5471 }
 0x5ca   : > { %v2966_v30 = vpack.c.bf16 %v2586_v41, %v2586_v41  ;;  %v5474_v45 = vpop.eup %5473  ;;  %v2921_v41 = vadd.f32 1.0, %v5472_v44  ;;  %v6810_v44 = vld [vmem:[#allocation8 + $0xac] ss:$16 sps:$4 sm:$0xff]  }
 0x5cb   : > { %5477 = vrcp.f32 %v2914_v5  ;;  %v5476_v6 = vpop.eup %5475  ;;  %v6800_v5 = vld [vmem:[#allocation8 + $0x80] ss:$16 sps:$4 sm:$0xff]   ;;  %7388 = vst [vmem:[#allocation73_spill] sm:$0xff] %v6810_v44 }
 0x5cc   : > { %3192 = vmatmul.mubr.bf16.vlgmr.msra.gmra.mrb[36].mxu0 %v2966_v30  ;;  %3233 = vmatmul.mubr.bf16.vlgmr.msra.gmra.mrb[36].mxu1 %v2966_v30  ;;  %v2926_v30 = vmul.f32 %v5476_v6, %v5474_v45  ;;  %5479 = vrcp.f32 %v2921_v41  ;;  %v6817_v45 = vld [vmem:[#allocation8 + $0xa8] ss:$16 sps:$4 sm:$0xff]   ;;  %v6821_v6 = vld [vmem:[#allocation8 + $0xc4] ss:$16 sps:$4 sm:$0xff]   ;;  %v6827_v41 = vld [vmem:[#allocation8 + $0xc0] ss:$16 sps:$4 sm:$0xff]  }
 0x5cd   : > { %3402 = vmatpush1.bf16.msra.mxu0 %v6751_v24  ;;  %3443 = vmatpush1.bf16.msra.mxu1 %v6753_v11  ;;  %7390 = vst [vmem:[#allocation21_spill] sm:$0xff] %v6817_v45  ;;  %7391 = vst [vmem:[#allocation22_spill] sm:$0xff] %v6821_v6 }
 0x5ce   : > { %3403 = vmatprep.subr.bf16.mxu0 %v6755_v1  ;;  %3444 = vmatprep.subr.bf16.mxu1 %v6757_v54 }
 0x5cf   : > { %3433 = vmatprep.mubr.bf16.mxu0 %v7246_v20  ;;  %3474 = vmatprep.mubr.bf16.mxu1 %v7246_v20 }
 0x5d1   : > { %3404 = vmatpush1.bf16.msra.mxu0 %v6761_v25  ;;  %3445 = vmatpush1.bf16.msra.mxu1 %v6763_v48 }
 0x5d2   : > { %3405 = vmatprep.subr.bf16.mxu0 %v6767_v27  ;;  %3446 = vmatprep.subr.bf16.mxu1 %v6769_v51 }
 0x5d5   : > { %3406 = vmatpush1.bf16.msra.mxu0 %v6775_v15  ;;  %3447 = vmatpush1.bf16.msra.mxu1 %v6777_v29  ;;  %v5478_v33 = vpop.eup %5477  ;;  %v6802_v29 = vld [vmem:[#allocation8 + $0x88] ss:$16 sps:$4 sm:$0xff]  }
 0x5d6   : > { %3407 = vmatprep.subr.bf16.mxu0 %v6781_v35  ;;  %3448 = vmatprep.subr.bf16.mxu1 %v6783_v12  ;;  %v2925_v32 = vmul.f32 %v5478_v33, %v6448_v46  ;;  %7386 = vst [vmem:[#allocation71_spill] sm:$0xff] %v6802_v29  ;;  %v6808_v12 = vld [vmem:[#allocation8 + $0xa4] ss:$16 sps:$4 sm:$0xff]   ;;  %v6815_v46 = vld [vmem:[#allocation8 + $0xa0] ss:$16 sps:$4 sm:$0xff]  }
 0x5d7   : > { %7387 = vst [vmem:[#allocation72_spill] sm:$0xff] %v6808_v12  ;;  %7389 = vst [vmem:[#allocation74_spill] sm:$0xff] %v6815_v46  ;;  %v6823_v33 = vld [vmem:[#allocation8 + $0xcc] ss:$16 sps:$4 sm:$0xff]  }
 0x5d8   : > { %v6804_v15 = vadd.f32 %v2926_v30, %v2925_v32  ;;  %7392 = vst [vmem:[#allocation23_spill] sm:$0xff] %v6823_v33  ;;  %v6829_v32 = vld [vmem:[#allocation8 + $0xc8] ss:$16 sps:$4 sm:$0xff]   ;;  %v6833_v30 = vld [vmem:[#allocation8 + $0xe4] ss:$16 sps:$4 sm:$0xff]  }
 0x5d9   : > { %3408 = vmatpush1.bf16.msra.mxu0 %v6787_v26  ;;  %3449 = vmatpush1.bf16.msra.mxu1 %v6789_v31 }
 0x5da   : > { %3409 = vmatprep.subr.bf16.mxu0 %v6793_v52  ;;  %3450 = vmatprep.subr.bf16.mxu1 %v6795_v38  ;;  %5481 = vtanh.f32 %v6804_v15 }
 0x5dd   : > { %3410 = vmatpush1.bf16.msra.mxu0 %v6800_v5  ;;  %3451 = vmatpush1.bf16.msra.mxu1 %v6802_v29 }
 0x5de   : > { %3411 = vmatprep.subr.bf16.mxu0 %v6808_v12  ;;  %3452 = vmatprep.subr.bf16.mxu1 %v6810_v44  ;;  %v6835_v12 = vld [vmem:[#allocation8 + $0xec] ss:$16 sps:$4 sm:$0xff]   ;;  %v5480_v44 = vpop.eup %5479 }
 0x5df   : > { %7393 = vst [vmem:[#allocation24_spill] sm:$0xff] %v6835_v12 }
 0x5e1   : > { %3412 = vmatpush1.bf16.msra.mxu0 %v6815_v46  ;;  %3453 = vmatpush1.bf16.msra.mxu1 %v6817_v45  ;;  %v6839_v46 = vld [vmem:[#allocation8 + $0xe0] ss:$16 sps:$4 sm:$0xff]   ;;  %v6841_v45 = vld [vmem:[#allocation8 + $0xe8] ss:$16 sps:$4 sm:$0xff]  }
 0x5e2   : > { %3413 = vmatprep.subr.bf16.mxu0 %v6821_v6  ;;  %3454 = vmatprep.subr.bf16.mxu1 %v6823_v33  ;;  %7394 = vst [vmem:[#allocation80_spill] sm:$0xff] %v6839_v46  ;;  %7395 = vst [vmem:[#allocation81_spill] sm:$0xff] %v6841_v45 }
 0x5e4   : > { %v5482_v29 = vpop.eup %5481 }
 0x5e5   : > { %3414 = vmatpush1.bf16.msra.mxu0 %v6827_v41  ;;  %3455 = vmatpush1.bf16.msra.mxu1 %v6829_v32  ;;  %v2929_v6 = vmul.f32 %v5482_v29, %v5480_v44  ;;  %v7417_v29 = vld [vmem:[#allocation79_spill] sm:$0xff]  ;;  %v7418_v44 = vld [vmem:[#allocation45_spill] sm:$0xff] }
 0x5e6   : > { %3415 = vmatprep.subr.bf16.mxu0 %v6833_v30  ;;  %3456 = vmatprep.subr.bf16.mxu1 %v6835_v12 }
 0x5e7   : > { %v2932_v33 = vpack.c.bf16 %v2929_v6, %v2929_v6  ;;  %v7419_v6 = vld [vmem:[#allocation46_spill] sm:$0xff] }
 0x5e9   : > { %3416 = vmatpush1.bf16.msra.mxu0 %v6839_v46  ;;  %3457 = vmatpush1.bf16.msra.mxu1 %v6841_v45 }
 0x5ea   : > { %3744 = vmatprep.subr.bf16.mxu0 %v6465_v13  ;;  %3785 = vmatprep.subr.bf16.mxu1 %v6467_v36  ;;  %v7396_v13 = vld [vmem:[#allocation33_spill] sm:$0xff]  ;;  %v7397_v36 = vld [vmem:[#allocation34_spill] sm:$0xff] }
 0x5ec   : > { %3434 = vmatmul.mubr.bf16.vlgmr.msra.gmra.mrb[40].mxu0 %v2932_v33  ;;  %3475 = vmatmul.mubr.bf16.vlgmr.msra.gmra.mrb[40].mxu1 %v2932_v33 }
 0x5ed   : > { %3745 = vmatpush1.bf16.msra.mxu0 %v6471_v39  ;;  %3786 = vmatpush1.bf16.msra.mxu1 %v6473_v40  ;;  %v7398_v39 = vld [vmem:[#allocation35_spill] sm:$0xff]  ;;  %v7399_v40 = vld [vmem:[#allocation36_spill] sm:$0xff] }
 0x5ee   : > { %3746 = vmatprep.subr.bf16.mxu0 %v6479_v42  ;;  %3787 = vmatprep.subr.bf16.mxu1 %v6481_v43  ;;  %v7400_v42 = vld [vmem:[#allocation37_spill] sm:$0xff]  ;;  %v7401_v43 = vld [vmem:[#allocation38_spill] sm:$0xff] }
 0x5ef   : > { %3776 = vmatprep.mubr.bf16.mxu0 %v7246_v20  ;;  %3817 = vmatprep.mubr.bf16.mxu1 %v7246_v20 }
 0x5f1   : > { %3747 = vmatpush1.bf16.msra.mxu0 %v6487_v47  ;;  %3788 = vmatpush1.bf16.msra.mxu1 %v6489_v50  ;;  %v7402_v47 = vld [vmem:[#allocation39_spill] sm:$0xff]  ;;  %v7403_v50 = vld [vmem:[#allocation40_spill] sm:$0xff] }
 0x5f2   : > { %3748 = vmatprep.subr.bf16.mxu0 %v6493_v61  ;;  %3789 = vmatprep.subr.bf16.mxu1 %v6495_v49  ;;  %v7404_v61 = vld [vmem:[#allocation41_spill] sm:$0xff]  ;;  %v7405_v49 = vld [vmem:[#allocation42_spill] sm:$0xff] }
 0x5f5   : > { %3749 = vmatpush1.bf16.msra.mxu0 %v6501_v62  ;;  %3790 = vmatpush1.bf16.msra.mxu1 %v6503_v7  ;;  %v7406_v62 = vld [vmem:[#allocation43_spill] sm:$0xff]  ;;  %v7407_v7 = vld [vmem:[#allocation44_spill] sm:$0xff] }
 0x5f6   : > { %3750 = vmatprep.subr.bf16.mxu0 %v6507_v17  ;;  %3791 = vmatprep.subr.bf16.mxu1 %v6509_v55  ;;  %v7408_v17 = vld [vmem:[#allocation16_spill] sm:$0xff]  ;;  %v7409_v55 = vld [vmem:[#allocation17_spill] sm:$0xff] }
 0x5f9   : > { %3751 = vmatpush1.bf16.msra.mxu0 %v6513_v56  ;;  %3792 = vmatpush1.bf16.msra.mxu1 %v6515_v58  ;;  %v7410_v56 = vld [vmem:[#allocation18_spill] sm:$0xff]  ;;  %v7411_v58 = vld [vmem:[#allocation19_spill] sm:$0xff] }
 0x5fa   : > { %3752 = vmatprep.subr.bf16.mxu0 %v6519_v59  ;;  %3793 = vmatprep.subr.bf16.mxu1 %v6521_v60  ;;  %v7412_v59 = vld [vmem:[#allocation20_spill] sm:$0xff]  ;;  %v7413_v60 = vld [vmem:[#allocation75_spill] sm:$0xff] }
 0x5fd   : > { %3753 = vmatpush1.bf16.msra.mxu0 %v6525_v19  ;;  %3794 = vmatpush1.bf16.msra.mxu1 %v6527_v21  ;;  %v7414_v19 = vld [vmem:[#allocation76_spill] sm:$0xff]  ;;  %v7415_v21 = vld [vmem:[#allocation77_spill] sm:$0xff] }
 0x5fe   : > { %3754 = vmatprep.subr.bf16.mxu0 %v7396_v13  ;;  %3795 = vmatprep.subr.bf16.mxu1 %v7397_v36  ;;  %v7421_v13 = vld [vmem:[#allocation48_spill] sm:$0xff]  ;;  %v7422_v36 = vld [vmem:[#allocation49_spill] sm:$0xff] }
 0x601   : > { %3755 = vmatpush1.bf16.msra.mxu0 %v7398_v39  ;;  %3796 = vmatpush1.bf16.msra.mxu1 %v7399_v40  ;;  %v7423_v39 = vld [vmem:[#allocation50_spill] sm:$0xff]  ;;  %v7424_v40 = vld [vmem:[#allocation51_spill] sm:$0xff] }
 0x602   : > { %3756 = vmatprep.subr.bf16.mxu0 %v7400_v42  ;;  %3797 = vmatprep.subr.bf16.mxu1 %v7401_v43  ;;  %v7425_v42 = vld [vmem:[#allocation52_spill] sm:$0xff]  ;;  %v7426_v43 = vld [vmem:[#allocation53_spill] sm:$0xff] }
 0x605   : > { %3757 = vmatpush1.bf16.msra.mxu0 %v7402_v47  ;;  %3798 = vmatpush1.bf16.msra.mxu1 %v7403_v50  ;;  %v7427_v47 = vld [vmem:[#allocation54_spill] sm:$0xff]  ;;  %v7428_v50 = vld [vmem:[#allocation55_spill] sm:$0xff] }
 0x606   : > { %3758 = vmatprep.subr.bf16.mxu0 %v7404_v61  ;;  %3799 = vmatprep.subr.bf16.mxu1 %v7405_v49  ;;  %v7429_v61 = vld [vmem:[#allocation56_spill] sm:$0xff]  ;;  %v7430_v49 = vld [vmem:[#allocation57_spill] sm:$0xff] }
 0x609   : > { %3759 = vmatpush1.bf16.msra.mxu0 %v7406_v62  ;;  %3800 = vmatpush1.bf16.msra.mxu1 %v7407_v7  ;;  %v7431_v62 = vld [vmem:[#allocation58_spill] sm:$0xff]  ;;  %v7432_v7 = vld [vmem:[#allocation59_spill] sm:$0xff] }
 0x60a   : > { %4116 = vmatprep.subr.bf16.mxu0 %v6621_v16  ;;  %4157 = vmatprep.subr.bf16.mxu1 %v7408_v17  ;;  %v7416_v16 = vld [vmem:[#allocation78_spill] sm:$0xff]  ;;  %v7433_v17 = vld [vmem:[#allocation60_spill] sm:$0xff] }
 0x60c   : > { %3777 = vmatmul.mubr.bf16.vlgmr.msra.gmra.mrb[44].mxu0 %v2932_v33  ;;  %3818 = vmatmul.mubr.bf16.vlgmr.msra.gmra.mrb[44].mxu1 %v2932_v33  ;;  %v7420_v33 = vld [vmem:[#allocation47_spill] sm:$0xff] }
 0x60d   : > { %4117 = vmatpush1.bf16.msra.mxu0 %v7409_v55  ;;  %4158 = vmatpush1.bf16.msra.mxu1 %v7410_v56  ;;  %v7434_v55 = vld [vmem:[#allocation61_spill] sm:$0xff]  ;;  %v7435_v56 = vld [vmem:[#allocation62_spill] sm:$0xff] }
 0x60e   : > { %4118 = vmatprep.subr.bf16.mxu0 %v7411_v58  ;;  %4159 = vmatprep.subr.bf16.mxu1 %v7412_v59  ;;  %v7436_v58 = vld [vmem:[#allocation63_spill] sm:$0xff]  ;;  %v7437_v59 = vld [vmem:[#allocation64_spill] sm:$0xff] }
 0x60f   : > { %4148 = vmatprep.mubr.bf16.mxu0 %v7246_v20  ;;  %4189 = vmatprep.mubr.bf16.mxu1 %v7246_v20 }
 0x611   : > { %4119 = vmatpush1.bf16.msra.mxu0 %v7413_v60  ;;  %4160 = vmatpush1.bf16.msra.mxu1 %v7414_v19  ;;  %v7438_v60 = vld [vmem:[#allocation65_spill] sm:$0xff]  ;;  %v7439_v19 = vld [vmem:[#allocation66_spill] sm:$0xff] }
 0x612   : > { %4120 = vmatprep.subr.bf16.mxu0 %v7415_v21  ;;  %4161 = vmatprep.subr.bf16.mxu1 %v7416_v16  ;;  %v7440_v21 = vld [vmem:[#allocation67_spill] sm:$0xff] }
 0x615   : > { %4121 = vmatpush1.bf16.msra.mxu0 %v7417_v29  ;;  %4162 = vmatpush1.bf16.msra.mxu1 %v7418_v44 }
 0x616   : > { %4122 = vmatprep.subr.bf16.mxu0 %v7419_v6  ;;  %4163 = vmatprep.subr.bf16.mxu1 %v7420_v33 }
 0x619   : > { %4123 = vmatpush1.bf16.msra.mxu0 %v7421_v13  ;;  %4164 = vmatpush1.bf16.msra.mxu1 %v7422_v36 }
 0x61a   : > { %4124 = vmatprep.subr.bf16.mxu0 %v7423_v39  ;;  %4165 = vmatprep.subr.bf16.mxu1 %v7424_v40 }
 0x61d   : > { %4125 = vmatpush1.bf16.msra.mxu0 %v7425_v42  ;;  %4166 = vmatpush1.bf16.msra.mxu1 %v7426_v43 }
 0x61e   : > { %4126 = vmatprep.subr.bf16.mxu0 %v7427_v47  ;;  %4167 = vmatprep.subr.bf16.mxu1 %v7428_v50 }
 0x621   : > { %4127 = vmatpush1.bf16.msra.mxu0 %v7429_v61  ;;  %4168 = vmatpush1.bf16.msra.mxu1 %v7430_v49 }
 0x622   : > { %4128 = vmatprep.subr.bf16.mxu0 %v7431_v62  ;;  %4169 = vmatprep.subr.bf16.mxu1 %v7432_v7 }
 0x625   : > { %4129 = vmatpush1.bf16.msra.mxu0 %v7433_v17  ;;  %4170 = vmatpush1.bf16.msra.mxu1 %v7434_v55  ;;  %v7441_v55 = vld [vmem:[#allocation29_spill] sm:$0xff] }
 0x626   : > { %4130 = vmatprep.subr.bf16.mxu0 %v7435_v56  ;;  %4171 = vmatprep.subr.bf16.mxu1 %v7436_v58 }
 0x629   : > { %4131 = vmatpush1.bf16.msra.mxu0 %v7437_v59  ;;  %4172 = vmatpush1.bf16.msra.mxu1 %v7438_v60  ;;  %v7442_v60 = vld [vmem:[#allocation30_spill] sm:$0xff] }
 0x62a   : > { %4358 = vmatprep.subr.bf16.mxu0 %v7439_v19  ;;  %4399 = vmatprep.subr.bf16.mxu1 %v7440_v21  ;;  %v7443_v21 = vld [vmem:[#allocation31_spill] sm:$0xff] }
 0x69f   : > { %v3193_v16 = vpop.f32.mrb[36].mxu0  ;;  %v3234_v29 = vpop.f32.mrb[36].mxu1 }
 0x6a0   : > { %v3195_v44 = vpop.f32.mrb[37].mxu0  ;;  %v3236_v6 = vpop.f32.mrb[37].mxu1 }
 0x6a1   : > { %v3197_v33 = vpop.f32.mrb[38].mxu0  ;;  %v3238_v13 = vpop.f32.mrb[38].mxu1 }
 0x6a2   : > { %v3198_v36 = vpop.f32.mrb[39].mxu0  ;;  %v3239_v39 = vpop.f32.mrb[39].mxu1 }
 0x6a3   : > { %v7444_v39 = vld [vmem:[#allocation32_spill] sm:$0xff] }
 0x6bf   : > { %v3435_v40 = vpop.f32.mrb[40].mxu0  ;;  %v3476_v42 = vpop.f32.mrb[40].mxu1 }
 0x6c0   : > { %v3436_v43 = vadd.f32 %v3435_v40, %v3193_v16  ;;  %v3477_v47 = vadd.f32 %v3476_v42, %v3234_v29  ;;  %v3437_v50 = vpop.f32.mrb[41].mxu0  ;;  %v3478_v61 = vpop.f32.mrb[41].mxu1 }
 0x6c1   : > { %v3438_v49 = vadd.f32 %v3437_v50, %v3195_v44  ;;  %v3479_v62 = vadd.f32 %v3478_v61, %v3236_v6  ;;  %v3439_v7 = vpop.f32.mrb[42].mxu0  ;;  %v3480_v17 = vpop.f32.mrb[42].mxu1 }
 0x6c2   : > { %v3483_v56 = vadd.f32 %v3436_v43, %v7441_v55  ;;  %v3440_v58 = vpop.f32.mrb[43].mxu0  ;;  %v3481_v59 = vpop.f32.mrb[43].mxu1  ;;  %v3485_v19 = vadd.f32 %v3477_v47, %v7442_v60  ;;  %v7445_v17 = vld [vmem:[#allocation25_spill] sm:$0xff] }
 0x6c3   : > { %v3484_v33 = vadd.f32 %v3438_v49, %v7443_v21  ;;  %v3486_v45 = vadd.f32 %v3479_v62, %v7444_v39  ;;  %v7446_v49 = vld [vmem:[#allocation26_spill] sm:$0xff]  ;;  %v7447_v39 = vld [vmem:[#allocation27_spill] sm:$0xff] }
 0x6c4   : > { %v3492_v13 = vmul.f32 %v3483_v56, %v3483_v56  ;;  %v3494_v40 = vmul.f32 %v3485_v19, %v3485_v19 }
 0x6c5   : > { %v3493_v36 = vmul.f32 %v3484_v33, %v3484_v33  ;;  %v3487_v16 = vadd.f32 %v3484_v33, %v3483_v56  ;;  %v3495_v6 = vmul.f32 %v3486_v45, %v3486_v45 }
 0x6c7   : > { %v3488_v29 = vadd.f32 %v3487_v16, %v3485_v19  ;;  %v3496_v42 = vadd.f32 %v3493_v36, %v3492_v13  ;;  %v7448_v13 = vld [vmem:[#allocation28_spill] sm:$0xff] }
 0x6c9   : > { %v3489_v44 = vadd.f32 %v3488_v29, %v3486_v45  ;;  %v3497_v50 = vadd.f32 %v3496_v42, %v3494_v40 }
 0x6cb   : > { %3490 = vadd.xlane.f32.xlu0 %v3489_v44  ;;  %v3498_v61 = vadd.f32 %v3497_v50, %v3495_v6 }
 0x6cd   : > { %3499 = vadd.xlane.f32.xlu1 %v3498_v61 }
 0x6df   : > { %v3778_v43 = vpop.f32.mrb[44].mxu0  ;;  %v3819_v7 = vpop.f32.mrb[44].mxu1 }
 0x6e0   : > { %v6922_v47 = vadd.f32 %v3778_v43, %v7445_v17  ;;  %v6925_v58 = vadd.f32 %v3819_v7, %v7446_v49  ;;  %v3780_v59 = vpop.f32.mrb[45].mxu0  ;;  %v3821_v62 = vpop.f32.mrb[45].mxu1 }
 0x6e1   : > { %v6928_v16 = vadd.f32 %v3780_v59, %v7447_v39  ;;  %v6931_v36 = vadd.f32 %v3821_v62, %v7448_v13  ;;  %v3782_v29 = vpop.f32.mrb[46].mxu0  ;;  %v3823_v40 = vpop.f32.mrb[46].mxu1 }
 0x6e2   : > { %v3835_v42 = vmul.f32 %v6922_v47, %v6922_v47  ;;  %v3783_v44 = vpop.f32.mrb[47].mxu0  ;;  %v3824_v6 = vpop.f32.mrb[47].mxu1  ;;  %v3837_v39 = vmul.f32 %v6925_v58, %v6925_v58 }
 0x6e3   : > { %v3830_v50 = vadd.f32 %v6928_v16, %v6922_v47  ;;  %v3836_v61 = vmul.f32 %v6928_v16, %v6928_v16  ;;  %v3838_v49 = vmul.f32 %v6931_v36, %v6931_v36 }
 0x6e5   : > { %v3831_v43 = vadd.f32 %v3830_v50, %v6925_v58  ;;  %v3839_v7 = vadd.f32 %v3836_v61, %v3835_v42 }
 0x6e7   : > { %v3832_v17 = vadd.f32 %v3831_v43, %v6931_v36  ;;  %v3840_v59 = vadd.f32 %v3839_v7, %v3837_v39 }
 0x6e9   : > { %3833 = vadd.xlane.f32.xlu0 %v3832_v17  ;;  %v3841_v62 = vadd.f32 %v3840_v59, %v3838_v49 }
 0x6eb   : > { %3842 = vadd.xlane.f32.xlu1 %v3841_v62 }
 0x758   : > { %v3491_v13 = vpop.xlane.xlu0 %3490 }
 0x759   : > { %v3501_v29 = vmul.f32 0.001953125, %v3491_v13 }
 0x75a   : > { %v3500_v40 = vpop.xlane.xlu1 %3499 }
 0x75b   : > { %v3502_v44 = vmul.f32 0.001953125, %v3500_v40  ;;  %v3503_v6 = vmul.f32 %v3501_v29, %v3501_v29  ;;  %v3506_v55 = vsub.f32 %v3484_v33, %v3501_v29  ;;  %v3508_v42 = vsub.f32 %v3486_v45, %v3501_v29 }
 0x75c   : > { %v3505_v43 = vsub.f32 %v3483_v56, %v3501_v29  ;;  %v3507_v59 = vsub.f32 %v3485_v19, %v3501_v29 }
 0x75d   : > { %v3504_v21 = vsub.f32 %v3502_v44, %v3503_v6 }
 0x75f   : > { %v3509_v60 = vadd.f32 1e-05, %v3504_v21 }
 0x761   : > { %5483 = vrsqrt.f32 %v3509_v60 }
 0x76b   : > { %v5484_v50 = vpop.eup %5483 }
 0x76c   : > { %v3512_v61 = vmul.f32 %v5484_v50, %v3506_v55  ;;  %v3514_v46 = vmul.f32 %v5484_v50, %v3508_v42  ;;  %v3511_v39 = vmul.f32 %v5484_v50, %v3505_v43  ;;  %v3513_v13 = vmul.f32 %v5484_v50, %v3507_v59 }
 0x76e   : > { %v3516_v12 = vmul.f32 %v3512_v61, %v6383_v0  ;;  %v3518_v17 = vmul.f32 %v3514_v46, %v6391_v3  ;;  %v3515_v62 = vmul.f32 %v3511_v39, %v6394_v8  ;;  %v3517_v33 = vmul.f32 %v3513_v13, %v6407_v28 }
 0x770   : > { %v3520_v7 = vadd.f32 %v3516_v12, %v6386_v2  ;;  %v3522_v21 = vadd.f32 %v3518_v17, %v6398_v53  ;;  %v3519_v56 = vadd.f32 %v3515_v62, %v6403_v23  ;;  %v3521_v19 = vadd.f32 %v3517_v33, %v6412_v37 }
 0x772   : > { %v4934_v49 = vmul.f32 -1.442695, %v3520_v7  ;;  %v4935_v12 = vmul.f32 -1.442695, %v3522_v21  ;;  %v3523_v46 = vmul.f32 1.442695, %v3519_v56 }
 0x774   : > { %5485 = vpow2.f32 %v4934_v49 }
 0x775   : > { %5487 = vpow2.f32 %v4935_v12 }
 0x776   : > { %v3834_v60 = vpop.xlane.xlu0 %3833 }
 0x777   : > { %v3844_v45 = vmul.f32 0.001953125, %v3834_v60 }
 0x778   : > { %v3843_v55 = vpop.xlane.xlu1 %3842 }
 0x779   : > { %v3845_v40 = vmul.f32 0.001953125, %v3843_v55  ;;  %v3846_v44 = vmul.f32 %v3844_v45, %v3844_v45  ;;  %v3849_v43 = vsub.f32 %v6928_v16, %v3844_v45  ;;  %v3851_v59 = vsub.f32 %v6931_v36, %v3844_v45 }
 0x77a   : > { %v3848_v60 = vsub.f32 %v6922_v47, %v3844_v45 }
 0x77b   : > { %v3847_v6 = vsub.f32 %v3845_v40, %v3846_v44 }
 0x77d   : > { %v3852_v29 = vadd.f32 1e-05, %v3847_v6  ;;  %v3850_v6 = vsub.f32 %v6925_v58, %v3844_v45 }
 0x77e   : > { %v5486_v50 = vpop.eup %5485 }
 0x77f   : > { %5489 = vrsqrt.f32 %v3852_v29  ;;  %v3528_v42 = vadd.f32 1.0, %v5486_v50  ;;  %v5488_v61 = vpop.eup %5487 }
 0x780   : > { %5491 = vpow2.f32 %v3523_v46  ;;  %v3535_v13 = vadd.f32 1.0, %v5488_v61 }
 0x781   : > { %5493 = vtanh.f32 %v3521_v19 }
 0x782   : > { %5495 = vrcp.f32 %v3528_v42 }
 0x783   : > { %5497 = vrcp.f32 %v3535_v13 }
 0x789   : > { %v5490_v39 = vpop.eup %5489 }
 0x78a   : > { %v5492_v7 = vpop.eup %5491  ;;  %v3855_v17 = vmul.f32 %v5490_v39, %v3849_v43  ;;  %v3857_v33 = vmul.f32 %v5490_v39, %v3851_v59  ;;  %v3854_v40 = vmul.f32 %v5490_v39, %v3848_v60 }
 0x78b   : > { %v5494_v49 = vpop.eup %5493 }
 0x78c   : > { %v5496_v62 = vpop.eup %5495  ;;  %v3859_v21 = vmul.f32 %v3855_v17, %v7299_v57  ;;  %v3540_v56 = vmul.f32 %v5494_v49, %v5492_v7  ;;  %v3861_v36 = vmul.f32 %v3857_v33, %v7301_v34  ;;  %v3858_v47 = vmul.f32 %v3854_v40, %v6239_v9  ;;  %v7460_v17 = vld [vmem:[#allocation80_spill] sm:$0xff]  ;;  %v7461_v49 = vld [vmem:[#allocation81_spill] sm:$0xff] }
 0x78d   : > { %v3539_v55 = vmul.f32 %v5496_v62, %v6741_v14  ;;  %v3856_v57 = vmul.f32 %v5490_v39, %v3850_v6  ;;  %v5498_v29 = vpop.eup %5497 }
 0x78e   : > { %v3863_v44 = vadd.f32 %v3859_v21, %v7300_v10  ;;  %v3865_v14 = vadd.f32 %v3861_v36, %v7302_v22  ;;  %v3862_v46 = vadd.f32 %v3858_v47, %v7303_v63  ;;  %v7449_v63 = vld [vmem:[#allocation68_spill] sm:$0xff] }
 0x78f   : > { %v6959_v16 = vadd.f32 %v3540_v56, %v3539_v55  ;;  %v3860_v10 = vmul.f32 %v3856_v57, %v6252_v4 }
 0x790   : > { %v4968_v12 = vmul.f32 -1.442695, %v3863_v44  ;;  %v4969_v19 = vmul.f32 -1.442695, %v3865_v14  ;;  %v3866_v50 = vmul.f32 1.442695, %v3862_v46 }
 0x791   : > { %5499 = vtanh.f32 %v6959_v16  ;;  %v3864_v58 = vadd.f32 %v3860_v10, %v6257_v18  ;;  %v7462_v14 = vld [vmem:[#allocation29_spill] sm:$0xff] }
 0x792   : > { %5501 = vpow2.f32 %v4968_v12 }
 0x793   : > { %5503 = vpow2.f32 %v4969_v19 }
 0x794   : > { %5505 = vpow2.f32 %v3866_v50 }
 0x795   : > { %5507 = vtanh.f32 %v3864_v58 }
 0x79b   : > { %v5500_v42 = vpop.eup %5499 }
 0x79c   : > { %v3543_v45 = vmul.f32 %v5500_v42, %v5498_v29  ;;  %v5502_v61 = vpop.eup %5501  ;;  %v7463_v29 = vld [vmem:[#allocation30_spill] sm:$0xff]  ;;  %v7464_v42 = vld [vmem:[#allocation31_spill] sm:$0xff] }
 0x79d   : > { %v3871_v9 = vadd.f32 1.0, %v5502_v61  ;;  %v5504_v4 = vpop.eup %5503 }
 0x79e   : > { %v3923_v34 = vpack.c.bf16 %v3543_v45, %v3543_v45  ;;  %v5506_v18 = vpop.eup %5505 }
 0x79f   : > { %5509 = vrcp.f32 %v3871_v9  ;;  %v5508_v22 = vpop.eup %5507 }
 0x7a0   : > { %4149 = vmatmul.mubr.bf16.vlgmr.msra.gmra.mrb[48].mxu0 %v3923_v34  ;;  %4190 = vmatmul.mubr.bf16.vlgmr.msra.gmra.mrb[48].mxu1 %v3923_v34  ;;  %v7465_v34 = vld [vmem:[#allocation32_spill] sm:$0xff] }
 0x7a1   : > { %4359 = vmatpush1.bf16.msra.mxu0 %v6751_v24  ;;  %4400 = vmatpush1.bf16.msra.mxu1 %v6753_v11  ;;  %v7450_v24 = vld [vmem:[#allocation69_spill] sm:$0xff] }
 0x7a2   : > { %4360 = vmatprep.subr.bf16.mxu0 %v6755_v1  ;;  %4401 = vmatprep.subr.bf16.mxu1 %v6757_v54  ;;  %v7451_v1 = vld [vmem:[#allocation70_spill] sm:$0xff] }
 0x7a3   : > { %4390 = vmatprep.mubr.bf16.mxu0 %v7246_v20  ;;  %4431 = vmatprep.mubr.bf16.mxu1 %v7246_v20  ;;  %v3878_v20 = vadd.f32 1.0, %v5504_v4 }
 0x7a5   : > { %4361 = vmatpush1.bf16.msra.mxu0 %v6761_v25  ;;  %4402 = vmatpush1.bf16.msra.mxu1 %v6763_v48  ;;  %v3883_v25 = vmul.f32 %v5508_v22, %v5506_v18  ;;  %5511 = vrcp.f32 %v3878_v20 }
 0x7a6   : > { %4362 = vmatprep.subr.bf16.mxu0 %v6767_v27  ;;  %4403 = vmatprep.subr.bf16.mxu1 %v6769_v51  ;;  %v7452_v27 = vld [vmem:[#allocation71_spill] sm:$0xff]  ;;  %v7453_v51 = vld [vmem:[#allocation72_spill] sm:$0xff] }
 0x7a9   : > { %4363 = vmatpush1.bf16.msra.mxu0 %v7449_v63  ;;  %4404 = vmatpush1.bf16.msra.mxu1 %v7450_v24  ;;  %v5510_v11 = vpop.eup %5509 }
 0x7aa   : > { %4364 = vmatprep.subr.bf16.mxu0 %v6781_v35  ;;  %4405 = vmatprep.subr.bf16.mxu1 %v7451_v1  ;;  %v3882_v54 = vmul.f32 %v5510_v11, %v6804_v15  ;;  %v7454_v15 = vld [vmem:[#allocation73_spill] sm:$0xff]  ;;  %v7455_v35 = vld [vmem:[#allocation74_spill] sm:$0xff] }
 0x7ac   : > { %v3884_v48 = vadd.f32 %v3883_v25, %v3882_v54 }
 0x7ad   : > { %4365 = vmatpush1.bf16.msra.mxu0 %v6787_v26  ;;  %4406 = vmatpush1.bf16.msra.mxu1 %v6789_v31  ;;  %v7456_v26 = vld [vmem:[#allocation21_spill] sm:$0xff]  ;;  %v7457_v31 = vld [vmem:[#allocation22_spill] sm:$0xff] }
 0x7ae   : > { %4366 = vmatprep.subr.bf16.mxu0 %v6793_v52  ;;  %4407 = vmatprep.subr.bf16.mxu1 %v6795_v38  ;;  %5513 = vtanh.f32 %v3884_v48  ;;  %3887 = vst [vmem:[#allocation10] sm:$0xff] %v3884_v48  ;;  %v7458_v52 = vld [vmem:[#allocation23_spill] sm:$0xff] }
 0x7af   : > { %v5512_v38 = vpop.eup %5511 }
 0x7b1   : > { %4367 = vmatpush1.bf16.msra.mxu0 %v6800_v5  ;;  %4408 = vmatpush1.bf16.msra.mxu1 %v7452_v27  ;;  %v7459_v5 = vld [vmem:[#allocation24_spill] sm:$0xff] }
 0x7b2   : > { %4368 = vmatprep.subr.bf16.mxu0 %v7453_v51  ;;  %4409 = vmatprep.subr.bf16.mxu1 %v7454_v15 }
 0x7b5   : > { %4369 = vmatpush1.bf16.msra.mxu0 %v7455_v35  ;;  %4410 = vmatpush1.bf16.msra.mxu1 %v7456_v26 }
 0x7b6   : > { %4370 = vmatprep.subr.bf16.mxu0 %v7457_v31  ;;  %4411 = vmatprep.subr.bf16.mxu1 %v7458_v52 }
 0x7b8   : > { %v5514_v43 = vpop.eup %5513 }
 0x7b9   : > { %4371 = vmatpush1.bf16.msra.mxu0 %v6827_v41  ;;  %4412 = vmatpush1.bf16.msra.mxu1 %v6829_v32  ;;  %v3886_v39 = vmul.f32 %v5514_v43, %v5512_v38 }
 0x7ba   : > { %4372 = vmatprep.subr.bf16.mxu0 %v6833_v30  ;;  %4413 = vmatprep.subr.bf16.mxu1 %v7459_v5 }
 0x7bb   : > { %v3889_v7 = vpack.c.bf16 %v3886_v39, %v3886_v39  ;;  %3888 = vst [vmem:[#allocation9] sm:$0xff] %v3886_v39 }
 0x7bd   : > { %4373 = vmatpush1.bf16.msra.mxu0 %v7460_v17  ;;  %4414 = vmatpush1.bf16.msra.mxu1 %v7461_v49 }
 0x7c0   : > { %4391 = vmatmul.mubr.bf16.vlgmr.msra.gmra.mrb[52].mxu0 %v3889_v7  ;;  %4432 = vmatmul.mubr.bf16.vlgmr.msra.gmra.mrb[52].mxu1 %v3889_v7 }
 0x873   : > { %v4150_v59 = vpop.f32.mrb[48].mxu0  ;;  %v4191_v62 = vpop.f32.mrb[48].mxu1 }
 0x874   : > { %v4152_v13 = vpop.f32.mrb[49].mxu0  ;;  %v4193_v60 = vpop.f32.mrb[49].mxu1 }
 0x875   : > { %v4154_v41 = vpop.f32.mrb[50].mxu0  ;;  %v4195_v21 = vpop.f32.mrb[50].mxu1 }
 0x876   : > { %v4155_v32 = vpop.f32.mrb[51].mxu0  ;;  %v4196_v55 = vpop.f32.mrb[51].mxu1 }
 0x893   : > { %v4392_v30 = vpop.f32.mrb[52].mxu0  ;;  %v4433_v56 = vpop.f32.mrb[52].mxu1 }
 0x894   : > { %v4393_v33 = vadd.f32 %v4392_v30, %v4150_v59  ;;  %v4434_v40 = vadd.f32 %v4433_v56, %v4191_v62  ;;  %v4394_v44 = vpop.f32.mrb[53].mxu0  ;;  %v4435_v12 = vpop.f32.mrb[53].mxu1 }
 0x895   : > { %v4395_v6 = vadd.f32 %v4394_v44, %v4152_v13  ;;  %v4436_v36 = vadd.f32 %v4435_v12, %v4193_v60  ;;  %v4396_v47 = vpop.f32.mrb[54].mxu0  ;;  %v4437_v57 = vpop.f32.mrb[54].mxu1 }
 0x896   : > { %v4440_v46 = vadd.f32 %v4393_v33, %v7462_v14  ;;  %v4397_v10 = vpop.f32.mrb[55].mxu0  ;;  %v4438_v19 = vpop.f32.mrb[55].mxu1  ;;  %v4442_v50 = vadd.f32 %v4434_v40, %v7463_v29 }
 0x897   : > { %v4441_v58 = vadd.f32 %v4395_v6, %v7464_v42  ;;  %v4443_v9 = vadd.f32 %v4436_v36, %v7465_v34 }
 0x898   : > { %v4449_v45 = vmul.f32 %v4440_v46, %v4440_v46  ;;  %v4451_v22 = vmul.f32 %v4442_v50, %v4442_v50 }
 0x899   : > { %v4450_v61 = vmul.f32 %v4441_v58, %v4441_v58  ;;  %v4444_v4 = vadd.f32 %v4441_v58, %v4440_v46  ;;  %v4452_v11 = vmul.f32 %v4443_v9, %v4443_v9 }
 0x89b   : > { %v4445_v18 = vadd.f32 %v4444_v4, %v4442_v50  ;;  %v4453_v63 = vadd.f32 %v4450_v61, %v4449_v45 }
 0x89d   : > { %v4446_v24 = vadd.f32 %v4445_v18, %v4443_v9  ;;  %v4454_v1 = vadd.f32 %v4453_v63, %v4451_v22 }
 0x89f   : > { %4447 = vadd.xlane.f32.xlu0 %v4446_v24  ;;  %v4455_v20 = vadd.f32 %v4454_v1, %v4452_v11 }
 0x8a1   : > { %4456 = vadd.xlane.f32.xlu1 %v4455_v20 }
 0x92c   : > { %v4448_v54 = vpop.xlane.xlu0 %4447 }
 0x92d   : > { %v4458_v25 = vmul.f32 0.001953125, %v4448_v54 }
 0x92e   : > { %v4457_v48 = vpop.xlane.xlu1 %4456 }
 0x92f   : > { %v4459_v27 = vmul.f32 0.001953125, %v4457_v48  ;;  %v4460_v51 = vmul.f32 %v4458_v25, %v4458_v25  ;;  %v4463_v26 = vsub.f32 %v4441_v58, %v4458_v25  ;;  %v4465_v38 = vsub.f32 %v4443_v9, %v4458_v25 }
 0x930   : > { %v4462_v43 = vsub.f32 %v4440_v46, %v4458_v25  ;;  %v4464_v59 = vsub.f32 %v4442_v50, %v4458_v25 }
 0x931   : > { %v4461_v15 = vsub.f32 %v4459_v27, %v4460_v51 }
 0x933   : > { %v4466_v35 = vadd.f32 1e-05, %v4461_v15 }
 0x935   : > { %5515 = vrsqrt.f32 %v4466_v35 }
 0x93f   : > { %v5516_v31 = vpop.eup %5515 }
 0x940   : > { %v4469_v52 = vmul.f32 %v5516_v31, %v4463_v26  ;;  %v4471_v39 = vmul.f32 %v5516_v31, %v4465_v38  ;;  %v4468_v7 = vmul.f32 %v5516_v31, %v4462_v43  ;;  %v4470_v60 = vmul.f32 %v5516_v31, %v4464_v59 }
 0x942   : > { %v4473_v5 = vmul.f32 %v4469_v52, %v6383_v0  ;;  %v4475_v62 = vmul.f32 %v4471_v39, %v6391_v3  ;;  %v4472_v13 = vmul.f32 %v4468_v7, %v6394_v8  ;;  %v4474_v32 = vmul.f32 %v4470_v60, %v6407_v28 }
 0x944   : > { %v4477_v17 = vadd.f32 %v4473_v5, %v6386_v2  ;;  %v4479_v41 = vadd.f32 %v4475_v62, %v6398_v53  ;;  %v4476_v21 = vadd.f32 %v4472_v13, %v6403_v23  ;;  %v4478_v30 = vadd.f32 %v4474_v32, %v6412_v37 }
 0x946   : > { %v5034_v49 = vmul.f32 -1.442695, %v4477_v17  ;;  %v5035_v55 = vmul.f32 -1.442695, %v4479_v41  ;;  %v4480_v0 = vmul.f32 1.442695, %v4476_v21 }
 0x948   : > { %5517 = vpow2.f32 %v5034_v49 }
 0x949   : > { %5519 = vpow2.f32 %v5035_v55 }
 0x94a   : > { %5521 = vpow2.f32 %v4480_v0 }
 0x94b   : > { %5523 = vtanh.f32 %v4478_v30 }
 0x952   : > { %v5518_v2 = vpop.eup %5517 }
 0x953   : > { %v4485_v56 = vadd.f32 1.0, %v5518_v2  ;;  %v5520_v3 = vpop.eup %5519 }
 0x954   : > { %v5522_v8 = vpop.eup %5521  ;;  %v4492_v40 = vadd.f32 1.0, %v5520_v3 }
 0x955   : > { %5525 = vrcp.f32 %v4485_v56  ;;  %v5524_v33 = vpop.eup %5523 }
 0x956   : > { %v4497_v28 = vmul.f32 %v5524_v33, %v5522_v8  ;;  %5527 = vrcp.f32 %v4492_v40 }
 0x95f   : > { %v5526_v53 = vpop.eup %5525 }
 0x960   : > { %v4496_v23 = vmul.f32 %v5526_v53, %v6959_v16 }
 0x962   : > { %v4498_v37 = vadd.f32 %v4497_v28, %v4496_v23 }
 0x964   : > { %5529 = vtanh.f32 %v4498_v37  ;;  %4501 = vst [vmem:[#allocation10 + $0x8] sm:$0xff] %v4498_v37 }
 0x965   : > { %5637 = shalt.err (!%p5634_p2)
}
 0x966   : > { %s5638_s20 = scalar_lea.hbm %s7071_s8, 256 }
 0x967   : > { %p5639_p8 = scmp.ne.s32.totalorder %s7071_s8, %s5638_s20  ;;  %p5644_p7 = scmp.lt.u32.totalorder %s5638_s20, %s7071_s8 }
 0x969   : > { %p5640_p3 = pnand %p5639_p8, %p5078_p10 }
 0x96b   : > { %p5641_p4 = pneg %p5640_p3 }
 0x96d   : > { %p5646_p9 = pnand %p5644_p7, %p5641_p4 }
 0x96f   : > { %5649 = shalt.err (!%p5646_p9)
}
 0x970   : > { %s5708_s9 = smov 128   ;;  %s5709_s21 = smov 8   ;;  %v5528_v16 = vpop.eup %5527 }
 0x971   : > { %5057 = dma.vmem_to_hbm [thread:$0]  (%p5078_p10), %s4523_s17, 256, %s7071_s8, [#allocation11], %s5708_s9, %s5708_s9, %s5709_s21   ;;  %v5530_v44 = vpop.eup %5529 }
 0x972   : > { %s5710_s26 = smov [#allocation9]   ;;  %v4500_v12 = vmul.f32 %v5530_v44, %v5528_v16 }
 0x973   : > { %s4509_s30 = sshll.u32 %s5710_s26, 4  ;;  %s4510_s30 = int_to_ptr.vmem [resolvable:$true] %s4509_s30 }
 0x974   : > { %4502 = vst [vmem:[#allocation9 + $0x8] sm:$0xff] %v4500_v12  ;;  %s5650_s10 = scalar_lea.vmem %s4510_s30, 256  ;;  %p5657_p13 = scmp.lt.s32.totalorder %s4510_s30, %s4510_s30 }
 0x975   : > { %p5651_p6 = scmp.ne.s32.totalorder %s4510_s30, %s5650_s10  ;;  %p5658_p0 = scmp.lt.s32.totalorder %s5650_s10, %s5650_s10 }
 0x977   : > { %p5652_p11 = pnand %p5651_p6, %p5078_p10  ;;  %p5659_p1 = por %p5658_p0, %p5657_p13 }
 0x979   : > { %p5653_p12 = pneg %p5652_p11 }
 0x97b   : > { %p5660_p5 = pnand %p5659_p1, %p5653_p12 }
 0x97d   : > { %5663 = shalt.err (!%p5660_p5)
}
 0x97e   : > { %s5664_s16 = scalar_lea.hbm %s7070_s7, 256 }
 0x97f   : > { %p5665_p2 = scmp.ne.s32.totalorder %s7070_s7, %s5664_s16  ;;  %p5670_p4 = scmp.lt.u32.totalorder %s5664_s16, %s7070_s7 }
 0x981   : > { %p5666_p8 = pnand %p5665_p2, %p5078_p10 }
 0x983   : > { %p5667_p3 = pneg %p5666_p8 }
 0x985   : > { %p5672_p7 = pnand %p5670_p4, %p5667_p3 }
 0x987   : > { %5675 = shalt.err (!%p5672_p7)
}
 0x988   : > { %5055 = dma.vmem_to_hbm [thread:$0]  (%p5078_p10), %s4510_s30, 256, %s7070_s7, [#allocation5], %s5708_s9, %s5708_s9, %s5709_s21  }
 0x989   : > { %5689 = dma.done.wait (%p5078_p10), [#allocation5], 256  }
 0x98a   : > { %5691 = vsyncadd (%p5078_p10), [#allocation5], 4294967040 }
 0x98b   : > { %5693 = dma.done.wait (%p5078_p10), [#allocation11], 256  }
 0x98c   : > { %5695 = vsyncadd (%p5078_p10), [#allocation11], 4294967040 }
 0x98d PF: > { %s23_s27 = sadd.s32 1, %s5698_s27  }
 0x98e   : > { %p20_p9 = scmp.ge.s32.totalorder %s23_s27, 4  }
 0x990   :  { %22 = sbr.rel (!%p20_p9) target bundleno = 4 (0x4), region = 106 }
 0x997   :  { %4542 = vsyncpa [#allocation4], 1 }
 0x998   :  { %4544 = vsyncpa [#allocation4 + $0x1], 1 }
 0x999   :  { %4545 = vsyncpa [#allocation7], 1 }
 0x99a   :  { %4546 = vsyncpa [#allocation5], 1 }
 0x99b   :  { %4548 = vsyncpa [#allocation5 + $0x1], 1 }
 0x99c   :  { %4549 = vsyncpa [#allocation11], 1 }

</bundles_post_ra>
